<compile_context>
chip_gen: v7x
topology: tpu7x:2x2x1
jax: 0.10.0
libtpu: 0.0.40
codegen_flags: <defaults>
</compile_context>

<pallas_src>
import math
import functools

import jax
import jax.numpy as jnp
from jax import lax
from jax.experimental import pallas as pl
from jax.experimental.pallas import tpu as pltpu


# ----------------------------------------------------------------------------
# tiling helpers
# ----------------------------------------------------------------------------

# Preferred tiles (bf16 inputs + f32 acc): double-buffered blocks stay well under
# the scoped-VMEM budget on v5e/v6e/v7x; 256/512 are multiples of 128 so they map
# onto both the 4x128^2 (v5e) and 2x256^2 (v6e/v7x) MXUs.
_TM, _TN, _TK = 256, 256, 512
_TROWS = 512                     # row tile for layernorm kernels
_VMEM_LIMIT = 32 * 1024 * 1024   # safe scoped-VMEM ceiling on every generation


def _round_up(x, m):
    return ((x + m - 1) // m) * m


def _tile(dim, pref):
    """Full-extent block if it fits the preferred tile, else the preferred tile."""
    if dim <= pref:
        return dim, dim
    return pref, _round_up(dim, pref)


# ----------------------------------------------------------------------------
# Pallas kernels
# ----------------------------------------------------------------------------

def _matmul_kernel(x_ref, w_ref, b_ref, o_ref, acc_ref, *, activation):
    """Tiled y = x @ w + b with fused activation; f32 accumulation over K."""
    k = pl.program_id(2)

    @pl.when(k == 0)
    def _():
        acc_ref[...] = jnp.zeros_like(acc_ref)

    acc_ref[...] += jnp.dot(x_ref[...], w_ref[...],
                            preferred_element_type=jnp.float32)

    @pl.when(k == pl.num_programs(2) - 1)
    def _():
        y = acc_ref[...] + b_ref[...]
        if activation == "relu":
            y = jnp.maximum(y, 0.0)
        elif activation == "gelu":
            # tanh-approx GELU (BERT activation).
            # TODO(synk): HF BERT default is exact erf-GELU; tanh approx kept.
            c = math.sqrt(2.0 / math.pi)
            y = 0.5 * y * (1.0 + jnp.tanh(c * (y + 0.044715 * (y ** 3))))
        o_ref[...] = y.astype(o_ref.dtype)


def linear(x, w, b, activation="none"):
    """x: (..., K) -> (..., N).  bf16 MXU inputs, f32 accumulation/output."""
    K, N = w.shape
    orig = x.shape
    xf = x.reshape(-1, K)
    M = xf.shape[0]

    tm, Mp = _tile(M, _TM)
    tn, Np = _tile(N, _TN)
    tk, Kp = _tile(K, _TK)

    xb = xf.astype(jnp.bfloat16)
    wb = w.astype(jnp.bfloat16)
    bb = b.reshape(1, N).astype(jnp.float32)
    if (Mp, Kp) != (M, K):
        xb = jnp.pad(xb, ((0, Mp - M), (0, Kp - K)))
    if (Kp, Np) != (K, N):
        wb = jnp.pad(wb, ((0, Kp - K), (0, Np - N)))
    if Np != N:
        bb = jnp.pad(bb, ((0, 0), (0, Np - N)))

    out = pl.pallas_call(
        functools.partial(_matmul_kernel, activation=activation),
        out_shape=jax.ShapeDtypeStruct((Mp, Np), jnp.float32),
        grid=(Mp // tm, Np // tn, Kp // tk),
        in_specs=[
            pl.BlockSpec((tm, tk), lambda i, j, k: (i, k)),
            pl.BlockSpec((tk, tn), lambda i, j, k: (k, j)),
            pl.BlockSpec((1, tn), lambda i, j, k: (0, j)),
        ],
        out_specs=pl.BlockSpec((tm, tn), lambda i, j, k: (i, j)),
        scratch_shapes=[pltpu.VMEM((tm, tn), jnp.float32)],
        compiler_params=pltpu.CompilerParams(
            dimension_semantics=("parallel", "parallel", "arbitrary"),
            vmem_limit_bytes=_VMEM_LIMIT),
    )(xb, wb, bb)

    if (Mp, Np) != (M, N):
        out = out[:M, :N]
    return out.reshape(orig[:-1] + (N,))


def _norm_math(x, g, b, eps, mode):
    mu = jnp.mean(x, axis=-1, keepdims=True)
    d = x - mu
    var = jnp.mean(d * d, axis=-1, keepdims=True)
    if mode == "bert":
        # BERT LayerNorm: (x - mu) / sqrt(var + eps)   (biased variance)
        y = d * lax.rsqrt(var + eps)
    else:
        # tutorial Norm: (x - mu) / (torch.std(x, -1) + eps)   (unbiased std)
        n = x.shape[-1]
        std = jnp.sqrt(var * (n / (n - 1)))
        y = d / (std + eps)
    return y * g + b


def _ln_kernel(x_ref, g_ref, b_ref, o_ref, *, eps, mode):
    o_ref[...] = _norm_math(x_ref[...], g_ref[...], b_ref[...], eps, mode)


def _add_ln_kernel(x_ref, d_ref, g_ref, b_ref, s_ref, n_ref, *, eps, mode):
    s = x_ref[...] + d_ref[...]
    s_ref[...] = s
    n_ref[...] = _norm_math(s, g_ref[...], b_ref[...], eps, mode)


def _add_ln_kernel_nosum(x_ref, d_ref, g_ref, b_ref, n_ref, *, eps, mode):
    s = x_ref[...] + d_ref[...]
    n_ref[...] = _norm_math(s, g_ref[...], b_ref[...], eps, mode)


def layernorm(x, gamma, beta, eps, mode):
    orig = x.shape
    D = orig[-1]
    xf = x.reshape(-1, D).astype(jnp.float32)
    M = xf.shape[0]
    tm, Mp = _tile(M, _TROWS)
    if Mp != M:
        xf = jnp.pad(xf, ((0, Mp - M), (0, 0)))
    out = pl.pallas_call(
        functools.partial(_ln_kernel, eps=eps, mode=mode),
        out_shape=jax.ShapeDtypeStruct((Mp, D), jnp.float32),
        grid=(Mp // tm,),
        in_specs=[pl.BlockSpec((tm, D), lambda i: (i, 0)),
                  pl.BlockSpec((1, D), lambda i: (0, 0)),
                  pl.BlockSpec((1, D), lambda i: (0, 0))],
        out_specs=pl.BlockSpec((tm, D), lambda i: (i, 0)),
        compiler_params=pltpu.CompilerParams(dimension_semantics=("parallel",)),
    )(xf, gamma.reshape(1, D), beta.reshape(1, D))
    if Mp != M:
        out = out[:M]
    return out.reshape(orig)


def add_layernorm(x, delta, gamma, beta, eps, mode, return_sum=True):
    """Fused residual add + layernorm.  Returns (x+delta, LN(x+delta)) or just LN."""
    orig = x.shape
    D = orig[-1]
    xf = x.reshape(-1, D).astype(jnp.float32)
    df = delta.reshape(-1, D).astype(jnp.float32)
    M = xf.shape[0]
    tm, Mp = _tile(M, _TROWS)
    if Mp != M:
        xf = jnp.pad(xf, ((0, Mp - M), (0, 0)))
        df = jnp.pad(df, ((0, Mp - M), (0, 0)))
    row_spec = pl.BlockSpec((tm, D), lambda i: (i, 0))
    vec_spec = pl.BlockSpec((1, D), lambda i: (0, 0))
    if return_sum:
        kernel = functools.partial(_add_ln_kernel, eps=eps, mode=mode)
        out_shape = (jax.ShapeDtypeStruct((Mp, D), jnp.float32),
                     jax.ShapeDtypeStruct((Mp, D), jnp.float32))
        out_specs = (row_spec, row_spec)
    else:
        kernel = functools.partial(_add_ln_kernel_nosum, eps=eps, mode=mode)
        out_shape = jax.ShapeDtypeStruct((Mp, D), jnp.float32)
        out_specs = row_spec
    res = pl.pallas_call(
        kernel,
        out_shape=out_shape,
        grid=(Mp // tm,),
        in_specs=[row_spec, row_spec, vec_spec, vec_spec],
        out_specs=out_specs,
        compiler_params=pltpu.CompilerParams(dimension_semantics=("parallel",)),
    )(xf, df, gamma.reshape(1, D), beta.reshape(1, D))
    if return_sum:
        s, n = res
        if Mp != M:
            s, n = s[:M], n[:M]
        return s.reshape(orig), n.reshape(orig)
    n = res
    if Mp != M:
        n = n[:M]
    return n.reshape(orig)


def _mha_kernel(q_ref, k_ref, v_ref, m_ref, o_ref, *, nh, dh, scale):
    """All heads of one batch element: softmax(q k^T * scale + mask) @ v."""
    m = m_ref[0]                                  # (1 or Sq, Sk) f32, broadcast over rows
    heads = []
    for h in range(nh):                           # static unroll over heads
        lo, hi = h * dh, (h + 1) * dh             # static lane slice of the H axis
        qh = q_ref[0, :, lo:hi]                   # (Sq, dh) bf16
        kh = k_ref[0, :, lo:hi]                   # (Sk, dh) bf16
        vh = v_ref[0, :, lo:hi]                   # (Sk, dh) bf16
        # contract last dims of q and k directly (no .T / XLU transpose)
        s = lax.dot_general(qh, kh, (((1,), (1,)), ((), ())),
                            preferred_element_type=jnp.float32) * scale + m
        s = s - jnp.max(s, axis=-1, keepdims=True)   # fully-masked rows -> uniform (matches torch)
        p = jnp.exp(s)
        p = p * pl.reciprocal(jnp.sum(p, axis=-1, keepdims=True), approx=True)
        heads.append(jnp.dot(p.astype(vh.dtype), vh,
                             preferred_element_type=jnp.float32))
    # single lane-dense store of the merged heads
    o_ref[0] = jnp.concatenate(heads, axis=-1).astype(o_ref.dtype)


def attention(q, k, v, add_mask, nh):
    """q:(B,Sq,H) k,v:(B,Sk,H) add_mask:(B,1|Sq,Sk) additive float -> (B,Sq,H) f32."""
    B, Sq, H = q.shape
    Sk = k.shape[1]
    mq = add_mask.shape[1]
    dh = H // nh
    scale = 1.0 / math.sqrt(dh)
    return pl.pallas_call(
        functools.partial(_mha_kernel, nh=nh, dh=dh, scale=scale),
        out_shape=jax.ShapeDtypeStruct((B, Sq, H), jnp.float32),
        grid=(B,),
        in_specs=[
            pl.BlockSpec((1, Sq, H), lambda b: (b, 0, 0)),
            pl.BlockSpec((1, Sk, H), lambda b: (b, 0, 0)),
            pl.BlockSpec((1, Sk, H), lambda b: (b, 0, 0)),
            pl.BlockSpec((1, mq, Sk), lambda b: (b, 0, 0)),
        ],
        out_specs=pl.BlockSpec((1, Sq, H), lambda b: (b, 0, 0)),
        compiler_params=pltpu.CompilerParams(
            dimension_semantics=("parallel",),
            vmem_limit_bytes=_VMEM_LIMIT),
    )(q.astype(jnp.bfloat16), k.astype(jnp.bfloat16), v.astype(jnp.bfloat16),
      add_mask.astype(jnp.float32))


# ----------------------------------------------------------------------------
# Model glue (plain JAX around the Pallas hot paths)
# ----------------------------------------------------------------------------

def mha_self(p, x, add_mask, nh):
    """Self-attention with fused QKV projection.  add_mask: (B, 1|Sq, Sk) additive."""
    H = x.shape[-1]
    qkv = linear(x, p["wqkv"], p["bqkv"])          # one matmul for Q, K, V
    q, k, v = qkv[..., :H], qkv[..., H:2 * H], qkv[..., 2 * H:]
    ctx = attention(q, k, v, add_mask, nh)
    return linear(ctx, p["wo"], p["bo"])


def mha_cross(p, x, k, v, add_mask, nh):
    """Cross-attention; K/V are precomputed (projection hoisted out of the loop)."""
    q = linear(x, p["wq"], p["bq"])
    ctx = attention(q, k, v, add_mask, nh)
    return linear(ctx, p["wo"], p["bo"])


# ---------------- synthetic BERT ----------------

def bert_forward(p, ids, token_type_ids, attn_mask_2d, nh):
    B, S = ids.shape
    x = (p["word_emb"][ids]
         + p["pos_emb"][:S][None, :, :]
         + p["type_emb"][token_type_ids])
    x = layernorm(x, *p["emb_ln"], eps=1e-12, mode="bert")
    # BERT-style additive pad mask: (1 - mask) * -10000, broadcast over queries/heads.
    add_mask = ((1.0 - attn_mask_2d.astype(jnp.float32)) * -10000.0)[:, None, :]  # (B,1,S)
    for lyr in p["layers"]:
        attn_out = mha_self(lyr["attn"], x, add_mask, nh)
        x = add_layernorm(x, attn_out, *lyr["attn_ln"], eps=1e-12, mode="bert",
                          return_sum=False)
        inter = linear(x, *lyr["inter"], activation="gelu")
        out = linear(inter, *lyr["out"])
        x = add_layernorm(x, out, *lyr["out_ln"], eps=1e-12, mode="bert",
                          return_sum=False)
    # NOTE: BERT pooled output is discarded by the caller ("x, _ = self.bert(...)").
    return x


# ---------------- PositionalEncoder ----------------

def make_positional_table(max_len, d_model):
    pos = jnp.arange(max_len, dtype=jnp.float32)[:, None]
    i = jnp.arange(0, d_model, 2, dtype=jnp.float32)
    pe_sin = jnp.sin(pos / (10000.0 ** ((2.0 * i) / d_model)))
    pe_cos = jnp.cos(pos / (10000.0 ** ((2.0 * (i + 1.0)) / d_model)))
    return jnp.stack([pe_sin, pe_cos], axis=-1).reshape(max_len, d_model)


def positional_encode(x, pe_table, d_model):
    S = x.shape[1]
    return x * math.sqrt(d_model) + pe_table[:S][None, :, :]


# ---------------- Encoder / Decoder stacks ----------------

def feed_forward(p, x):
    return linear(linear(x, *p["lin1"], activation="relu"), *p["lin2"])


def encoder_forward(params, src_ids, src_type, src_mask, N, nh):
    x = bert_forward(params["bert"], src_ids, src_type, src_mask[:, 0, :], nh)
    x = positional_encode(x, params["pe"], x.shape[-1])
    add_src = jnp.where(src_mask == 0, -1e9, 0.0).astype(jnp.float32)      # (B,1,Ss)
    lp = params["enc_layer"]  # identical weights for all N clones
    if N == 0:
        return layernorm(x, *params["enc_norm"], eps=1e-6, mode="std")
    # pre-norm blocks; residual add is fused with the next norm (clone weights shared).
    x2 = layernorm(x, *lp["norm1"], eps=1e-6, mode="std")
    for i in range(N):
        attn = mha_self(lp["attn"], x2, add_src, nh)
        x, x2 = add_layernorm(x, attn, *lp["norm2"], eps=1e-6, mode="std")
        ff = feed_forward(lp["ff"], x2)
        if i + 1 < N:
            x, x2 = add_layernorm(x, ff, *lp["norm1"], eps=1e-6, mode="std")
        else:
            return add_layernorm(x, ff, *params["enc_norm"], eps=1e-6, mode="std",
                                 return_sum=False)


def decoder_forward(params, tgt_ids, tgt_type, tgt_mask, nopeak_mask,
                    enc_out, src_mask, N, nh):
    x = bert_forward(params["bert"], tgt_ids, tgt_type, tgt_mask[:, 0, :], nh)
    x = positional_encode(x, params["pe"], x.shape[-1])
    add_trg = jnp.where(nopeak_mask == 0, -1e9, 0.0).astype(jnp.float32)   # (B,St,St)
    add_src = jnp.where(src_mask == 0, -1e9, 0.0).astype(jnp.float32)      # (B,1,Ss)
    lp = params["dec_layer"]  # identical weights for all N clones
    H = x.shape[-1]
    if N == 0:
        return layernorm(x, *params["dec_norm"], eps=1e-6, mode="std")
    # All clones share weights, so the cross-attention K/V projection of enc_out
    # is identical for every layer: compute it once (fused K/V matmul).
    kv = linear(enc_out, lp["attn2"]["wkv"], lp["attn2"]["bkv"])
    kc, vc = kv[..., :H], kv[..., H:]
    x2 = layernorm(x, *lp["norm1"], eps=1e-6, mode="std")
    for i in range(N):
        a1 = mha_self(lp["attn1"], x2, add_trg, nh)
        x, x2 = add_layernorm(x, a1, *lp["norm2"], eps=1e-6, mode="std")
        a2 = mha_cross(lp["attn2"], x2, kc, vc, add_src, nh)
        x, x2 = add_layernorm(x, a2, *lp["norm3"], eps=1e-6, mode="std")
        ff = feed_forward(lp["ff"], x2)
        if i + 1 < N:
            x, x2 = add_layernorm(x, ff, *lp["norm1"], eps=1e-6, mode="std")
        else:
            return add_layernorm(x, ff, *params["dec_norm"], eps=1e-6, mode="std",
                                 return_sum=False)


def bert_transformer_forward(params, src_ids, src_type, src_mask,
                             tgt_ids, tgt_type, tgt_mask, nopeak_mask, N, nh):
    enc_out = encoder_forward(params, src_ids, src_type, src_mask, N, nh)
    dec_out = decoder_forward(params, tgt_ids, tgt_type, tgt_mask, nopeak_mask,
                              enc_out, src_mask, N, nh)
    return linear(dec_out, *params["out"])


# ----------------------------------------------------------------------------
# deterministic parameter construction
# ----------------------------------------------------------------------------

def _dense(key, din, dout):
    kw, kb = jax.random.split(key)
    return (jax.random.normal(kw, (din, dout), jnp.float32) * 0.02,
            jax.random.normal(kb, (dout,), jnp.float32) * 0.02)


def _ln(d):
    return (jnp.ones((d,), jnp.float32), jnp.zeros((d,), jnp.float32))


def _mha_self_params(key, d):
    k1, k2 = jax.random.split(key)
    wqkv, bqkv = _dense(k1, d, 3 * d)
    wo, bo = _dense(k2, d, d)
    return {"wqkv": wqkv, "bqkv": bqkv, "wo": wo, "bo": bo}


def _mha_cross_params(key, d):
    k1, k2, k3 = jax.random.split(key, 3)
    wq, bq = _dense(k1, d, d)
    wkv, bkv = _dense(k2, d, 2 * d)
    wo, bo = _dense(k3, d, d)
    return {"wq": wq, "bq": bq, "wkv": wkv, "bkv": bkv, "wo": wo, "bo": bo}


def init_params(key, hidden, n_layers, bert_layers, d_ff, bert_inter,
                vocab, tgt_vocab, max_pos=64, type_vocab=2):
    keys = iter(jax.random.split(key, 64))
    bert = {
        "word_emb": jax.random.normal(next(keys), (vocab, hidden), jnp.float32) * 0.02,
        "pos_emb": jax.random.normal(next(keys), (max_pos, hidden), jnp.float32) * 0.02,
        "type_emb": jax.random.normal(next(keys), (type_vocab, hidden), jnp.float32) * 0.02,
        "emb_ln": _ln(hidden),
        "layers": [],
    }
    for _ in range(bert_layers):
        bert["layers"].append({
            "attn": _mha_self_params(next(keys), hidden),
            "attn_ln": _ln(hidden),
            "inter": _dense(next(keys), hidden, bert_inter),
            "out": _dense(next(keys), bert_inter, hidden),
            "out_ln": _ln(hidden),
        })
    enc_layer = {
        "norm1": _ln(hidden), "norm2": _ln(hidden),
        "attn": _mha_self_params(next(keys), hidden),
        "ff": {"lin1": _dense(next(keys), hidden, d_ff),
               "lin2": _dense(next(keys), d_ff, hidden)},
    }
    dec_layer = {
        "norm1": _ln(hidden), "norm2": _ln(hidden), "norm3": _ln(hidden),
        "attn1": _mha_self_params(next(keys), hidden),
        "attn2": _mha_cross_params(next(keys), hidden),
        "ff": {"lin1": _dense(next(keys), hidden, d_ff),
               "lin2": _dense(next(keys), d_ff, hidden)},
    }
    return {
        "bert": bert,
        "pe": make_positional_table(max_pos, hidden),
        "enc_layer": enc_layer, "enc_norm": _ln(hidden),
        "dec_layer": dec_layer, "dec_norm": _ln(hidden),
        "out": _dense(next(keys), hidden, tgt_vocab),
    }


# ----------------------------------------------------------------------------

if __name__ == "__main__":
    # small, self-consistent shapes
    B, S_SRC, S_TGT = 2, 8, 8
    HIDDEN, N_HEADS, N_LAYERS = 32, 4, 2
    BERT_LAYERS, D_FF, BERT_INTER = 2, 64, 64
    VOCAB, TGT_VOCAB = 100, 50

    root = jax.random.PRNGKey(0)
    kp, k1, k2 = jax.random.split(root, 3)

    params = init_params(kp, HIDDEN, N_LAYERS, BERT_LAYERS, D_FF, BERT_INTER,
                         VOCAB, TGT_VOCAB)

    src_ids = jax.random.randint(k1, (B, S_SRC), 0, VOCAB, dtype=jnp.int32)
    src_token_type_ids = jnp.zeros((B, S_SRC), jnp.int32)
    src_mask = jnp.ones((B, 1, S_SRC), jnp.int32).at[1, 0, -2:].set(0)  # pad last 2 of sample 1

    target_ids = jax.random.randint(k2, (B, S_TGT), 0, VOCAB, dtype=jnp.int32)
    target_token_type_ids = jnp.zeros((B, S_TGT), jnp.int32)
    target_mask = jnp.ones((B, 1, S_TGT), jnp.int32)
    nopeak = jnp.tril(jnp.ones((S_TGT, S_TGT), jnp.int32))
    target_nopeak_mask = jnp.broadcast_to(nopeak[None], (B, S_TGT, S_TGT)) \
        * target_mask.transpose(0, 2, 1)  # pad & causal

    fwd = jax.jit(functools.partial(bert_transformer_forward,
                                    N=N_LAYERS, nh=N_HEADS))
    logits = fwd(params, src_ids, src_token_type_ids, src_mask,
                 target_ids, target_token_type_ids, target_mask,
                 target_nopeak_mask)
    logits = jax.block_until_ready(logits)

    assert logits.shape == (B, S_TGT, TGT_VOCAB), logits.shape
    assert bool(jnp.all(jnp.isfinite(logits)))
    print("KERNEL_OK")
</pallas_src>

<mosaic_0001>
module attributes {stable_mosaic.version = 11 : i64} {
  func.func @_ln_kernel(%arg0: i32, %arg1: memref<16x32xf32, #tpu.memory_space<vmem>>, %arg2: memref<1x32xf32, #tpu.memory_space<vmem>>, %arg3: memref<1x32xf32, #tpu.memory_space<vmem>>, %arg4: memref<16x32xf32, #tpu.memory_space<vmem>>) attributes {dimension_semantics = [#tpu.dimension_semantics<parallel>], iteration_bounds = array<i64: 1>, scalar_prefetch = 0 : i64, scratch_operands = 0 : i64, tpu.core_type = #tpu.core_type<tc>, window_params = [{transform_indices = @transform_0, window_bounds = array<i64: 16, 32>}, {pipeline_mode = #tpu.pipeline_mode<synchronous>, transform_indices = @transform_1, window_bounds = array<i64: 1, 32>}, {pipeline_mode = #tpu.pipeline_mode<synchronous>, transform_indices = @transform_2, window_bounds = array<i64: 1, 32>}, {transform_indices = @transform_3, window_bounds = array<i64: 16, 32>}]} {
    %c0 = arith.constant 0 : index
    %c0_0 = arith.constant 0 : index
    %0 = vector.load %arg1[%c0, %c0_0] : memref<16x32xf32, #tpu.memory_space<vmem>>, vector<16x32xf32>
    %c0_1 = arith.constant 0 : index
    %c0_2 = arith.constant 0 : index
    %1 = vector.load %arg2[%c0_1, %c0_2] : memref<1x32xf32, #tpu.memory_space<vmem>>, vector<1x32xf32>
    %c0_3 = arith.constant 0 : index
    %c0_4 = arith.constant 0 : index
    %2 = vector.load %arg3[%c0_3, %c0_4] : memref<1x32xf32, #tpu.memory_space<vmem>>, vector<1x32xf32>
    %cst = arith.constant dense<0.000000e+00> : vector<16xf32>
    %3 = vector.multi_reduction <add>, %0, %cst [1] : vector<16x32xf32> to vector<16xf32>
    %4 = vector.shape_cast %3 : vector<16xf32> to vector<16x1xf32>
    %cst_5 = arith.constant 3.200000e+01 : f32
    %5 = vector.broadcast %cst_5 : f32 to vector<16x1xf32>
    %6 = arith.divf %4, %5 : vector<16x1xf32>
    %7 = vector.broadcast %6 : vector<16x1xf32> to vector<16x32xf32>
    %8 = arith.subf %0, %7 : vector<16x32xf32>
    %9 = arith.mulf %8, %8 : vector<16x32xf32>
    %cst_6 = arith.constant dense<0.000000e+00> : vector<16xf32>
    %10 = vector.multi_reduction <add>, %9, %cst_6 [1] : vector<16x32xf32> to vector<16xf32>
    %11 = vector.shape_cast %10 : vector<16xf32> to vector<16x1xf32>
    %cst_7 = arith.constant 3.200000e+01 : f32
    %12 = vector.broadcast %cst_7 : f32 to vector<16x1xf32>
    %13 = arith.divf %11, %12 : vector<16x1xf32>
    %cst_8 = arith.constant 9.99999996E-13 : f32
    %14 = vector.broadcast %cst_8 : f32 to vector<16x1xf32>
    %15 = arith.addf %13, %14 : vector<16x1xf32>
    %16 = math.rsqrt %15 : vector<16x1xf32>
    %17 = vector.broadcast %16 : vector<16x1xf32> to vector<16x32xf32>
    %18 = arith.mulf %8, %17 : vector<16x32xf32>
    %19 = vector.broadcast %1 : vector<1x32xf32> to vector<16x32xf32>
    %20 = arith.mulf %18, %19 : vector<16x32xf32>
    %21 = vector.broadcast %2 : vector<1x32xf32> to vector<16x32xf32>
    %22 = arith.addf %20, %21 : vector<16x32xf32>
    %c0_9 = arith.constant 0 : index
    %c0_10 = arith.constant 0 : index
    %23 = vector.load %arg4[%c0_9, %c0_10] : memref<16x32xf32, #tpu.memory_space<vmem>>, vector<16x32xf32>
    tpu.vector_store %arg4[%c0_9, %c0_10], %22 {strides = array<i32>} : memref<16x32xf32, #tpu.memory_space<vmem>>, vector<16x32xf32>,
    return
  }
  func.func @transform_0(%arg0: i32) -> (i32, i32) {
    %c0_i32 = arith.constant 0 : i32
    %c0_i32_0 = arith.constant 0 : i32
    return %arg0, %c0_i32 : i32, i32
  }
  func.func @transform_1(%arg0: i32) -> (i32, i32) {
    %c0_i32 = arith.constant 0 : i32
    %c0_i32_0 = arith.constant 0 : i32
    %c0_i32_1 = arith.constant 0 : i32
    return %c0_i32, %c0_i32_0 : i32, i32
  }
  func.func @transform_2(%arg0: i32) -> (i32, i32) {
    %c0_i32 = arith.constant 0 : i32
    %c0_i32_0 = arith.constant 0 : i32
    %c0_i32_1 = arith.constant 0 : i32
    return %c0_i32, %c0_i32_0 : i32, i32
  }
  func.func @transform_3(%arg0: i32) -> (i32, i32) {
    %c0_i32 = arith.constant 0 : i32
    %c0_i32_0 = arith.constant 0 : i32
    return %arg0, %c0_i32 : i32, i32
  }
}

module attributes {stable_mosaic.version = 11 : i64} {
  func.func @_matmul_kernel(%arg0: i32, %arg1: i32, %arg2: i32, %arg3: memref<16x32xbf16, #tpu.memory_space<vmem>>, %arg4: memref<32x96xbf16, #tpu.memory_space<vmem>>, %arg5: memref<1x96xf32, #tpu.memory_space<vmem>>, %arg6: memref<16x96xf32, #tpu.memory_space<vmem>>, %arg7: memref<16x96xf32, #tpu.memory_space<vmem>>) attributes {dimension_semantics = [#tpu.dimension_semantics<parallel>, #tpu.dimension_semantics<parallel>, #tpu.dimension_semantics<arbitrary>], iteration_bounds = array<i64: 1, 1, 1>, scalar_prefetch = 0 : i64, scratch_operands = 1 : i64, tpu.core_type = #tpu.core_type<tc>, window_params = [{transform_indices = @transform_0, window_bounds = array<i64: 16, 32>}, {transform_indices = @transform_1, window_bounds = array<i64: 32, 96>}, {transform_indices = @transform_2, window_bounds = array<i64: 1, 96>}, {transform_indices = @transform_3, window_bounds = array<i64: 16, 96>}]} {
    %c0_i32 = arith.constant 0 : i32
    %0 = arith.cmpi eq, %arg2, %c0_i32 : i32
    %1 = arith.extui %0 : i1 to i32
    %c0_i32_0 = arith.constant 0 : i32
    %2 = arith.cmpi ne, %1, %c0_i32_0 : i32
    scf.if %2 {
      %cst_10 = arith.constant 0.000000e+00 : f32
      %12 = vector.broadcast %cst_10 : f32 to vector<16x96xf32>
      %c0_11 = arith.constant 0 : index
      %c0_12 = arith.constant 0 : index
      %13 = vector.load %arg7[%c0_11, %c0_12] : memref<16x96xf32, #tpu.memory_space<vmem>>, vector<16x96xf32>
      tpu.vector_store %arg7[%c0_11, %c0_12], %12 {strides = array<i32>} : memref<16x96xf32, #tpu.memory_space<vmem>>, vector<16x96xf32>,
    } else {
    }
    %c0 = arith.constant 0 : index
    %c0_1 = arith.constant 0 : index
    %3 = vector.load %arg7[%c0, %c0_1] : memref<16x96xf32, #tpu.memory_space<vmem>>, vector<16x96xf32>
    %c0_2 = arith.constant 0 : index
    %c0_3 = arith.constant 0 : index
    %4 = vector.load %arg3[%c0_2, %c0_3] : memref<16x32xbf16, #tpu.memory_space<vmem>>, vector<16x32xbf16>
    %c0_4 = arith.constant 0 : index
    %c0_5 = arith.constant 0 : index
    %5 = vector.load %arg4[%c0_4, %c0_5] : memref<32x96xbf16, #tpu.memory_space<vmem>>, vector<32x96xbf16>
    %cst = arith.constant dense<0.000000e+00> : vector<16x96xf32>
    %6 = tpu.matmul %4, %5, %cst {dimension_numbers = #tpu.dot_dimension_numbers<[1], [0], [0], [1], [0, 0, 1, 1], [], []>} : vector<16x32xbf16>, vector<32x96xbf16>, vector<16x96xf32> -> vector<16x96xf32>
    %7 = arith.addf %3, %6 : vector<16x96xf32>
    %c0_6 = arith.constant 0 : index
    %c0_7 = arith.constant 0 : index
    %8 = vector.load %arg7[%c0_6, %c0_7] : memref<16x96xf32, #tpu.memory_space<vmem>>, vector<16x96xf32>
    tpu.vector_store %arg7[%c0_6, %c0_7], %7 {strides = array<i32>} : memref<16x96xf32, #tpu.memory_space<vmem>>, vector<16x96xf32>,
    %c0_i32_8 = arith.constant 0 : i32
    %9 = arith.cmpi eq, %arg2, %c0_i32_8 : i32
    %10 = arith.extui %9 : i1 to i32
    %c0_i32_9 = arith.constant 0 : i32
    %11 = arith.cmpi ne, %10, %c0_i32_9 : i32
    scf.if %11 {
      %c0_10 = arith.constant 0 : index
      %c0_11 = arith.constant 0 : index
      %12 = vector.load %arg7[%c0_10, %c0_11] : memref<16x96xf32, #tpu.memory_space<vmem>>, vector<16x96xf32>
      %c0_12 = arith.constant 0 : index
      %c0_13 = arith.constant 0 : index
      %13 = vector.load %arg5[%c0_12, %c0_13] : memref<1x96xf32, #tpu.memory_space<vmem>>, vector<1x96xf32>
      %14 = vector.broadcast %13 : vector<1x96xf32> to vector<16x96xf32>
      %15 = arith.addf %12, %14 : vector<16x96xf32>
      %c0_14 = arith.constant 0 : index
      %c0_15 = arith.constant 0 : index
      %16 = vector.load %arg6[%c0_14, %c0_15] : memref<16x96xf32, #tpu.memory_space<vmem>>, vector<16x96xf32>
      tpu.vector_store %arg6[%c0_14, %c0_15], %15 {strides = array<i32>} : memref<16x96xf32, #tpu.memory_space<vmem>>, vector<16x96xf32>,
    } else {
    }
    return
  }
  func.func @transform_0(%arg0: i32, %arg1: i32, %arg2: i32) -> (i32, i32) {
    %c0_i32 = arith.constant 0 : i32
    return %arg0, %arg2 : i32, i32
  }
  func.func @transform_1(%arg0: i32, %arg1: i32, %arg2: i32) -> (i32, i32) {
    %c0_i32 = arith.constant 0 : i32
    return %arg2, %arg1 : i32, i32
  }
  func.func @transform_2(%arg0: i32, %arg1: i32, %arg2: i32) -> (i32, i32) {
    %c0_i32 = arith.constant 0 : i32
    %c0_i32_0 = arith.constant 0 : i32
    return %c0_i32, %arg1 : i32, i32
  }
  func.func @transform_3(%arg0: i32, %arg1: i32, %arg2: i32) -> (i32, i32) {
    %c0_i32 = arith.constant 0 : i32
    return %arg0, %arg1 : i32, i32
  }
}

module attributes {stable_mosaic.version = 11 : i64} {
  func.func @_mha_kernel(%arg0: i32, %arg1: memref<1x8x32xbf16, #tpu.memory_space<vmem>>, %arg2: memref<1x8x32xbf16, #tpu.memory_space<vmem>>, %arg3: memref<1x8x32xbf16, #tpu.memory_space<vmem>>, %arg4: memref<1x1x8xf32, #tpu.memory_space<vmem>>, %arg5: memref<1x8x32xf32, #tpu.memory_space<vmem>>) attributes {dimension_semantics = [#tpu.dimension_semantics<parallel>], iteration_bounds = array<i64: 2>, scalar_prefetch = 0 : i64, scratch_operands = 0 : i64, tpu.core_type = #tpu.core_type<tc>, window_params = [{transform_indices = @transform_0, window_bounds = array<i64: 1, 8, 32>}, {transform_indices = @transform_1, window_bounds = array<i64: 1, 8, 32>}, {transform_indices = @transform_2, window_bounds = array<i64: 1, 8, 32>}, {transform_indices = @transform_3, window_bounds = array<i64: 1, 1, 8>}, {transform_indices = @transform_4, window_bounds = array<i64: 1, 8, 32>}]} {
    %c0 = arith.constant 0 : index
    %c0_0 = arith.constant 0 : index
    %c0_1 = arith.constant 0 : index
    %0 = vector.load %arg4[%c0, %c0_0, %c0_1] : memref<1x1x8xf32, #tpu.memory_space<vmem>>, vector<1x1x8xf32>
    %1 = vector.shape_cast %0 : vector<1x1x8xf32> to vector<1x8xf32>
    %c0_2 = arith.constant 0 : index
    %c0_3 = arith.constant 0 : index
    %c0_4 = arith.constant 0 : index
    %2 = vector.load %arg1[%c0_2, %c0_3, %c0_4] : memref<1x8x32xbf16, #tpu.memory_space<vmem>>, vector<1x8x8xbf16>
    %3 = vector.shape_cast %2 : vector<1x8x8xbf16> to vector<8x8xbf16>
    %c0_5 = arith.constant 0 : index
    %c0_6 = arith.constant 0 : index
    %c0_7 = arith.constant 0 : index
    %4 = vector.load %arg2[%c0_5, %c0_6, %c0_7] : memref<1x8x32xbf16, #tpu.memory_space<vmem>>, vector<1x8x8xbf16>
    %5 = vector.shape_cast %4 : vector<1x8x8xbf16> to vector<8x8xbf16>
    %c0_8 = arith.constant 0 : index
    %c0_9 = arith.constant 0 : index
    %c0_10 = arith.constant 0 : index
    %6 = vector.load %arg3[%c0_8, %c0_9, %c0_10] : memref<1x8x32xbf16, #tpu.memory_space<vmem>>, vector<1x8x8xbf16>
    %7 = vector.shape_cast %6 : vector<1x8x8xbf16> to vector<8x8xbf16>
    %cst = arith.constant dense<0.000000e+00> : vector<8x8xf32>
    %8 = tpu.matmul %3, %5, %cst {dimension_numbers = #tpu.dot_dimension_numbers<[1], [1], [0], [0], [0, 0, 1, 0], [], []>} : vector<8x8xbf16>, vector<8x8xbf16>, vector<8x8xf32> -> vector<8x8xf32>
    %cst_11 = arith.constant 0.353553385 : f32
    %9 = vector.broadcast %cst_11 : f32 to vector<8x8xf32>
    %10 = arith.mulf %8, %9 : vector<8x8xf32>
    %11 = vector.broadcast %1 : vector<1x8xf32> to vector<8x8xf32>
    %12 = arith.addf %10, %11 : vector<8x8xf32>
    %cst_12 = arith.constant dense<0xFF800000> : vector<8xf32>
    %13 = vector.multi_reduction <maximumf>, %12, %cst_12 [1] : vector<8x8xf32> to vector<8xf32>
    %14 = vector.shape_cast %13 : vector<8xf32> to vector<8x1xf32>
    %15 = vector.broadcast %14 : vector<8x1xf32> to vector<8x8xf32>
    %16 = arith.subf %12, %15 : vector<8x8xf32>
    %17 = math.exp %16 : vector<8x8xf32>
    %cst_13 = arith.constant dense<0.000000e+00> : vector<8xf32>
    %18 = vector.multi_reduction <add>, %17, %cst_13 [1] : vector<8x8xf32> to vector<8xf32>
    %19 = vector.shape_cast %18 : vector<8xf32> to vector<8x1xf32>
    %20 = tpu.reciprocal %19 {approx = true} : vector<8x1xf32> -> vector<8x1xf32>
    %21 = vector.broadcast %20 : vector<8x1xf32> to vector<8x8xf32>
    %22 = arith.mulf %17, %21 : vector<8x8xf32>
    %23 = arith.truncf %22 : vector<8x8xf32> to vector<8x8xbf16>
    %cst_14 = arith.constant dense<0.000000e+00> : vector<8x8xf32>
    %24 = tpu.matmul %23, %7, %cst_14 {dimension_numbers = #tpu.dot_dimension_numbers<[1], [0], [0], [1], [0, 0, 1, 1], [], []>} : vector<8x8xbf16>, vector<8x8xbf16>, vector<8x8xf32> -> vector<8x8xf32>
    %c0_15 = arith.constant 0 : index
    %c0_16 = arith.constant 0 : index
    %c8 = arith.constant 8 : index
    %25 = vector.load %arg1[%c0_15, %c0_16, %c8] : memref<1x8x32xbf16, #tpu.memory_space<vmem>>, vector<1x8x8xbf16>
    %26 = vector.shape_cast %25 : vector<1x8x8xbf16> to vector<8x8xbf16>
    %c0_17 = arith.constant 0 : index
    %c0_18 = arith.constant 0 : index
    %c8_19 = arith.constant 8 : index
    %27 = vector.load %arg2[%c0_17, %c0_18, %c8_19] : memref<1x8x32xbf16, #tpu.memory_space<vmem>>, vector<1x8x8xbf16>
    %28 = vector.shape_cast %27 : vector<1x8x8xbf16> to vector<8x8xbf16>
    %c0_20 = arith.constant 0 : index
    %c0_21 = arith.constant 0 : index
    %c8_22 = arith.constant 8 : index
    %29 = vector.load %arg3[%c0_20, %c0_21, %c8_22] : memref<1x8x32xbf16, #tpu.memory_space<vmem>>, vector<1x8x8xbf16>
    %30 = vector.shape_cast %29 : vector<1x8x8xbf16> to vector<8x8xbf16>
    %cst_23 = arith.constant dense<0.000000e+00> : vector<8x8xf32>
    %31 = tpu.matmul %26, %28, %cst_23 {dimension_numbers = #tpu.dot_dimension_numbers<[1], [1], [0], [0], [0, 0, 1, 0], [], []>} : vector<8x8xbf16>, vector<8x8xbf16>, vector<8x8xf32> -> vector<8x8xf32>
    %cst_24 = arith.constant 0.353553385 : f32
    %32 = vector.broadcast %cst_24 : f32 to vector<8x8xf32>
    %33 = arith.mulf %31, %32 : vector<8x8xf32>
    %34 = vector.broadcast %1 : vector<1x8xf32> to vector<8x8xf32>
    %35 = arith.addf %33, %34 : vector<8x8xf32>
    %cst_25 = arith.constant dense<0xFF800000> : vector<8xf32>
    %36 = vector.multi_reduction <maximumf>, %35, %cst_25 [1] : vector<8x8xf32> to vector<8xf32>
    %37 = vector.shape_cast %36 : vector<8xf32> to vector<8x1xf32>
    %38 = vector.broadcast %37 : vector<8x1xf32> to vector<8x8xf32>
    %39 = arith.subf %35, %38 : vector<8x8xf32>
    %40 = math.exp %39 : vector<8x8xf32>
    %cst_26 = arith.constant dense<0.000000e+00> : vector<8xf32>
    %41 = vector.multi_reduction <add>, %40, %cst_26 [1] : vector<8x8xf32> to vector<8xf32>
    %42 = vector.shape_cast %41 : vector<8xf32> to vector<8x1xf32>
    %43 = tpu.reciprocal %42 {approx = true} : vector<8x1xf32> -> vector<8x1xf32>
    %44 = vector.broadcast %43 : vector<8x1xf32> to vector<8x8xf32>
    %45 = arith.mulf %40, %44 : vector<8x8xf32>
    %46 = arith.truncf %45 : vector<8x8xf32> to vector<8x8xbf16>
    %cst_27 = arith.constant dense<0.000000e+00> : vector<8x8xf32>
    %47 = tpu.matmul %46, %30, %cst_27 {dimension_numbers = #tpu.dot_dimension_numbers<[1], [0], [0], [1], [0, 0, 1, 1], [], []>} : vector<8x8xbf16>, vector<8x8xbf16>, vector<8x8xf32> -> vector<8x8xf32>
    %c0_28 = arith.constant 0 : index
    %c0_29 = arith.constant 0 : index
    %c16 = arith.constant 16 : index
    %48 = vector.load %arg1[%c0_28, %c0_29, %c16] : memref<1x8x32xbf16, #tpu.memory_space<vmem>>, vector<1x8x8xbf16>
    %49 = vector.shape_cast %48 : vector<1x8x8xbf16> to vector<8x8xbf16>
    %c0_30 = arith.constant 0 : index
    %c0_31 = arith.constant 0 : index
    %c16_32 = arith.constant 16 : index
    %50 = vector.load %arg2[%c0_30, %c0_31, %c16_32] : memref<1x8x32xbf16, #tpu.memory_space<vmem>>, vector<1x8x8xbf16>
    %51 = vector.shape_cast %50 : vector<1x8x8xbf16> to vector<8x8xbf16>
    %c0_33 = arith.constant 0 : index
    %c0_34 = arith.constant 0 : index
    %c16_35 = arith.constant 16 : index
    %52 = vector.load %arg3[%c0_33, %c0_34, %c16_35] : memref<1x8x32xbf16, #tpu.memory_space<vmem>>, vector<1x8x8xbf16>
    %53 = vector.shape_cast %52 : vector<1x8x8xbf16> to vector<8x8xbf16>
    %cst_36 = arith.constant dense<0.000000e+00> : vector<8x8xf32>
    %54 = tpu.matmul %49, %51, %cst_36 {dimension_numbers = #tpu.dot_dimension_numbers<[1], [1], [0], [0], [0, 0, 1, 0], [], []>} : vector<8x8xbf16>, vector<8x8xbf16>, vector<8x8xf32> -> vector<8x8xf32>
    %cst_37 = arith.constant 0.353553385 : f32
    %55 = vector.broadcast %cst_37 : f32 to vector<8x8xf32>
    %56 = arith.mulf %54, %55 : vector<8x8xf32>
    %57 = vector.broadcast %1 : vector<1x8xf32> to vector<8x8xf32>
    %58 = arith.addf %56, %57 : vector<8x8xf32>
    %cst_38 = arith.constant dense<0xFF800000> : vector<8xf32>
    %59 = vector.multi_reduction <maximumf>, %58, %cst_38 [1] : vector<8x8xf32> to vector<8xf32>
    %60 = vector.shape_cast %59 : vector<8xf32> to vector<8x1xf32>
    %61 = vector.broadcast %60 : vector<8x1xf32> to vector<8x8xf32>
    %62 = arith.subf %58, %61 : vector<8x8xf32>
    %63 = math.exp %62 : vector<8x8xf32>
    %cst_39 = arith.constant dense<0.000000e+00> : vector<8xf32>
    %64 = vector.multi_reduction <add>, %63, %cst_39 [1] : vector<8x8xf32> to vector<8xf32>
    %65 = vector.shape_cast %64 : vector<8xf32> to vector<8x1xf32>
    %66 = tpu.reciprocal %65 {approx = true} : vector<8x1xf32> -> vector<8x1xf32>
    %67 = vector.broadcast %66 : vector<8x1xf32> to vector<8x8xf32>
    %68 = arith.mulf %63, %67 : vector<8x8xf32>
    %69 = arith.truncf %68 : vector<8x8xf32> to vector<8x8xbf16>
    %cst_40 = arith.constant dense<0.000000e+00> : vector<8x8xf32>
    %70 = tpu.matmul %69, %53, %cst_40 {dimension_numbers = #tpu.dot_dimension_numbers<[1], [0], [0], [1], [0, 0, 1, 1], [], []>} : vector<8x8xbf16>, vector<8x8xbf16>, vector<8x8xf32> -> vector<8x8xf32>
    %c0_41 = arith.constant 0 : index
    %c0_42 = arith.constant 0 : index
    %c24 = arith.constant 24 : index
    %71 = vector.load %arg1[%c0_41, %c0_42, %c24] : memref<1x8x32xbf16, #tpu.memory_space<vmem>>, vector<1x8x8xbf16>
    %72 = vector.shape_cast %71 : vector<1x8x8xbf16> to vector<8x8xbf16>
    %c0_43 = arith.constant 0 : index
    %c0_44 = arith.constant 0 : index
    %c24_45 = arith.constant 24 : index
    %73 = vector.load %arg2[%c0_43, %c0_44, %c24_45] : memref<1x8x32xbf16, #tpu.memory_space<vmem>>, vector<1x8x8xbf16>
    %74 = vector.shape_cast %73 : vector<1x8x8xbf16> to vector<8x8xbf16>
    %c0_46 = arith.constant 0 : index
    %c0_47 = arith.constant 0 : index
    %c24_48 = arith.constant 24 : index
    %75 = vector.load %arg3[%c0_46, %c0_47, %c24_48] : memref<1x8x32xbf16, #tpu.memory_space<vmem>>, vector<1x8x8xbf16>
    %76 = vector.shape_cast %75 : vector<1x8x8xbf16> to vector<8x8xbf16>
    %cst_49 = arith.constant dense<0.000000e+00> : vector<8x8xf32>
    %77 = tpu.matmul %72, %74, %cst_49 {dimension_numbers = #tpu.dot_dimension_numbers<[1], [1], [0], [0], [0, 0, 1, 0], [], []>} : vector<8x8xbf16>, vector<8x8xbf16>, vector<8x8xf32> -> vector<8x8xf32>
    %cst_50 = arith.constant 0.353553385 : f32
    %78 = vector.broadcast %cst_50 : f32 to vector<8x8xf32>
    %79 = arith.mulf %77, %78 : vector<8x8xf32>
    %80 = vector.broadcast %1 : vector<1x8xf32> to vector<8x8xf32>
    %81 = arith.addf %79, %80 : vector<8x8xf32>
    %cst_51 = arith.constant dense<0xFF800000> : vector<8xf32>
    %82 = vector.multi_reduction <maximumf>, %81, %cst_51 [1] : vector<8x8xf32> to vector<8xf32>
    %83 = vector.shape_cast %82 : vector<8xf32> to vector<8x1xf32>
    %84 = vector.broadcast %83 : vector<8x1xf32> to vector<8x8xf32>
    %85 = arith.subf %81, %84 : vector<8x8xf32>
    %86 = math.exp %85 : vector<8x8xf32>
    %cst_52 = arith.constant dense<0.000000e+00> : vector<8xf32>
    %87 = vector.multi_reduction <add>, %86, %cst_52 [1] : vector<8x8xf32> to vector<8xf32>
    %88 = vector.shape_cast %87 : vector<8xf32> to vector<8x1xf32>
    %89 = tpu.reciprocal %88 {approx = true} : vector<8x1xf32> -> vector<8x1xf32>
    %90 = vector.broadcast %89 : vector<8x1xf32> to vector<8x8xf32>
    %91 = arith.mulf %86, %90 : vector<8x8xf32>
    %92 = arith.truncf %91 : vector<8x8xf32> to vector<8x8xbf16>
    %cst_53 = arith.constant dense<0.000000e+00> : vector<8x8xf32>
    %93 = tpu.matmul %92, %76, %cst_53 {dimension_numbers = #tpu.dot_dimension_numbers<[1], [0], [0], [1], [0, 0, 1, 1], [], []>} : vector<8x8xbf16>, vector<8x8xbf16>, vector<8x8xf32> -> vector<8x8xf32>
    %94 = tpu.concatenate %24, %47, %70, %93 in 1 : vector<8x8xf32>, vector<8x8xf32>, vector<8x8xf32>, vector<8x8xf32> -> vector<8x32xf32>
    %c0_54 = arith.constant 0 : index
    %c0_55 = arith.constant 0 : index
    %c0_56 = arith.constant 0 : index
    %95 = vector.load %arg5[%c0_54, %c0_55, %c0_56] : memref<1x8x32xf32, #tpu.memory_space<vmem>>, vector<1x8x32xf32>
    %96 = vector.shape_cast %95 : vector<1x8x32xf32> to vector<8x32xf32>
    %97 = vector.shape_cast %94 : vector<8x32xf32> to vector<1x8x32xf32>
    tpu.vector_store %arg5[%c0_54, %c0_55, %c0_56], %97 {strides = array<i32>} : memref<1x8x32xf32, #tpu.memory_space<vmem>>, vector<1x8x32xf32>,
    return
  }
  func.func @transform_0(%arg0: i32) -> (i32, i32, i32) {
    %c0_i32 = arith.constant 0 : i32
    %c0_i32_0 = arith.constant 0 : i32
    %c0_i32_1 = arith.constant 0 : i32
    return %arg0, %c0_i32, %c0_i32_0 : i32, i32, i32
  }
  func.func @transform_1(%arg0: i32) -> (i32, i32, i32) {
    %c0_i32 = arith.constant 0 : i32
    %c0_i32_0 = arith.constant 0 : i32
    %c0_i32_1 = arith.constant 0 : i32
    return %arg0, %c0_i32, %c0_i32_0 : i32, i32, i32
  }
  func.func @transform_2(%arg0: i32) -> (i32, i32, i32) {
    %c0_i32 = arith.constant 0 : i32
    %c0_i32_0 = arith.constant 0 : i32
    %c0_i32_1 = arith.constant 0 : i32
    return %arg0, %c0_i32, %c0_i32_0 : i32, i32, i32
  }
  func.func @transform_3(%arg0: i32) -> (i32, i32, i32) {
    %c0_i32 = arith.constant 0 : i32
    %c0_i32_0 = arith.constant 0 : i32
    %c0_i32_1 = arith.constant 0 : i32
    return %arg0, %c0_i32, %c0_i32_0 : i32, i32, i32
  }
  func.func @transform_4(%arg0: i32) -> (i32, i32, i32) {
    %c0_i32 = arith.constant 0 : i32
    %c0_i32_0 = arith.constant 0 : i32
    %c0_i32_1 = arith.constant 0 : i32
    return %arg0, %c0_i32, %c0_i32_0 : i32, i32, i32
  }
}

module attributes {stable_mosaic.version = 11 : i64} {
  func.func @_matmul_kernel(%arg0: i32, %arg1: i32, %arg2: i32, %arg3: memref<16x32xbf16, #tpu.memory_space<vmem>>, %arg4: memref<32x32xbf16, #tpu.memory_space<vmem>>, %arg5: memref<1x32xf32, #tpu.memory_space<vmem>>, %arg6: memref<16x32xf32, #tpu.memory_space<vmem>>, %arg7: memref<16x32xf32, #tpu.memory_space<vmem>>) attributes {dimension_semantics = [#tpu.dimension_semantics<parallel>, #tpu.dimension_semantics<parallel>, #tpu.dimension_semantics<arbitrary>], iteration_bounds = array<i64: 1, 1, 1>, scalar_prefetch = 0 : i64, scratch_operands = 1 : i64, tpu.core_type = #tpu.core_type<tc>, window_params = [{transform_indices = @transform_0, window_bounds = array<i64: 16, 32>}, {transform_indices = @transform_1, window_bounds = array<i64: 32, 32>}, {transform_indices = @transform_2, window_bounds = array<i64: 1, 32>}, {transform_indices = @transform_3, window_bounds = array<i64: 16, 32>}]} {
    %c0_i32 = arith.constant 0 : i32
    %0 = arith.cmpi eq, %arg2, %c0_i32 : i32
    %1 = arith.extui %0 : i1 to i32
    %c0_i32_0 = arith.constant 0 : i32
    %2 = arith.cmpi ne, %1, %c0_i32_0 : i32
    scf.if %2 {
      %cst_10 = arith.constant 0.000000e+00 : f32
      %12 = vector.broadcast %cst_10 : f32 to vector<16x32xf32>
      %c0_11 = arith.constant 0 : index
      %c0_12 = arith.constant 0 : index
      %13 = vector.load %arg7[%c0_11, %c0_12] : memref<16x32xf32, #tpu.memory_space<vmem>>, vector<16x32xf32>
      tpu.vector_store %arg7[%c0_11, %c0_12], %12 {strides = array<i32>} : memref<16x32xf32, #tpu.memory_space<vmem>>, vector<16x32xf32>,
    } else {
    }
    %c0 = arith.constant 0 : index
    %c0_1 = arith.constant 0 : index
    %3 = vector.load %arg7[%c0, %c0_1] : memref<16x32xf32, #tpu.memory_space<vmem>>, vector<16x32xf32>
    %c0_2 = arith.constant 0 : index
    %c0_3 = arith.constant 0 : index
    %4 = vector.load %arg3[%c0_2, %c0_3] : memref<16x32xbf16, #tpu.memory_space<vmem>>, vector<16x32xbf16>
    %c0_4 = arith.constant 0 : index
    %c0_5 = arith.constant 0 : index
    %5 = vector.load %arg4[%c0_4, %c0_5] : memref<32x32xbf16, #tpu.memory_space<vmem>>, vector<32x32xbf16>
    %cst = arith.constant dense<0.000000e+00> : vector<16x32xf32>
    %6 = tpu.matmul %4, %5, %cst {dimension_numbers = #tpu.dot_dimension_numbers<[1], [0], [0], [1], [0, 0, 1, 1], [], []>} : vector<16x32xbf16>, vector<32x32xbf16>, vector<16x32xf32> -> vector<16x32xf32>
    %7 = arith.addf %3, %6 : vector<16x32xf32>
    %c0_6 = arith.constant 0 : index
    %c0_7 = arith.constant 0 : index
    %8 = vector.load %arg7[%c0_6, %c0_7] : memref<16x32xf32, #tpu.memory_space<vmem>>, vector<16x32xf32>
    tpu.vector_store %arg7[%c0_6, %c0_7], %7 {strides = array<i32>} : memref<16x32xf32, #tpu.memory_space<vmem>>, vector<16x32xf32>,
    %c0_i32_8 = arith.constant 0 : i32
    %9 = arith.cmpi eq, %arg2, %c0_i32_8 : i32
    %10 = arith.extui %9 : i1 to i32
    %c0_i32_9 = arith.constant 0 : i32
    %11 = arith.cmpi ne, %10, %c0_i32_9 : i32
    scf.if %11 {
      %c0_10 = arith.constant 0 : index
      %c0_11 = arith.constant 0 : index
      %12 = vector.load %arg7[%c0_10, %c0_11] : memref<16x32xf32, #tpu.memory_space<vmem>>, vector<16x32xf32>
      %c0_12 = arith.constant 0 : index
      %c0_13 = arith.constant 0 : index
      %13 = vector.load %arg5[%c0_12, %c0_13] : memref<1x32xf32, #tpu.memory_space<vmem>>, vector<1x32xf32>
      %14 = vector.broadcast %13 : vector<1x32xf32> to vector<16x32xf32>
      %15 = arith.addf %12, %14 : vector<16x32xf32>
      %c0_14 = arith.constant 0 : index
      %c0_15 = arith.constant 0 : index
      %16 = vector.load %arg6[%c0_14, %c0_15] : memref<16x32xf32, #tpu.memory_space<vmem>>, vector<16x32xf32>
      tpu.vector_store %arg6[%c0_14, %c0_15], %15 {strides = array<i32>} : memref<16x32xf32, #tpu.memory_space<vmem>>, vector<16x32xf32>,
    } else {
    }
    return
  }
  func.func @transform_0(%arg0: i32, %arg1: i32, %arg2: i32) -> (i32, i32) {
    %c0_i32 = arith.constant 0 : i32
    return %arg0, %arg2 : i32, i32
  }
  func.func @transform_1(%arg0: i32, %arg1: i32, %arg2: i32) -> (i32, i32) {
    %c0_i32 = arith.constant 0 : i32
    return %arg2, %arg1 : i32, i32
  }
  func.func @transform_2(%arg0: i32, %arg1: i32, %arg2: i32) -> (i32, i32) {
    %c0_i32 = arith.constant 0 : i32
    %c0_i32_0 = arith.constant 0 : i32
    return %c0_i32, %arg1 : i32, i32
  }
  func.func @transform_3(%arg0: i32, %arg1: i32, %arg2: i32) -> (i32, i32) {
    %c0_i32 = arith.constant 0 : i32
    return %arg0, %arg1 : i32, i32
  }
}

module attributes {stable_mosaic.version = 11 : i64} {
  func.func @_add_ln_kernel_nosum(%arg0: i32, %arg1: memref<16x32xf32, #tpu.memory_space<vmem>>, %arg2: memref<16x32xf32, #tpu.memory_space<vmem>>, %arg3: memref<1x32xf32, #tpu.memory_space<vmem>>, %arg4: memref<1x32xf32, #tpu.memory_space<vmem>>, %arg5: memref<16x32xf32, #tpu.memory_space<vmem>>) attributes {dimension_semantics = [#tpu.dimension_semantics<parallel>], iteration_bounds = array<i64: 1>, scalar_prefetch = 0 : i64, scratch_operands = 0 : i64, tpu.core_type = #tpu.core_type<tc>, window_params = [{transform_indices = @transform_0, window_bounds = array<i64: 16, 32>}, {transform_indices = @transform_1, window_bounds = array<i64: 16, 32>}, {pipeline_mode = #tpu.pipeline_mode<synchronous>, transform_indices = @transform_2, window_bounds = array<i64: 1, 32>}, {pipeline_mode = #tpu.pipeline_mode<synchronous>, transform_indices = @transform_3, window_bounds = array<i64: 1, 32>}, {transform_indices = @transform_4, window_bounds = array<i64: 16, 32>}]} {
    %c0 = arith.constant 0 : index
    %c0_0 = arith.constant 0 : index
    %0 = vector.load %arg1[%c0, %c0_0] : memref<16x32xf32, #tpu.memory_space<vmem>>, vector<16x32xf32>
    %c0_1 = arith.constant 0 : index
    %c0_2 = arith.constant 0 : index
    %1 = vector.load %arg2[%c0_1, %c0_2] : memref<16x32xf32, #tpu.memory_space<vmem>>, vector<16x32xf32>
    %2 = arith.addf %0, %1 : vector<16x32xf32>
    %c0_3 = arith.constant 0 : index
    %c0_4 = arith.constant 0 : index
    %3 = vector.load %arg3[%c0_3, %c0_4] : memref<1x32xf32, #tpu.memory_space<vmem>>, vector<1x32xf32>
    %c0_5 = arith.constant 0 : index
    %c0_6 = arith.constant 0 : index
    %4 = vector.load %arg4[%c0_5, %c0_6] : memref<1x32xf32, #tpu.memory_space<vmem>>, vector<1x32xf32>
    %cst = arith.constant dense<0.000000e+00> : vector<16xf32>
    %5 = vector.multi_reduction <add>, %2, %cst [1] : vector<16x32xf32> to vector<16xf32>
    %6 = vector.shape_cast %5 : vector<16xf32> to vector<16x1xf32>
    %cst_7 = arith.constant 3.200000e+01 : f32
    %7 = vector.broadcast %cst_7 : f32 to vector<16x1xf32>
    %8 = arith.divf %6, %7 : vector<16x1xf32>
    %9 = vector.broadcast %8 : vector<16x1xf32> to vector<16x32xf32>
    %10 = arith.subf %2, %9 : vector<16x32xf32>
    %11 = arith.mulf %10, %10 : vector<16x32xf32>
    %cst_8 = arith.constant dense<0.000000e+00> : vector<16xf32>
    %12 = vector.multi_reduction <add>, %11, %cst_8 [1] : vector<16x32xf32> to vector<16xf32>
    %13 = vector.shape_cast %12 : vector<16xf32> to vector<16x1xf32>
    %cst_9 = arith.constant 3.200000e+01 : f32
    %14 = vector.broadcast %cst_9 : f32 to vector<16x1xf32>
    %15 = arith.divf %13, %14 : vector<16x1xf32>
    %cst_10 = arith.constant 9.99999996E-13 : f32
    %16 = vector.broadcast %cst_10 : f32 to vector<16x1xf32>
    %17 = arith.addf %15, %16 : vector<16x1xf32>
    %18 = math.rsqrt %17 : vector<16x1xf32>
    %19 = vector.broadcast %18 : vector<16x1xf32> to vector<16x32xf32>
    %20 = arith.mulf %10, %19 : vector<16x32xf32>
    %21 = vector.broadcast %3 : vector<1x32xf32> to vector<16x32xf32>
    %22 = arith.mulf %20, %21 : vector<16x32xf32>
    %23 = vector.broadcast %4 : vector<1x32xf32> to vector<16x32xf32>
    %24 = arith.addf %22, %23 : vector<16x32xf32>
    %c0_11 = arith.constant 0 : index
    %c0_12 = arith.constant 0 : index
    %25 = vector.load %arg5[%c0_11, %c0_12] : memref<16x32xf32, #tpu.memory_space<vmem>>, vector<16x32xf32>
    tpu.vector_store %arg5[%c0_11, %c0_12], %24 {strides = array<i32>} : memref<16x32xf32, #tpu.memory_space<vmem>>, vector<16x32xf32>,
    return
  }
  func.func @transform_0(%arg0: i32) -> (i32, i32) {
    %c0_i32 = arith.constant 0 : i32
    %c0_i32_0 = arith.constant 0 : i32
    return %arg0, %c0_i32 : i32, i32
  }
  func.func @transform_1(%arg0: i32) -> (i32, i32) {
    %c0_i32 = arith.constant 0 : i32
    %c0_i32_0 = arith.constant 0 : i32
    return %arg0, %c0_i32 : i32, i32
  }
  func.func @transform_2(%arg0: i32) -> (i32, i32) {
    %c0_i32 = arith.constant 0 : i32
    %c0_i32_0 = arith.constant 0 : i32
    %c0_i32_1 = arith.constant 0 : i32
    return %c0_i32, %c0_i32_0 : i32, i32
  }
  func.func @transform_3(%arg0: i32) -> (i32, i32) {
    %c0_i32 = arith.constant 0 : i32
    %c0_i32_0 = arith.constant 0 : i32
    %c0_i32_1 = arith.constant 0 : i32
    return %c0_i32, %c0_i32_0 : i32, i32
  }
  func.func @transform_4(%arg0: i32) -> (i32, i32) {
    %c0_i32 = arith.constant 0 : i32
    %c0_i32_0 = arith.constant 0 : i32
    return %arg0, %c0_i32 : i32, i32
  }
}

module attributes {stable_mosaic.version = 11 : i64} {
  func.func @_matmul_kernel(%arg0: i32, %arg1: i32, %arg2: i32, %arg3: memref<16x32xbf16, #tpu.memory_space<vmem>>, %arg4: memref<32x64xbf16, #tpu.memory_space<vmem>>, %arg5: memref<1x64xf32, #tpu.memory_space<vmem>>, %arg6: memref<16x64xf32, #tpu.memory_space<vmem>>, %arg7: memref<16x64xf32, #tpu.memory_space<vmem>>) attributes {dimension_semantics = [#tpu.dimension_semantics<parallel>, #tpu.dimension_semantics<parallel>, #tpu.dimension_semantics<arbitrary>], iteration_bounds = array<i64: 1, 1, 1>, scalar_prefetch = 0 : i64, scratch_operands = 1 : i64, tpu.core_type = #tpu.core_type<tc>, window_params = [{transform_indices = @transform_0, window_bounds = array<i64: 16, 32>}, {transform_indices = @transform_1, window_bounds = array<i64: 32, 64>}, {transform_indices = @transform_2, window_bounds = array<i64: 1, 64>}, {transform_indices = @transform_3, window_bounds = array<i64: 16, 64>}]} {
    %c0_i32 = arith.constant 0 : i32
    %0 = arith.cmpi eq, %arg2, %c0_i32 : i32
    %1 = arith.extui %0 : i1 to i32
    %c0_i32_0 = arith.constant 0 : i32
    %2 = arith.cmpi ne, %1, %c0_i32_0 : i32
    scf.if %2 {
      %cst_10 = arith.constant 0.000000e+00 : f32
      %12 = vector.broadcast %cst_10 : f32 to vector<16x64xf32>
      %c0_11 = arith.constant 0 : index
      %c0_12 = arith.constant 0 : index
      %13 = vector.load %arg7[%c0_11, %c0_12] : memref<16x64xf32, #tpu.memory_space<vmem>>, vector<16x64xf32>
      tpu.vector_store %arg7[%c0_11, %c0_12], %12 {strides = array<i32>} : memref<16x64xf32, #tpu.memory_space<vmem>>, vector<16x64xf32>,
    } else {
    }
    %c0 = arith.constant 0 : index
    %c0_1 = arith.constant 0 : index
    %3 = vector.load %arg7[%c0, %c0_1] : memref<16x64xf32, #tpu.memory_space<vmem>>, vector<16x64xf32>
    %c0_2 = arith.constant 0 : index
    %c0_3 = arith.constant 0 : index
    %4 = vector.load %arg3[%c0_2, %c0_3] : memref<16x32xbf16, #tpu.memory_space<vmem>>, vector<16x32xbf16>
    %c0_4 = arith.constant 0 : index
    %c0_5 = arith.constant 0 : index
    %5 = vector.load %arg4[%c0_4, %c0_5] : memref<32x64xbf16, #tpu.memory_space<vmem>>, vector<32x64xbf16>
    %cst = arith.constant dense<0.000000e+00> : vector<16x64xf32>
    %6 = tpu.matmul %4, %5, %cst {dimension_numbers = #tpu.dot_dimension_numbers<[1], [0], [0], [1], [0, 0, 1, 1], [], []>} : vector<16x32xbf16>, vector<32x64xbf16>, vector<16x64xf32> -> vector<16x64xf32>
    %7 = arith.addf %3, %6 : vector<16x64xf32>
    %c0_6 = arith.constant 0 : index
    %c0_7 = arith.constant 0 : index
    %8 = vector.load %arg7[%c0_6, %c0_7] : memref<16x64xf32, #tpu.memory_space<vmem>>, vector<16x64xf32>
    tpu.vector_store %arg7[%c0_6, %c0_7], %7 {strides = array<i32>} : memref<16x64xf32, #tpu.memory_space<vmem>>, vector<16x64xf32>,
    %c0_i32_8 = arith.constant 0 : i32
    %9 = arith.cmpi eq, %arg2, %c0_i32_8 : i32
    %10 = arith.extui %9 : i1 to i32
    %c0_i32_9 = arith.constant 0 : i32
    %11 = arith.cmpi ne, %10, %c0_i32_9 : i32
    scf.if %11 {
      %c0_10 = arith.constant 0 : index
      %c0_11 = arith.constant 0 : index
      %12 = vector.load %arg7[%c0_10, %c0_11] : memref<16x64xf32, #tpu.memory_space<vmem>>, vector<16x64xf32>
      %c0_12 = arith.constant 0 : index
      %c0_13 = arith.constant 0 : index
      %13 = vector.load %arg5[%c0_12, %c0_13] : memref<1x64xf32, #tpu.memory_space<vmem>>, vector<1x64xf32>
      %14 = vector.broadcast %13 : vector<1x64xf32> to vector<16x64xf32>
      %15 = arith.addf %12, %14 : vector<16x64xf32>
      %cst_14 = arith.constant 5.000000e-01 : f32
      %16 = vector.broadcast %cst_14 : f32 to vector<16x64xf32>
      %17 = arith.mulf %16, %15 : vector<16x64xf32>
      %18 = arith.mulf %15, %15 : vector<16x64xf32>
      %19 = arith.mulf %15, %18 : vector<16x64xf32>
      %cst_15 = arith.constant 4.471500e-02 : f32
      %20 = vector.broadcast %cst_15 : f32 to vector<16x64xf32>
      %21 = arith.mulf %20, %19 : vector<16x64xf32>
      %22 = arith.addf %15, %21 : vector<16x64xf32>
      %cst_16 = arith.constant 0.797884583 : f32
      %23 = vector.broadcast %cst_16 : f32 to vector<16x64xf32>
      %24 = arith.mulf %23, %22 : vector<16x64xf32>
      %25 = math.tanh %24 : vector<16x64xf32>
      %cst_17 = arith.constant 1.000000e+00 : f32
      %26 = vector.broadcast %cst_17 : f32 to vector<16x64xf32>
      %27 = arith.addf %26, %25 : vector<16x64xf32>
      %28 = arith.mulf %17, %27 : vector<16x64xf32>
      %c0_18 = arith.constant 0 : index
      %c0_19 = arith.constant 0 : index
      %29 = vector.load %arg6[%c0_18, %c0_19] : memref<16x64xf32, #tpu.memory_space<vmem>>, vector<16x64xf32>
      tpu.vector_store %arg6[%c0_18, %c0_19], %28 {strides = array<i32>} : memref<16x64xf32, #tpu.memory_space<vmem>>, vector<16x64xf32>,
    } else {
    }
    return
  }
  func.func @transform_0(%arg0: i32, %arg1: i32, %arg2: i32) -> (i32, i32) {
    %c0_i32 = arith.constant 0 : i32
    return %arg0, %arg2 : i32, i32
  }
  func.func @transform_1(%arg0: i32, %arg1: i32, %arg2: i32) -> (i32, i32) {
    %c0_i32 = arith.constant 0 : i32
    return %arg2, %arg1 : i32, i32
  }
  func.func @transform_2(%arg0: i32, %arg1: i32, %arg2: i32) -> (i32, i32) {
    %c0_i32 = arith.constant 0 : i32
    %c0_i32_0 = arith.constant 0 : i32
    return %c0_i32, %arg1 : i32, i32
  }
  func.func @transform_3(%arg0: i32, %arg1: i32, %arg2: i32) -> (i32, i32) {
    %c0_i32 = arith.constant 0 : i32
    return %arg0, %arg1 : i32, i32
  }
}

module attributes {stable_mosaic.version = 11 : i64} {
  func.func @_matmul_kernel(%arg0: i32, %arg1: i32, %arg2: i32, %arg3: memref<16x64xbf16, #tpu.memory_space<vmem>>, %arg4: memref<64x32xbf16, #tpu.memory_space<vmem>>, %arg5: memref<1x32xf32, #tpu.memory_space<vmem>>, %arg6: memref<16x32xf32, #tpu.memory_space<vmem>>, %arg7: memref<16x32xf32, #tpu.memory_space<vmem>>) attributes {dimension_semantics = [#tpu.dimension_semantics<parallel>, #tpu.dimension_semantics<parallel>, #tpu.dimension_semantics<arbitrary>], iteration_bounds = array<i64: 1, 1, 1>, scalar_prefetch = 0 : i64, scratch_operands = 1 : i64, tpu.core_type = #tpu.core_type<tc>, window_params = [{transform_indices = @transform_0, window_bounds = array<i64: 16, 64>}, {transform_indices = @transform_1, window_bounds = array<i64: 64, 32>}, {transform_indices = @transform_2, window_bounds = array<i64: 1, 32>}, {transform_indices = @transform_3, window_bounds = array<i64: 16, 32>}]} {
    %c0_i32 = arith.constant 0 : i32
    %0 = arith.cmpi eq, %arg2, %c0_i32 : i32
    %1 = arith.extui %0 : i1 to i32
    %c0_i32_0 = arith.constant 0 : i32
    %2 = arith.cmpi ne, %1, %c0_i32_0 : i32
    scf.if %2 {
      %cst_10 = arith.constant 0.000000e+00 : f32
      %12 = vector.broadcast %cst_10 : f32 to vector<16x32xf32>
      %c0_11 = arith.constant 0 : index
      %c0_12 = arith.constant 0 : index
      %13 = vector.load %arg7[%c0_11, %c0_12] : memref<16x32xf32, #tpu.memory_space<vmem>>, vector<16x32xf32>
      tpu.vector_store %arg7[%c0_11, %c0_12], %12 {strides = array<i32>} : memref<16x32xf32, #tpu.memory_space<vmem>>, vector<16x32xf32>,
    } else {
    }
    %c0 = arith.constant 0 : index
    %c0_1 = arith.constant 0 : index
    %3 = vector.load %arg7[%c0, %c0_1] : memref<16x32xf32, #tpu.memory_space<vmem>>, vector<16x32xf32>
    %c0_2 = arith.constant 0 : index
    %c0_3 = arith.constant 0 : index
    %4 = vector.load %arg3[%c0_2, %c0_3] : memref<16x64xbf16, #tpu.memory_space<vmem>>, vector<16x64xbf16>
    %c0_4 = arith.constant 0 : index
    %c0_5 = arith.constant 0 : index
    %5 = vector.load %arg4[%c0_4, %c0_5] : memref<64x32xbf16, #tpu.memory_space<vmem>>, vector<64x32xbf16>
    %cst = arith.constant dense<0.000000e+00> : vector<16x32xf32>
    %6 = tpu.matmul %4, %5, %cst {dimension_numbers = #tpu.dot_dimension_numbers<[1], [0], [0], [1], [0, 0, 1, 1], [], []>} : vector<16x64xbf16>, vector<64x32xbf16>, vector<16x32xf32> -> vector<16x32xf32>
    %7 = arith.addf %3, %6 : vector<16x32xf32>
    %c0_6 = arith.constant 0 : index
    %c0_7 = arith.constant 0 : index
    %8 = vector.load %arg7[%c0_6, %c0_7] : memref<16x32xf32, #tpu.memory_space<vmem>>, vector<16x32xf32>
    tpu.vector_store %arg7[%c0_6, %c0_7], %7 {strides = array<i32>} : memref<16x32xf32, #tpu.memory_space<vmem>>, vector<16x32xf32>,
    %c0_i32_8 = arith.constant 0 : i32
    %9 = arith.cmpi eq, %arg2, %c0_i32_8 : i32
    %10 = arith.extui %9 : i1 to i32
    %c0_i32_9 = arith.constant 0 : i32
    %11 = arith.cmpi ne, %10, %c0_i32_9 : i32
    scf.if %11 {
      %c0_10 = arith.constant 0 : index
      %c0_11 = arith.constant 0 : index
      %12 = vector.load %arg7[%c0_10, %c0_11] : memref<16x32xf32, #tpu.memory_space<vmem>>, vector<16x32xf32>
      %c0_12 = arith.constant 0 : index
      %c0_13 = arith.constant 0 : index
      %13 = vector.load %arg5[%c0_12, %c0_13] : memref<1x32xf32, #tpu.memory_space<vmem>>, vector<1x32xf32>
      %14 = vector.broadcast %13 : vector<1x32xf32> to vector<16x32xf32>
      %15 = arith.addf %12, %14 : vector<16x32xf32>
      %c0_14 = arith.constant 0 : index
      %c0_15 = arith.constant 0 : index
      %16 = vector.load %arg6[%c0_14, %c0_15] : memref<16x32xf32, #tpu.memory_space<vmem>>, vector<16x32xf32>
      tpu.vector_store %arg6[%c0_14, %c0_15], %15 {strides = array<i32>} : memref<16x32xf32, #tpu.memory_space<vmem>>, vector<16x32xf32>,
    } else {
    }
    return
  }
  func.func @transform_0(%arg0: i32, %arg1: i32, %arg2: i32) -> (i32, i32) {
    %c0_i32 = arith.constant 0 : i32
    return %arg0, %arg2 : i32, i32
  }
  func.func @transform_1(%arg0: i32, %arg1: i32, %arg2: i32) -> (i32, i32) {
    %c0_i32 = arith.constant 0 : i32
    return %arg2, %arg1 : i32, i32
  }
  func.func @transform_2(%arg0: i32, %arg1: i32, %arg2: i32) -> (i32, i32) {
    %c0_i32 = arith.constant 0 : i32
    %c0_i32_0 = arith.constant 0 : i32
    return %c0_i32, %arg1 : i32, i32
  }
  func.func @transform_3(%arg0: i32, %arg1: i32, %arg2: i32) -> (i32, i32) {
    %c0_i32 = arith.constant 0 : i32
    return %arg0, %arg1 : i32, i32
  }
}

module attributes {stable_mosaic.version = 11 : i64} {
  func.func @_ln_kernel(%arg0: i32, %arg1: memref<16x32xf32, #tpu.memory_space<vmem>>, %arg2: memref<1x32xf32, #tpu.memory_space<vmem>>, %arg3: memref<1x32xf32, #tpu.memory_space<vmem>>, %arg4: memref<16x32xf32, #tpu.memory_space<vmem>>) attributes {dimension_semantics = [#tpu.dimension_semantics<parallel>], iteration_bounds = array<i64: 1>, scalar_prefetch = 0 : i64, scratch_operands = 0 : i64, tpu.core_type = #tpu.core_type<tc>, window_params = [{transform_indices = @transform_0, window_bounds = array<i64: 16, 32>}, {pipeline_mode = #tpu.pipeline_mode<synchronous>, transform_indices = @transform_1, window_bounds = array<i64: 1, 32>}, {pipeline_mode = #tpu.pipeline_mode<synchronous>, transform_indices = @transform_2, window_bounds = array<i64: 1, 32>}, {transform_indices = @transform_3, window_bounds = array<i64: 16, 32>}]} {
    %c0 = arith.constant 0 : index
    %c0_0 = arith.constant 0 : index
    %0 = vector.load %arg1[%c0, %c0_0] : memref<16x32xf32, #tpu.memory_space<vmem>>, vector<16x32xf32>
    %c0_1 = arith.constant 0 : index
    %c0_2 = arith.constant 0 : index
    %1 = vector.load %arg2[%c0_1, %c0_2] : memref<1x32xf32, #tpu.memory_space<vmem>>, vector<1x32xf32>
    %c0_3 = arith.constant 0 : index
    %c0_4 = arith.constant 0 : index
    %2 = vector.load %arg3[%c0_3, %c0_4] : memref<1x32xf32, #tpu.memory_space<vmem>>, vector<1x32xf32>
    %cst = arith.constant dense<0.000000e+00> : vector<16xf32>
    %3 = vector.multi_reduction <add>, %0, %cst [1] : vector<16x32xf32> to vector<16xf32>
    %4 = vector.shape_cast %3 : vector<16xf32> to vector<16x1xf32>
    %cst_5 = arith.constant 3.200000e+01 : f32
    %5 = vector.broadcast %cst_5 : f32 to vector<16x1xf32>
    %6 = arith.divf %4, %5 : vector<16x1xf32>
    %7 = vector.broadcast %6 : vector<16x1xf32> to vector<16x32xf32>
    %8 = arith.subf %0, %7 : vector<16x32xf32>
    %9 = arith.mulf %8, %8 : vector<16x32xf32>
    %cst_6 = arith.constant dense<0.000000e+00> : vector<16xf32>
    %10 = vector.multi_reduction <add>, %9, %cst_6 [1] : vector<16x32xf32> to vector<16xf32>
    %11 = vector.shape_cast %10 : vector<16xf32> to vector<16x1xf32>
    %cst_7 = arith.constant 3.200000e+01 : f32
    %12 = vector.broadcast %cst_7 : f32 to vector<16x1xf32>
    %13 = arith.divf %11, %12 : vector<16x1xf32>
    %cst_8 = arith.constant 1.03225803 : f32
    %14 = vector.broadcast %cst_8 : f32 to vector<16x1xf32>
    %15 = arith.mulf %13, %14 : vector<16x1xf32>
    %16 = math.sqrt %15 : vector<16x1xf32>
    %cst_9 = arith.constant 9.99999997E-7 : f32
    %17 = vector.broadcast %cst_9 : f32 to vector<16x1xf32>
    %18 = arith.addf %16, %17 : vector<16x1xf32>
    %19 = vector.broadcast %18 : vector<16x1xf32> to vector<16x32xf32>
    %20 = arith.divf %8, %19 : vector<16x32xf32>
    %21 = vector.broadcast %1 : vector<1x32xf32> to vector<16x32xf32>
    %22 = arith.mulf %20, %21 : vector<16x32xf32>
    %23 = vector.broadcast %2 : vector<1x32xf32> to vector<16x32xf32>
    %24 = arith.addf %22, %23 : vector<16x32xf32>
    %c0_10 = arith.constant 0 : index
    %c0_11 = arith.constant 0 : index
    %25 = vector.load %arg4[%c0_10, %c0_11] : memref<16x32xf32, #tpu.memory_space<vmem>>, vector<16x32xf32>
    tpu.vector_store %arg4[%c0_10, %c0_11], %24 {strides = array<i32>} : memref<16x32xf32, #tpu.memory_space<vmem>>, vector<16x32xf32>,
    return
  }
  func.func @transform_0(%arg0: i32) -> (i32, i32) {
    %c0_i32 = arith.constant 0 : i32
    %c0_i32_0 = arith.constant 0 : i32
    return %arg0, %c0_i32 : i32, i32
  }
  func.func @transform_1(%arg0: i32) -> (i32, i32) {
    %c0_i32 = arith.constant 0 : i32
    %c0_i32_0 = arith.constant 0 : i32
    %c0_i32_1 = arith.constant 0 : i32
    return %c0_i32, %c0_i32_0 : i32, i32
  }
  func.func @transform_2(%arg0: i32) -> (i32, i32) {
    %c0_i32 = arith.constant 0 : i32
    %c0_i32_0 = arith.constant 0 : i32
    %c0_i32_1 = arith.constant 0 : i32
    return %c0_i32, %c0_i32_0 : i32, i32
  }
  func.func @transform_3(%arg0: i32) -> (i32, i32) {
    %c0_i32 = arith.constant 0 : i32
    %c0_i32_0 = arith.constant 0 : i32
    return %arg0, %c0_i32 : i32, i32
  }
}

module attributes {stable_mosaic.version = 11 : i64} {
  func.func @_add_ln_kernel(%arg0: i32, %arg1: memref<16x32xf32, #tpu.memory_space<vmem>>, %arg2: memref<16x32xf32, #tpu.memory_space<vmem>>, %arg3: memref<1x32xf32, #tpu.memory_space<vmem>>, %arg4: memref<1x32xf32, #tpu.memory_space<vmem>>, %arg5: memref<16x32xf32, #tpu.memory_space<vmem>>, %arg6: memref<16x32xf32, #tpu.memory_space<vmem>>) attributes {dimension_semantics = [#tpu.dimension_semantics<parallel>], iteration_bounds = array<i64: 1>, scalar_prefetch = 0 : i64, scratch_operands = 0 : i64, tpu.core_type = #tpu.core_type<tc>, window_params = [{transform_indices = @transform_0, window_bounds = array<i64: 16, 32>}, {transform_indices = @transform_1, window_bounds = array<i64: 16, 32>}, {pipeline_mode = #tpu.pipeline_mode<synchronous>, transform_indices = @transform_2, window_bounds = array<i64: 1, 32>}, {pipeline_mode = #tpu.pipeline_mode<synchronous>, transform_indices = @transform_3, window_bounds = array<i64: 1, 32>}, {transform_indices = @transform_4, window_bounds = array<i64: 16, 32>}, {transform_indices = @transform_5, window_bounds = array<i64: 16, 32>}]} {
    %c0 = arith.constant 0 : index
    %c0_0 = arith.constant 0 : index
    %0 = vector.load %arg1[%c0, %c0_0] : memref<16x32xf32, #tpu.memory_space<vmem>>, vector<16x32xf32>
    %c0_1 = arith.constant 0 : index
    %c0_2 = arith.constant 0 : index
    %1 = vector.load %arg2[%c0_1, %c0_2] : memref<16x32xf32, #tpu.memory_space<vmem>>, vector<16x32xf32>
    %2 = arith.addf %0, %1 : vector<16x32xf32>
    %c0_3 = arith.constant 0 : index
    %c0_4 = arith.constant 0 : index
    %3 = vector.load %arg5[%c0_3, %c0_4] : memref<16x32xf32, #tpu.memory_space<vmem>>, vector<16x32xf32>
    tpu.vector_store %arg5[%c0_3, %c0_4], %2 {strides = array<i32>} : memref<16x32xf32, #tpu.memory_space<vmem>>, vector<16x32xf32>,
    %c0_5 = arith.constant 0 : index
    %c0_6 = arith.constant 0 : index
    %4 = vector.load %arg3[%c0_5, %c0_6] : memref<1x32xf32, #tpu.memory_space<vmem>>, vector<1x32xf32>
    %c0_7 = arith.constant 0 : index
    %c0_8 = arith.constant 0 : index
    %5 = vector.load %arg4[%c0_7, %c0_8] : memref<1x32xf32, #tpu.memory_space<vmem>>, vector<1x32xf32>
    %cst = arith.constant dense<0.000000e+00> : vector<16xf32>
    %6 = vector.multi_reduction <add>, %2, %cst [1] : vector<16x32xf32> to vector<16xf32>
    %7 = vector.shape_cast %6 : vector<16xf32> to vector<16x1xf32>
    %cst_9 = arith.constant 3.200000e+01 : f32
    %8 = vector.broadcast %cst_9 : f32 to vector<16x1xf32>
    %9 = arith.divf %7, %8 : vector<16x1xf32>
    %10 = vector.broadcast %9 : vector<16x1xf32> to vector<16x32xf32>
    %11 = arith.subf %2, %10 : vector<16x32xf32>
    %12 = arith.mulf %11, %11 : vector<16x32xf32>
    %cst_10 = arith.constant dense<0.000000e+00> : vector<16xf32>
    %13 = vector.multi_reduction <add>, %12, %cst_10 [1] : vector<16x32xf32> to vector<16xf32>
    %14 = vector.shape_cast %13 : vector<16xf32> to vector<16x1xf32>
    %cst_11 = arith.constant 3.200000e+01 : f32
    %15 = vector.broadcast %cst_11 : f32 to vector<16x1xf32>
    %16 = arith.divf %14, %15 : vector<16x1xf32>
    %cst_12 = arith.constant 1.03225803 : f32
    %17 = vector.broadcast %cst_12 : f32 to vector<16x1xf32>
    %18 = arith.mulf %16, %17 : vector<16x1xf32>
    %19 = math.sqrt %18 : vector<16x1xf32>
    %cst_13 = arith.constant 9.99999997E-7 : f32
    %20 = vector.broadcast %cst_13 : f32 to vector<16x1xf32>
    %21 = arith.addf %19, %20 : vector<16x1xf32>
    %22 = vector.broadcast %21 : vector<16x1xf32> to vector<16x32xf32>
    %23 = arith.divf %11, %22 : vector<16x32xf32>
    %24 = vector.broadcast %4 : vector<1x32xf32> to vector<16x32xf32>
    %25 = arith.mulf %23, %24 : vector<16x32xf32>
    %26 = vector.broadcast %5 : vector<1x32xf32> to vector<16x32xf32>
    %27 = arith.addf %25, %26 : vector<16x32xf32>
    %c0_14 = arith.constant 0 : index
    %c0_15 = arith.constant 0 : index
    %28 = vector.load %arg6[%c0_14, %c0_15] : memref<16x32xf32, #tpu.memory_space<vmem>>, vector<16x32xf32>
    tpu.vector_store %arg6[%c0_14, %c0_15], %27 {strides = array<i32>} : memref<16x32xf32, #tpu.memory_space<vmem>>, vector<16x32xf32>,
    return
  }
  func.func @transform_0(%arg0: i32) -> (i32, i32) {
    %c0_i32 = arith.constant 0 : i32
    %c0_i32_0 = arith.constant 0 : i32
    return %arg0, %c0_i32 : i32, i32
  }
  func.func @transform_1(%arg0: i32) -> (i32, i32) {
    %c0_i32 = arith.constant 0 : i32
    %c0_i32_0 = arith.constant 0 : i32
    return %arg0, %c0_i32 : i32, i32
  }
  func.func @transform_2(%arg0: i32) -> (i32, i32) {
    %c0_i32 = arith.constant 0 : i32
    %c0_i32_0 = arith.constant 0 : i32
    %c0_i32_1 = arith.constant 0 : i32
    return %c0_i32, %c0_i32_0 : i32, i32
  }
  func.func @transform_3(%arg0: i32) -> (i32, i32) {
    %c0_i32 = arith.constant 0 : i32
    %c0_i32_0 = arith.constant 0 : i32
    %c0_i32_1 = arith.constant 0 : i32
    return %c0_i32, %c0_i32_0 : i32, i32
  }
  func.func @transform_4(%arg0: i32) -> (i32, i32) {
    %c0_i32 = arith.constant 0 : i32
    %c0_i32_0 = arith.constant 0 : i32
    return %arg0, %c0_i32 : i32, i32
  }
  func.func @transform_5(%arg0: i32) -> (i32, i32) {
    %c0_i32 = arith.constant 0 : i32
    %c0_i32_0 = arith.constant 0 : i32
    return %arg0, %c0_i32 : i32, i32
  }
}

module attributes {stable_mosaic.version = 11 : i64} {
  func.func @_matmul_kernel(%arg0: i32, %arg1: i32, %arg2: i32, %arg3: memref<16x32xbf16, #tpu.memory_space<vmem>>, %arg4: memref<32x64xbf16, #tpu.memory_space<vmem>>, %arg5: memref<1x64xf32, #tpu.memory_space<vmem>>, %arg6: memref<16x64xf32, #tpu.memory_space<vmem>>, %arg7: memref<16x64xf32, #tpu.memory_space<vmem>>) attributes {dimension_semantics = [#tpu.dimension_semantics<parallel>, #tpu.dimension_semantics<parallel>, #tpu.dimension_semantics<arbitrary>], iteration_bounds = array<i64: 1, 1, 1>, scalar_prefetch = 0 : i64, scratch_operands = 1 : i64, tpu.core_type = #tpu.core_type<tc>, window_params = [{transform_indices = @transform_0, window_bounds = array<i64: 16, 32>}, {transform_indices = @transform_1, window_bounds = array<i64: 32, 64>}, {transform_indices = @transform_2, window_bounds = array<i64: 1, 64>}, {transform_indices = @transform_3, window_bounds = array<i64: 16, 64>}]} {
    %c0_i32 = arith.constant 0 : i32
    %0 = arith.cmpi eq, %arg2, %c0_i32 : i32
    %1 = arith.extui %0 : i1 to i32
    %c0_i32_0 = arith.constant 0 : i32
    %2 = arith.cmpi ne, %1, %c0_i32_0 : i32
    scf.if %2 {
      %cst_10 = arith.constant 0.000000e+00 : f32
      %12 = vector.broadcast %cst_10 : f32 to vector<16x64xf32>
      %c0_11 = arith.constant 0 : index
      %c0_12 = arith.constant 0 : index
      %13 = vector.load %arg7[%c0_11, %c0_12] : memref<16x64xf32, #tpu.memory_space<vmem>>, vector<16x64xf32>
      tpu.vector_store %arg7[%c0_11, %c0_12], %12 {strides = array<i32>} : memref<16x64xf32, #tpu.memory_space<vmem>>, vector<16x64xf32>,
    } else {
    }
    %c0 = arith.constant 0 : index
    %c0_1 = arith.constant 0 : index
    %3 = vector.load %arg7[%c0, %c0_1] : memref<16x64xf32, #tpu.memory_space<vmem>>, vector<16x64xf32>
    %c0_2 = arith.constant 0 : index
    %c0_3 = arith.constant 0 : index
    %4 = vector.load %arg3[%c0_2, %c0_3] : memref<16x32xbf16, #tpu.memory_space<vmem>>, vector<16x32xbf16>
    %c0_4 = arith.constant 0 : index
    %c0_5 = arith.constant 0 : index
    %5 = vector.load %arg4[%c0_4, %c0_5] : memref<32x64xbf16, #tpu.memory_space<vmem>>, vector<32x64xbf16>
    %cst = arith.constant dense<0.000000e+00> : vector<16x64xf32>
    %6 = tpu.matmul %4, %5, %cst {dimension_numbers = #tpu.dot_dimension_numbers<[1], [0], [0], [1], [0, 0, 1, 1], [], []>} : vector<16x32xbf16>, vector<32x64xbf16>, vector<16x64xf32> -> vector<16x64xf32>
    %7 = arith.addf %3, %6 : vector<16x64xf32>
    %c0_6 = arith.constant 0 : index
    %c0_7 = arith.constant 0 : index
    %8 = vector.load %arg7[%c0_6, %c0_7] : memref<16x64xf32, #tpu.memory_space<vmem>>, vector<16x64xf32>
    tpu.vector_store %arg7[%c0_6, %c0_7], %7 {strides = array<i32>} : memref<16x64xf32, #tpu.memory_space<vmem>>, vector<16x64xf32>,
    %c0_i32_8 = arith.constant 0 : i32
    %9 = arith.cmpi eq, %arg2, %c0_i32_8 : i32
    %10 = arith.extui %9 : i1 to i32
    %c0_i32_9 = arith.constant 0 : i32
    %11 = arith.cmpi ne, %10, %c0_i32_9 : i32
    scf.if %11 {
      %c0_10 = arith.constant 0 : index
      %c0_11 = arith.constant 0 : index
      %12 = vector.load %arg7[%c0_10, %c0_11] : memref<16x64xf32, #tpu.memory_space<vmem>>, vector<16x64xf32>
      %c0_12 = arith.constant 0 : index
      %c0_13 = arith.constant 0 : index
      %13 = vector.load %arg5[%c0_12, %c0_13] : memref<1x64xf32, #tpu.memory_space<vmem>>, vector<1x64xf32>
      %14 = vector.broadcast %13 : vector<1x64xf32> to vector<16x64xf32>
      %15 = arith.addf %12, %14 : vector<16x64xf32>
      %cst_14 = arith.constant 0.000000e+00 : f32
      %16 = vector.broadcast %cst_14 : f32 to vector<16x64xf32>
      %17 = arith.maximumf %15, %16 : vector<16x64xf32>
      %c0_15 = arith.constant 0 : index
      %c0_16 = arith.constant 0 : index
      %18 = vector.load %arg6[%c0_15, %c0_16] : memref<16x64xf32, #tpu.memory_space<vmem>>, vector<16x64xf32>
      tpu.vector_store %arg6[%c0_15, %c0_16], %17 {strides = array<i32>} : memref<16x64xf32, #tpu.memory_space<vmem>>, vector<16x64xf32>,
    } else {
    }
    return
  }
  func.func @transform_0(%arg0: i32, %arg1: i32, %arg2: i32) -> (i32, i32) {
    %c0_i32 = arith.constant 0 : i32
    return %arg0, %arg2 : i32, i32
  }
  func.func @transform_1(%arg0: i32, %arg1: i32, %arg2: i32) -> (i32, i32) {
    %c0_i32 = arith.constant 0 : i32
    return %arg2, %arg1 : i32, i32
  }
  func.func @transform_2(%arg0: i32, %arg1: i32, %arg2: i32) -> (i32, i32) {
    %c0_i32 = arith.constant 0 : i32
    %c0_i32_0 = arith.constant 0 : i32
    return %c0_i32, %arg1 : i32, i32
  }
  func.func @transform_3(%arg0: i32, %arg1: i32, %arg2: i32) -> (i32, i32) {
    %c0_i32 = arith.constant 0 : i32
    return %arg0, %arg1 : i32, i32
  }
}

module attributes {stable_mosaic.version = 11 : i64} {
  func.func @_add_ln_kernel_nosum(%arg0: i32, %arg1: memref<16x32xf32, #tpu.memory_space<vmem>>, %arg2: memref<16x32xf32, #tpu.memory_space<vmem>>, %arg3: memref<1x32xf32, #tpu.memory_space<vmem>>, %arg4: memref<1x32xf32, #tpu.memory_space<vmem>>, %arg5: memref<16x32xf32, #tpu.memory_space<vmem>>) attributes {dimension_semantics = [#tpu.dimension_semantics<parallel>], iteration_bounds = array<i64: 1>, scalar_prefetch = 0 : i64, scratch_operands = 0 : i64, tpu.core_type = #tpu.core_type<tc>, window_params = [{transform_indices = @transform_0, window_bounds = array<i64: 16, 32>}, {transform_indices = @transform_1, window_bounds = array<i64: 16, 32>}, {pipeline_mode = #tpu.pipeline_mode<synchronous>, transform_indices = @transform_2, window_bounds = array<i64: 1, 32>}, {pipeline_mode = #tpu.pipeline_mode<synchronous>, transform_indices = @transform_3, window_bounds = array<i64: 1, 32>}, {transform_indices = @transform_4, window_bounds = array<i64: 16, 32>}]} {
    %c0 = arith.constant 0 : index
    %c0_0 = arith.constant 0 : index
    %0 = vector.load %arg1[%c0, %c0_0] : memref<16x32xf32, #tpu.memory_space<vmem>>, vector<16x32xf32>
    %c0_1 = arith.constant 0 : index
    %c0_2 = arith.constant 0 : index
    %1 = vector.load %arg2[%c0_1, %c0_2] : memref<16x32xf32, #tpu.memory_space<vmem>>, vector<16x32xf32>
    %2 = arith.addf %0, %1 : vector<16x32xf32>
    %c0_3 = arith.constant 0 : index
    %c0_4 = arith.constant 0 : index
    %3 = vector.load %arg3[%c0_3, %c0_4] : memref<1x32xf32, #tpu.memory_space<vmem>>, vector<1x32xf32>
    %c0_5 = arith.constant 0 : index
    %c0_6 = arith.constant 0 : index
    %4 = vector.load %arg4[%c0_5, %c0_6] : memref<1x32xf32, #tpu.memory_space<vmem>>, vector<1x32xf32>
    %cst = arith.constant dense<0.000000e+00> : vector<16xf32>
    %5 = vector.multi_reduction <add>, %2, %cst [1] : vector<16x32xf32> to vector<16xf32>
    %6 = vector.shape_cast %5 : vector<16xf32> to vector<16x1xf32>
    %cst_7 = arith.constant 3.200000e+01 : f32
    %7 = vector.broadcast %cst_7 : f32 to vector<16x1xf32>
    %8 = arith.divf %6, %7 : vector<16x1xf32>
    %9 = vector.broadcast %8 : vector<16x1xf32> to vector<16x32xf32>
    %10 = arith.subf %2, %9 : vector<16x32xf32>
    %11 = arith.mulf %10, %10 : vector<16x32xf32>
    %cst_8 = arith.constant dense<0.000000e+00> : vector<16xf32>
    %12 = vector.multi_reduction <add>, %11, %cst_8 [1] : vector<16x32xf32> to vector<16xf32>
    %13 = vector.shape_cast %12 : vector<16xf32> to vector<16x1xf32>
    %cst_9 = arith.constant 3.200000e+01 : f32
    %14 = vector.broadcast %cst_9 : f32 to vector<16x1xf32>
    %15 = arith.divf %13, %14 : vector<16x1xf32>
    %cst_10 = arith.constant 1.03225803 : f32
    %16 = vector.broadcast %cst_10 : f32 to vector<16x1xf32>
    %17 = arith.mulf %15, %16 : vector<16x1xf32>
    %18 = math.sqrt %17 : vector<16x1xf32>
    %cst_11 = arith.constant 9.99999997E-7 : f32
    %19 = vector.broadcast %cst_11 : f32 to vector<16x1xf32>
    %20 = arith.addf %18, %19 : vector<16x1xf32>
    %21 = vector.broadcast %20 : vector<16x1xf32> to vector<16x32xf32>
    %22 = arith.divf %10, %21 : vector<16x32xf32>
    %23 = vector.broadcast %3 : vector<1x32xf32> to vector<16x32xf32>
    %24 = arith.mulf %22, %23 : vector<16x32xf32>
    %25 = vector.broadcast %4 : vector<1x32xf32> to vector<16x32xf32>
    %26 = arith.addf %24, %25 : vector<16x32xf32>
    %c0_12 = arith.constant 0 : index
    %c0_13 = arith.constant 0 : index
    %27 = vector.load %arg5[%c0_12, %c0_13] : memref<16x32xf32, #tpu.memory_space<vmem>>, vector<16x32xf32>
    tpu.vector_store %arg5[%c0_12, %c0_13], %26 {strides = array<i32>} : memref<16x32xf32, #tpu.memory_space<vmem>>, vector<16x32xf32>,
    return
  }
  func.func @transform_0(%arg0: i32) -> (i32, i32) {
    %c0_i32 = arith.constant 0 : i32
    %c0_i32_0 = arith.constant 0 : i32
    return %arg0, %c0_i32 : i32, i32
  }
  func.func @transform_1(%arg0: i32) -> (i32, i32) {
    %c0_i32 = arith.constant 0 : i32
    %c0_i32_0 = arith.constant 0 : i32
    return %arg0, %c0_i32 : i32, i32
  }
  func.func @transform_2(%arg0: i32) -> (i32, i32) {
    %c0_i32 = arith.constant 0 : i32
    %c0_i32_0 = arith.constant 0 : i32
    %c0_i32_1 = arith.constant 0 : i32
    return %c0_i32, %c0_i32_0 : i32, i32
  }
  func.func @transform_3(%arg0: i32) -> (i32, i32) {
    %c0_i32 = arith.constant 0 : i32
    %c0_i32_0 = arith.constant 0 : i32
    %c0_i32_1 = arith.constant 0 : i32
    return %c0_i32, %c0_i32_0 : i32, i32
  }
  func.func @transform_4(%arg0: i32) -> (i32, i32) {
    %c0_i32 = arith.constant 0 : i32
    %c0_i32_0 = arith.constant 0 : i32
    return %arg0, %c0_i32 : i32, i32
  }
}

module attributes {stable_mosaic.version = 11 : i64} {
  func.func @_matmul_kernel(%arg0: i32, %arg1: i32, %arg2: i32, %arg3: memref<16x32xbf16, #tpu.memory_space<vmem>>, %arg4: memref<32x64xbf16, #tpu.memory_space<vmem>>, %arg5: memref<1x64xf32, #tpu.memory_space<vmem>>, %arg6: memref<16x64xf32, #tpu.memory_space<vmem>>, %arg7: memref<16x64xf32, #tpu.memory_space<vmem>>) attributes {dimension_semantics = [#tpu.dimension_semantics<parallel>, #tpu.dimension_semantics<parallel>, #tpu.dimension_semantics<arbitrary>], iteration_bounds = array<i64: 1, 1, 1>, scalar_prefetch = 0 : i64, scratch_operands = 1 : i64, tpu.core_type = #tpu.core_type<tc>, window_params = [{transform_indices = @transform_0, window_bounds = array<i64: 16, 32>}, {transform_indices = @transform_1, window_bounds = array<i64: 32, 64>}, {transform_indices = @transform_2, window_bounds = array<i64: 1, 64>}, {transform_indices = @transform_3, window_bounds = array<i64: 16, 64>}]} {
    %c0_i32 = arith.constant 0 : i32
    %0 = arith.cmpi eq, %arg2, %c0_i32 : i32
    %1 = arith.extui %0 : i1 to i32
    %c0_i32_0 = arith.constant 0 : i32
    %2 = arith.cmpi ne, %1, %c0_i32_0 : i32
    scf.if %2 {
      %cst_10 = arith.constant 0.000000e+00 : f32
      %12 = vector.broadcast %cst_10 : f32 to vector<16x64xf32>
      %c0_11 = arith.constant 0 : index
      %c0_12 = arith.constant 0 : index
      %13 = vector.load %arg7[%c0_11, %c0_12] : memref<16x64xf32, #tpu.memory_space<vmem>>, vector<16x64xf32>
      tpu.vector_store %arg7[%c0_11, %c0_12], %12 {strides = array<i32>} : memref<16x64xf32, #tpu.memory_space<vmem>>, vector<16x64xf32>,
    } else {
    }
    %c0 = arith.constant 0 : index
    %c0_1 = arith.constant 0 : index
    %3 = vector.load %arg7[%c0, %c0_1] : memref<16x64xf32, #tpu.memory_space<vmem>>, vector<16x64xf32>
    %c0_2 = arith.constant 0 : index
    %c0_3 = arith.constant 0 : index
    %4 = vector.load %arg3[%c0_2, %c0_3] : memref<16x32xbf16, #tpu.memory_space<vmem>>, vector<16x32xbf16>
    %c0_4 = arith.constant 0 : index
    %c0_5 = arith.constant 0 : index
    %5 = vector.load %arg4[%c0_4, %c0_5] : memref<32x64xbf16, #tpu.memory_space<vmem>>, vector<32x64xbf16>
    %cst = arith.constant dense<0.000000e+00> : vector<16x64xf32>
    %6 = tpu.matmul %4, %5, %cst {dimension_numbers = #tpu.dot_dimension_numbers<[1], [0], [0], [1], [0, 0, 1, 1], [], []>} : vector<16x32xbf16>, vector<32x64xbf16>, vector<16x64xf32> -> vector<16x64xf32>
    %7 = arith.addf %3, %6 : vector<16x64xf32>
    %c0_6 = arith.constant 0 : index
    %c0_7 = arith.constant 0 : index
    %8 = vector.load %arg7[%c0_6, %c0_7] : memref<16x64xf32, #tpu.memory_space<vmem>>, vector<16x64xf32>
    tpu.vector_store %arg7[%c0_6, %c0_7], %7 {strides = array<i32>} : memref<16x64xf32, #tpu.memory_space<vmem>>, vector<16x64xf32>,
    %c0_i32_8 = arith.constant 0 : i32
    %9 = arith.cmpi eq, %arg2, %c0_i32_8 : i32
    %10 = arith.extui %9 : i1 to i32
    %c0_i32_9 = arith.constant 0 : i32
    %11 = arith.cmpi ne, %10, %c0_i32_9 : i32
    scf.if %11 {
      %c0_10 = arith.constant 0 : index
      %c0_11 = arith.constant 0 : index
      %12 = vector.load %arg7[%c0_10, %c0_11] : memref<16x64xf32, #tpu.memory_space<vmem>>, vector<16x64xf32>
      %c0_12 = arith.constant 0 : index
      %c0_13 = arith.constant 0 : index
      %13 = vector.load %arg5[%c0_12, %c0_13] : memref<1x64xf32, #tpu.memory_space<vmem>>, vector<1x64xf32>
      %14 = vector.broadcast %13 : vector<1x64xf32> to vector<16x64xf32>
      %15 = arith.addf %12, %14 : vector<16x64xf32>
      %c0_14 = arith.constant 0 : index
      %c0_15 = arith.constant 0 : index
      %16 = vector.load %arg6[%c0_14, %c0_15] : memref<16x64xf32, #tpu.memory_space<vmem>>, vector<16x64xf32>
      tpu.vector_store %arg6[%c0_14, %c0_15], %15 {strides = array<i32>} : memref<16x64xf32, #tpu.memory_space<vmem>>, vector<16x64xf32>,
    } else {
    }
    return
  }
  func.func @transform_0(%arg0: i32, %arg1: i32, %arg2: i32) -> (i32, i32) {
    %c0_i32 = arith.constant 0 : i32
    return %arg0, %arg2 : i32, i32
  }
  func.func @transform_1(%arg0: i32, %arg1: i32, %arg2: i32) -> (i32, i32) {
    %c0_i32 = arith.constant 0 : i32
    return %arg2, %arg1 : i32, i32
  }
  func.func @transform_2(%arg0: i32, %arg1: i32, %arg2: i32) -> (i32, i32) {
    %c0_i32 = arith.constant 0 : i32
    %c0_i32_0 = arith.constant 0 : i32
    return %c0_i32, %arg1 : i32, i32
  }
  func.func @transform_3(%arg0: i32, %arg1: i32, %arg2: i32) -> (i32, i32) {
    %c0_i32 = arith.constant 0 : i32
    return %arg0, %arg1 : i32, i32
  }
}

module attributes {stable_mosaic.version = 11 : i64} {
  func.func @_mha_kernel(%arg0: i32, %arg1: memref<1x8x32xbf16, #tpu.memory_space<vmem>>, %arg2: memref<1x8x32xbf16, #tpu.memory_space<vmem>>, %arg3: memref<1x8x32xbf16, #tpu.memory_space<vmem>>, %arg4: memref<1x8x8xf32, #tpu.memory_space<vmem>>, %arg5: memref<1x8x32xf32, #tpu.memory_space<vmem>>) attributes {dimension_semantics = [#tpu.dimension_semantics<parallel>], iteration_bounds = array<i64: 2>, scalar_prefetch = 0 : i64, scratch_operands = 0 : i64, tpu.core_type = #tpu.core_type<tc>, window_params = [{transform_indices = @transform_0, window_bounds = array<i64: 1, 8, 32>}, {transform_indices = @transform_1, window_bounds = array<i64: 1, 8, 32>}, {transform_indices = @transform_2, window_bounds = array<i64: 1, 8, 32>}, {transform_indices = @transform_3, window_bounds = array<i64: 1, 8, 8>}, {transform_indices = @transform_4, window_bounds = array<i64: 1, 8, 32>}]} {
    %c0 = arith.constant 0 : index
    %c0_0 = arith.constant 0 : index
    %c0_1 = arith.constant 0 : index
    %0 = vector.load %arg4[%c0, %c0_0, %c0_1] : memref<1x8x8xf32, #tpu.memory_space<vmem>>, vector<1x8x8xf32>
    %1 = vector.shape_cast %0 : vector<1x8x8xf32> to vector<8x8xf32>
    %c0_2 = arith.constant 0 : index
    %c0_3 = arith.constant 0 : index
    %c0_4 = arith.constant 0 : index
    %2 = vector.load %arg1[%c0_2, %c0_3, %c0_4] : memref<1x8x32xbf16, #tpu.memory_space<vmem>>, vector<1x8x8xbf16>
    %3 = vector.shape_cast %2 : vector<1x8x8xbf16> to vector<8x8xbf16>
    %c0_5 = arith.constant 0 : index
    %c0_6 = arith.constant 0 : index
    %c0_7 = arith.constant 0 : index
    %4 = vector.load %arg2[%c0_5, %c0_6, %c0_7] : memref<1x8x32xbf16, #tpu.memory_space<vmem>>, vector<1x8x8xbf16>
    %5 = vector.shape_cast %4 : vector<1x8x8xbf16> to vector<8x8xbf16>
    %c0_8 = arith.constant 0 : index
    %c0_9 = arith.constant 0 : index
    %c0_10 = arith.constant 0 : index
    %6 = vector.load %arg3[%c0_8, %c0_9, %c0_10] : memref<1x8x32xbf16, #tpu.memory_space<vmem>>, vector<1x8x8xbf16>
    %7 = vector.shape_cast %6 : vector<1x8x8xbf16> to vector<8x8xbf16>
    %cst = arith.constant dense<0.000000e+00> : vector<8x8xf32>
    %8 = tpu.matmul %3, %5, %cst {dimension_numbers = #tpu.dot_dimension_numbers<[1], [1], [0], [0], [0, 0, 1, 0], [], []>} : vector<8x8xbf16>, vector<8x8xbf16>, vector<8x8xf32> -> vector<8x8xf32>
    %cst_11 = arith.constant 0.353553385 : f32
    %9 = vector.broadcast %cst_11 : f32 to vector<8x8xf32>
    %10 = arith.mulf %8, %9 : vector<8x8xf32>
    %11 = arith.addf %10, %1 : vector<8x8xf32>
    %cst_12 = arith.constant dense<0xFF800000> : vector<8xf32>
    %12 = vector.multi_reduction <maximumf>, %11, %cst_12 [1] : vector<8x8xf32> to vector<8xf32>
    %13 = vector.shape_cast %12 : vector<8xf32> to vector<8x1xf32>
    %14 = vector.broadcast %13 : vector<8x1xf32> to vector<8x8xf32>
    %15 = arith.subf %11, %14 : vector<8x8xf32>
    %16 = math.exp %15 : vector<8x8xf32>
    %cst_13 = arith.constant dense<0.000000e+00> : vector<8xf32>
    %17 = vector.multi_reduction <add>, %16, %cst_13 [1] : vector<8x8xf32> to vector<8xf32>
    %18 = vector.shape_cast %17 : vector<8xf32> to vector<8x1xf32>
    %19 = tpu.reciprocal %18 {approx = true} : vector<8x1xf32> -> vector<8x1xf32>
    %20 = vector.broadcast %19 : vector<8x1xf32> to vector<8x8xf32>
    %21 = arith.mulf %16, %20 : vector<8x8xf32>
    %22 = arith.truncf %21 : vector<8x8xf32> to vector<8x8xbf16>
    %cst_14 = arith.constant dense<0.000000e+00> : vector<8x8xf32>
    %23 = tpu.matmul %22, %7, %cst_14 {dimension_numbers = #tpu.dot_dimension_numbers<[1], [0], [0], [1], [0, 0, 1, 1], [], []>} : vector<8x8xbf16>, vector<8x8xbf16>, vector<8x8xf32> -> vector<8x8xf32>
    %c0_15 = arith.constant 0 : index
    %c0_16 = arith.constant 0 : index
    %c8 = arith.constant 8 : index
    %24 = vector.load %arg1[%c0_15, %c0_16, %c8] : memref<1x8x32xbf16, #tpu.memory_space<vmem>>, vector<1x8x8xbf16>
    %25 = vector.shape_cast %24 : vector<1x8x8xbf16> to vector<8x8xbf16>
    %c0_17 = arith.constant 0 : index
    %c0_18 = arith.constant 0 : index
    %c8_19 = arith.constant 8 : index
    %26 = vector.load %arg2[%c0_17, %c0_18, %c8_19] : memref<1x8x32xbf16, #tpu.memory_space<vmem>>, vector<1x8x8xbf16>
    %27 = vector.shape_cast %26 : vector<1x8x8xbf16> to vector<8x8xbf16>
    %c0_20 = arith.constant 0 : index
    %c0_21 = arith.constant 0 : index
    %c8_22 = arith.constant 8 : index
    %28 = vector.load %arg3[%c0_20, %c0_21, %c8_22] : memref<1x8x32xbf16, #tpu.memory_space<vmem>>, vector<1x8x8xbf16>
    %29 = vector.shape_cast %28 : vector<1x8x8xbf16> to vector<8x8xbf16>
    %cst_23 = arith.constant dense<0.000000e+00> : vector<8x8xf32>
    %30 = tpu.matmul %25, %27, %cst_23 {dimension_numbers = #tpu.dot_dimension_numbers<[1], [1], [0], [0], [0, 0, 1, 0], [], []>} : vector<8x8xbf16>, vector<8x8xbf16>, vector<8x8xf32> -> vector<8x8xf32>
    %cst_24 = arith.constant 0.353553385 : f32
    %31 = vector.broadcast %cst_24 : f32 to vector<8x8xf32>
    %32 = arith.mulf %30, %31 : vector<8x8xf32>
    %33 = arith.addf %32, %1 : vector<8x8xf32>
    %cst_25 = arith.constant dense<0xFF800000> : vector<8xf32>
    %34 = vector.multi_reduction <maximumf>, %33, %cst_25 [1] : vector<8x8xf32> to vector<8xf32>
    %35 = vector.shape_cast %34 : vector<8xf32> to vector<8x1xf32>
    %36 = vector.broadcast %35 : vector<8x1xf32> to vector<8x8xf32>
    %37 = arith.subf %33, %36 : vector<8x8xf32>
    %38 = math.exp %37 : vector<8x8xf32>
    %cst_26 = arith.constant dense<0.000000e+00> : vector<8xf32>
    %39 = vector.multi_reduction <add>, %38, %cst_26 [1] : vector<8x8xf32> to vector<8xf32>
    %40 = vector.shape_cast %39 : vector<8xf32> to vector<8x1xf32>
    %41 = tpu.reciprocal %40 {approx = true} : vector<8x1xf32> -> vector<8x1xf32>
    %42 = vector.broadcast %41 : vector<8x1xf32> to vector<8x8xf32>
    %43 = arith.mulf %38, %42 : vector<8x8xf32>
    %44 = arith.truncf %43 : vector<8x8xf32> to vector<8x8xbf16>
    %cst_27 = arith.constant dense<0.000000e+00> : vector<8x8xf32>
    %45 = tpu.matmul %44, %29, %cst_27 {dimension_numbers = #tpu.dot_dimension_numbers<[1], [0], [0], [1], [0, 0, 1, 1], [], []>} : vector<8x8xbf16>, vector<8x8xbf16>, vector<8x8xf32> -> vector<8x8xf32>
    %c0_28 = arith.constant 0 : index
    %c0_29 = arith.constant 0 : index
    %c16 = arith.constant 16 : index
    %46 = vector.load %arg1[%c0_28, %c0_29, %c16] : memref<1x8x32xbf16, #tpu.memory_space<vmem>>, vector<1x8x8xbf16>
    %47 = vector.shape_cast %46 : vector<1x8x8xbf16> to vector<8x8xbf16>
    %c0_30 = arith.constant 0 : index
    %c0_31 = arith.constant 0 : index
    %c16_32 = arith.constant 16 : index
    %48 = vector.load %arg2[%c0_30, %c0_31, %c16_32] : memref<1x8x32xbf16, #tpu.memory_space<vmem>>, vector<1x8x8xbf16>
    %49 = vector.shape_cast %48 : vector<1x8x8xbf16> to vector<8x8xbf16>
    %c0_33 = arith.constant 0 : index
    %c0_34 = arith.constant 0 : index
    %c16_35 = arith.constant 16 : index
    %50 = vector.load %arg3[%c0_33, %c0_34, %c16_35] : memref<1x8x32xbf16, #tpu.memory_space<vmem>>, vector<1x8x8xbf16>
    %51 = vector.shape_cast %50 : vector<1x8x8xbf16> to vector<8x8xbf16>
    %cst_36 = arith.constant dense<0.000000e+00> : vector<8x8xf32>
    %52 = tpu.matmul %47, %49, %cst_36 {dimension_numbers = #tpu.dot_dimension_numbers<[1], [1], [0], [0], [0, 0, 1, 0], [], []>} : vector<8x8xbf16>, vector<8x8xbf16>, vector<8x8xf32> -> vector<8x8xf32>
    %cst_37 = arith.constant 0.353553385 : f32
    %53 = vector.broadcast %cst_37 : f32 to vector<8x8xf32>
    %54 = arith.mulf %52, %53 : vector<8x8xf32>
    %55 = arith.addf %54, %1 : vector<8x8xf32>
    %cst_38 = arith.constant dense<0xFF800000> : vector<8xf32>
    %56 = vector.multi_reduction <maximumf>, %55, %cst_38 [1] : vector<8x8xf32> to vector<8xf32>
    %57 = vector.shape_cast %56 : vector<8xf32> to vector<8x1xf32>
    %58 = vector.broadcast %57 : vector<8x1xf32> to vector<8x8xf32>
    %59 = arith.subf %55, %58 : vector<8x8xf32>
    %60 = math.exp %59 : vector<8x8xf32>
    %cst_39 = arith.constant dense<0.000000e+00> : vector<8xf32>
    %61 = vector.multi_reduction <add>, %60, %cst_39 [1] : vector<8x8xf32> to vector<8xf32>
    %62 = vector.shape_cast %61 : vector<8xf32> to vector<8x1xf32>
    %63 = tpu.reciprocal %62 {approx = true} : vector<8x1xf32> -> vector<8x1xf32>
    %64 = vector.broadcast %63 : vector<8x1xf32> to vector<8x8xf32>
    %65 = arith.mulf %60, %64 : vector<8x8xf32>
    %66 = arith.truncf %65 : vector<8x8xf32> to vector<8x8xbf16>
    %cst_40 = arith.constant dense<0.000000e+00> : vector<8x8xf32>
    %67 = tpu.matmul %66, %51, %cst_40 {dimension_numbers = #tpu.dot_dimension_numbers<[1], [0], [0], [1], [0, 0, 1, 1], [], []>} : vector<8x8xbf16>, vector<8x8xbf16>, vector<8x8xf32> -> vector<8x8xf32>
    %c0_41 = arith.constant 0 : index
    %c0_42 = arith.constant 0 : index
    %c24 = arith.constant 24 : index
    %68 = vector.load %arg1[%c0_41, %c0_42, %c24] : memref<1x8x32xbf16, #tpu.memory_space<vmem>>, vector<1x8x8xbf16>
    %69 = vector.shape_cast %68 : vector<1x8x8xbf16> to vector<8x8xbf16>
    %c0_43 = arith.constant 0 : index
    %c0_44 = arith.constant 0 : index
    %c24_45 = arith.constant 24 : index
    %70 = vector.load %arg2[%c0_43, %c0_44, %c24_45] : memref<1x8x32xbf16, #tpu.memory_space<vmem>>, vector<1x8x8xbf16>
    %71 = vector.shape_cast %70 : vector<1x8x8xbf16> to vector<8x8xbf16>
    %c0_46 = arith.constant 0 : index
    %c0_47 = arith.constant 0 : index
    %c24_48 = arith.constant 24 : index
    %72 = vector.load %arg3[%c0_46, %c0_47, %c24_48] : memref<1x8x32xbf16, #tpu.memory_space<vmem>>, vector<1x8x8xbf16>
    %73 = vector.shape_cast %72 : vector<1x8x8xbf16> to vector<8x8xbf16>
    %cst_49 = arith.constant dense<0.000000e+00> : vector<8x8xf32>
    %74 = tpu.matmul %69, %71, %cst_49 {dimension_numbers = #tpu.dot_dimension_numbers<[1], [1], [0], [0], [0, 0, 1, 0], [], []>} : vector<8x8xbf16>, vector<8x8xbf16>, vector<8x8xf32> -> vector<8x8xf32>
    %cst_50 = arith.constant 0.353553385 : f32
    %75 = vector.broadcast %cst_50 : f32 to vector<8x8xf32>
    %76 = arith.mulf %74, %75 : vector<8x8xf32>
    %77 = arith.addf %76, %1 : vector<8x8xf32>
    %cst_51 = arith.constant dense<0xFF800000> : vector<8xf32>
    %78 = vector.multi_reduction <maximumf>, %77, %cst_51 [1] : vector<8x8xf32> to vector<8xf32>
    %79 = vector.shape_cast %78 : vector<8xf32> to vector<8x1xf32>
    %80 = vector.broadcast %79 : vector<8x1xf32> to vector<8x8xf32>
    %81 = arith.subf %77, %80 : vector<8x8xf32>
    %82 = math.exp %81 : vector<8x8xf32>
    %cst_52 = arith.constant dense<0.000000e+00> : vector<8xf32>
    %83 = vector.multi_reduction <add>, %82, %cst_52 [1] : vector<8x8xf32> to vector<8xf32>
    %84 = vector.shape_cast %83 : vector<8xf32> to vector<8x1xf32>
    %85 = tpu.reciprocal %84 {approx = true} : vector<8x1xf32> -> vector<8x1xf32>
    %86 = vector.broadcast %85 : vector<8x1xf32> to vector<8x8xf32>
    %87 = arith.mulf %82, %86 : vector<8x8xf32>
    %88 = arith.truncf %87 : vector<8x8xf32> to vector<8x8xbf16>
    %cst_53 = arith.constant dense<0.000000e+00> : vector<8x8xf32>
    %89 = tpu.matmul %88, %73, %cst_53 {dimension_numbers = #tpu.dot_dimension_numbers<[1], [0], [0], [1], [0, 0, 1, 1], [], []>} : vector<8x8xbf16>, vector<8x8xbf16>, vector<8x8xf32> -> vector<8x8xf32>
    %90 = tpu.concatenate %23, %45, %67, %89 in 1 : vector<8x8xf32>, vector<8x8xf32>, vector<8x8xf32>, vector<8x8xf32> -> vector<8x32xf32>
    %c0_54 = arith.constant 0 : index
    %c0_55 = arith.constant 0 : index
    %c0_56 = arith.constant 0 : index
    %91 = vector.load %arg5[%c0_54, %c0_55, %c0_56] : memref<1x8x32xf32, #tpu.memory_space<vmem>>, vector<1x8x32xf32>
    %92 = vector.shape_cast %91 : vector<1x8x32xf32> to vector<8x32xf32>
    %93 = vector.shape_cast %90 : vector<8x32xf32> to vector<1x8x32xf32>
    tpu.vector_store %arg5[%c0_54, %c0_55, %c0_56], %93 {strides = array<i32>} : memref<1x8x32xf32, #tpu.memory_space<vmem>>, vector<1x8x32xf32>,
    return
  }
  func.func @transform_0(%arg0: i32) -> (i32, i32, i32) {
    %c0_i32 = arith.constant 0 : i32
    %c0_i32_0 = arith.constant 0 : i32
    %c0_i32_1 = arith.constant 0 : i32
    return %arg0, %c0_i32, %c0_i32_0 : i32, i32, i32
  }
  func.func @transform_1(%arg0: i32) -> (i32, i32, i32) {
    %c0_i32 = arith.constant 0 : i32
    %c0_i32_0 = arith.constant 0 : i32
    %c0_i32_1 = arith.constant 0 : i32
    return %arg0, %c0_i32, %c0_i32_0 : i32, i32, i32
  }
  func.func @transform_2(%arg0: i32) -> (i32, i32, i32) {
    %c0_i32 = arith.constant 0 : i32
    %c0_i32_0 = arith.constant 0 : i32
    %c0_i32_1 = arith.constant 0 : i32
    return %arg0, %c0_i32, %c0_i32_0 : i32, i32, i32
  }
  func.func @transform_3(%arg0: i32) -> (i32, i32, i32) {
    %c0_i32 = arith.constant 0 : i32
    %c0_i32_0 = arith.constant 0 : i32
    %c0_i32_1 = arith.constant 0 : i32
    return %arg0, %c0_i32, %c0_i32_0 : i32, i32, i32
  }
  func.func @transform_4(%arg0: i32) -> (i32, i32, i32) {
    %c0_i32 = arith.constant 0 : i32
    %c0_i32_0 = arith.constant 0 : i32
    %c0_i32_1 = arith.constant 0 : i32
    return %arg0, %c0_i32, %c0_i32_0 : i32, i32, i32
  }
}

module attributes {stable_mosaic.version = 11 : i64} {
  func.func @_matmul_kernel(%arg0: i32, %arg1: i32, %arg2: i32, %arg3: memref<16x32xbf16, #tpu.memory_space<vmem>>, %arg4: memref<32x50xbf16, #tpu.memory_space<vmem>>, %arg5: memref<1x50xf32, #tpu.memory_space<vmem>>, %arg6: memref<16x50xf32, #tpu.memory_space<vmem>>, %arg7: memref<16x50xf32, #tpu.memory_space<vmem>>) attributes {dimension_semantics = [#tpu.dimension_semantics<parallel>, #tpu.dimension_semantics<parallel>, #tpu.dimension_semantics<arbitrary>], iteration_bounds = array<i64: 1, 1, 1>, scalar_prefetch = 0 : i64, scratch_operands = 1 : i64, tpu.core_type = #tpu.core_type<tc>, window_params = [{transform_indices = @transform_0, window_bounds = array<i64: 16, 32>}, {transform_indices = @transform_1, window_bounds = array<i64: 32, 50>}, {transform_indices = @transform_2, window_bounds = array<i64: 1, 50>}, {transform_indices = @transform_3, window_bounds = array<i64: 16, 50>}]} {
    %c0_i32 = arith.constant 0 : i32
    %0 = arith.cmpi eq, %arg2, %c0_i32 : i32
    %1 = arith.extui %0 : i1 to i32
    %c0_i32_0 = arith.constant 0 : i32
    %2 = arith.cmpi ne, %1, %c0_i32_0 : i32
    scf.if %2 {
      %cst_10 = arith.constant 0.000000e+00 : f32
      %12 = vector.broadcast %cst_10 : f32 to vector<16x50xf32>
      %c0_11 = arith.constant 0 : index
      %c0_12 = arith.constant 0 : index
      %13 = vector.load %arg7[%c0_11, %c0_12] : memref<16x50xf32, #tpu.memory_space<vmem>>, vector<16x50xf32>
      tpu.vector_store %arg7[%c0_11, %c0_12], %12 {strides = array<i32>} : memref<16x50xf32, #tpu.memory_space<vmem>>, vector<16x50xf32>,
    } else {
    }
    %c0 = arith.constant 0 : index
    %c0_1 = arith.constant 0 : index
    %3 = vector.load %arg7[%c0, %c0_1] : memref<16x50xf32, #tpu.memory_space<vmem>>, vector<16x50xf32>
    %c0_2 = arith.constant 0 : index
    %c0_3 = arith.constant 0 : index
    %4 = vector.load %arg3[%c0_2, %c0_3] : memref<16x32xbf16, #tpu.memory_space<vmem>>, vector<16x32xbf16>
    %c0_4 = arith.constant 0 : index
    %c0_5 = arith.constant 0 : index
    %5 = vector.load %arg4[%c0_4, %c0_5] : memref<32x50xbf16, #tpu.memory_space<vmem>>, vector<32x50xbf16>
    %cst = arith.constant dense<0.000000e+00> : vector<16x50xf32>
    %6 = tpu.matmul %4, %5, %cst {dimension_numbers = #tpu.dot_dimension_numbers<[1], [0], [0], [1], [0, 0, 1, 1], [], []>} : vector<16x32xbf16>, vector<32x50xbf16>, vector<16x50xf32> -> vector<16x50xf32>
    %7 = arith.addf %3, %6 : vector<16x50xf32>
    %c0_6 = arith.constant 0 : index
    %c0_7 = arith.constant 0 : index
    %8 = vector.load %arg7[%c0_6, %c0_7] : memref<16x50xf32, #tpu.memory_space<vmem>>, vector<16x50xf32>
    tpu.vector_store %arg7[%c0_6, %c0_7], %7 {strides = array<i32>} : memref<16x50xf32, #tpu.memory_space<vmem>>, vector<16x50xf32>,
    %c0_i32_8 = arith.constant 0 : i32
    %9 = arith.cmpi eq, %arg2, %c0_i32_8 : i32
    %10 = arith.extui %9 : i1 to i32
    %c0_i32_9 = arith.constant 0 : i32
    %11 = arith.cmpi ne, %10, %c0_i32_9 : i32
    scf.if %11 {
      %c0_10 = arith.constant 0 : index
      %c0_11 = arith.constant 0 : index
      %12 = vector.load %arg7[%c0_10, %c0_11] : memref<16x50xf32, #tpu.memory_space<vmem>>, vector<16x50xf32>
      %c0_12 = arith.constant 0 : index
      %c0_13 = arith.constant 0 : index
      %13 = vector.load %arg5[%c0_12, %c0_13] : memref<1x50xf32, #tpu.memory_space<vmem>>, vector<1x50xf32>
      %14 = vector.broadcast %13 : vector<1x50xf32> to vector<16x50xf32>
      %15 = arith.addf %12, %14 : vector<16x50xf32>
      %c0_14 = arith.constant 0 : index
      %c0_15 = arith.constant 0 : index
      %16 = vector.load %arg6[%c0_14, %c0_15] : memref<16x50xf32, #tpu.memory_space<vmem>>, vector<16x50xf32>
      tpu.vector_store %arg6[%c0_14, %c0_15], %15 {strides = array<i32>} : memref<16x50xf32, #tpu.memory_space<vmem>>, vector<16x50xf32>,
    } else {
    }
    return
  }
  func.func @transform_0(%arg0: i32, %arg1: i32, %arg2: i32) -> (i32, i32) {
    %c0_i32 = arith.constant 0 : i32
    return %arg0, %arg2 : i32, i32
  }
  func.func @transform_1(%arg0: i32, %arg1: i32, %arg2: i32) -> (i32, i32) {
    %c0_i32 = arith.constant 0 : i32
    return %arg2, %arg1 : i32, i32
  }
  func.func @transform_2(%arg0: i32, %arg1: i32, %arg2: i32) -> (i32, i32) {
    %c0_i32 = arith.constant 0 : i32
    %c0_i32_0 = arith.constant 0 : i32
    return %c0_i32, %arg1 : i32, i32
  }
  func.func @transform_3(%arg0: i32, %arg1: i32, %arg2: i32) -> (i32, i32) {
    %c0_i32 = arith.constant 0 : i32
    return %arg0, %arg1 : i32, i32
  }
}

</mosaic_0001>

<bundles_post_ra>
// kernel: bert_transformer_forward.100
= control target key start
LH: loop header
LB: loop body
LE: loop exit
PB: predicated region body
PF: predicated region fallthrough
CT: control target
= control target key end

     0   :  { %vm18_vm0 = vcmask 261120   ;;  %s118_s0 = inlined_call_operand.vmem [shape: f32[16,32], index: 0, kind: input, shape index: {}]   ;;  %s119_s1 = inlined_call_operand.vmem [shape: f32[1,32], index: 1, kind: input, shape index: {}]   ;;  %s120_s2 = inlined_call_operand.vmem [shape: f32[1,32], index: 2, kind: input, shape index: {}]   ;;  %s121_s3 = inlined_call_operand.vmem [shape: f32[16,32], index: 3, kind: output, shape index: {}]  }
   0x1   :  { %v14_v0 = vld [vmem:[%s118_s0] sm:$0xff]  ;;  %v15_v1 = vld [vmem:[%s118_s0 + $0x8] sm:$0xff] }
   0x2   :  { %v19_v2 = vsel %vm18_vm0, %v14_v0, 0.0  ;;  %v22_v3 = vsel %vm18_vm0, %v15_v1, 0.0  ;;  %v68_v21 = vld [vmem:[%s119_s1] ss:$0 sm:$0xff] }
   0x3   :  { %20 = vadd.xlane.f32.xlu0 %v19_v2  ;;  %v69_v23 = vld [vmem:[%s120_s2] ss:$0 sm:$0xff] }
   0x7   :  { %23 = vadd.xlane.f32.xlu0 %v22_v3 }
  0x90   :  { %v21_v4 = vpop.xlane.xlu0 %20 }
  0x91   :  { %v26_v5 = vmul.f32 0.03125, %v21_v4 }
  0x93   :  { %v28_v6 = vsub.f32 %v14_v0, %v26_v5 }
  0x94   :  { %v24_v7 = vpop.xlane.xlu0 %23 }
  0x95   :  { %v27_v8 = vmul.f32 0.03125, %v24_v7  ;;  %v30_v9 = vmul.f32 %v28_v6, %v28_v6 }
  0x97   :  { %v29_v10 = vsub.f32 %v15_v1, %v27_v8  ;;  %v32_v11 = vsel %vm18_vm0, %v30_v9, 0.0 }
  0x98   :  { %33 = vadd.xlane.f32.xlu1 %v32_v11 }
  0x99   :  { %v31_v12 = vmul.f32 %v29_v10, %v29_v10 }
  0x9b   :  { %v35_v13 = vsel %vm18_vm0, %v31_v12, 0.0 }
  0x9c   :  { %36 = vadd.xlane.f32.xlu1 %v35_v13 }
 0x125   :  { %v34_v14 = vpop.xlane.xlu1 %33 }
 0x126   :  { %v38_v15 = vmul.f32 0.03125, %v34_v14 }
 0x128   :  { %v40_v16 = vadd.f32 1e-12, %v38_v15 }
 0x129   :  { %v37_v17 = vpop.xlane.xlu1 %36 }
 0x12a   :  { %70 = vrsqrt.f32 %v40_v16  ;;  %v39_v18 = vmul.f32 0.03125, %v37_v17 }
 0x12c   :  { %v41_v19 = vadd.f32 1e-12, %v39_v18 }
 0x12e   :  { %72 = vrsqrt.f32 %v41_v19 }
 0x134   :  { %v71_v20 = vpop.eup %70 }
 0x135   :  { %v44_v22 = vmul.f32 %v71_v20, %v28_v6 }
 0x137   :  { %v52_v24 = vmul.f32 %v68_v21, %v44_v22 }
 0x138   :  { %v73_v25 = vpop.eup %72 }
 0x139   :  { %v60_v26 = vadd.f32 %v69_v23, %v52_v24  ;;  %v45_v27 = vmul.f32 %v73_v25, %v29_v10 }
 0x13b   :  { %62 = vst.msk [vmem:[%s121_s3] sm:$0xff] %vm18_vm0, %v60_v26  ;;  %v53_v28 = vmul.f32 %v68_v21, %v45_v27 }
 0x13d   :  { %v61_v29 = vadd.f32 %v69_v23, %v53_v28 }
 0x13f   :  { %63 = vst.msk [vmem:[%s121_s3 + $0x8] sm:$0xff] %vm18_vm0, %v61_v29 }

// kernel: bert_transformer_forward.101
= control target key start
LH: loop header
LB: loop body
LE: loop exit
PB: predicated region body
PF: predicated region fallthrough
CT: control target
= control target key end

     0   :  { %vm19_vm0 = vcmask 785408   ;;  %v138_v0 = vmov 0.0   ;;  %vm139_vm1 = vmmov 0   ;;  %vm47_vm2 = vcmask 261120   ;;  %s184_s1 = inlined_call_operand.vmem [shape: bf16[32,96], index: 1, kind: input, shape index: {}]   ;;  %s185_s0 = inlined_call_operand.vmem [shape: bf16[16,32], index: 0, kind: input, shape index: {}]   ;;  %s186_s2 = inlined_call_operand.vmem [shape: f32[1,96], index: 2, kind: input, shape index: {}]   ;;  %s187_s3 = inlined_call_operand.vmem [shape: f32[16,96], index: 3, kind: output, shape index: {}]  }
   0x1   :  { %125 = vmatprep.subr.bf16.mxu0 %v138_v0  ;;  %v135_v1 = vld [vmem:[%s184_s1] sm:$0xff]   ;;  %129 = vmatprep.mubr.msk.bf16.mxu0 %vm139_vm1, %v138_v0  ;;  %20 = vst.msk [vmem:[#allocation2] sm:$0xff] %vm19_vm0, %v138_v0  ;;  %21 = vst.msk [vmem:[#allocation2 + $0x8] sm:$0xff] %vm19_vm0, %v138_v0  ;;  %v136_v2 = vld [vmem:[%s184_s1 + $0x8] sm:$0xff]  }
   0x2   :  { %126 = vmatpush3.bf16.msra.mxu0 %v135_v1  ;;  %v137_v3 = vld [vmem:[%s185_s0] sm:$0xff]  }
   0x3   :  { %127 = vmatprep.subr.bf16.mxu0 %v138_v0  ;;  %v121_v12 = vld [vmem:[%s186_s2] ss:$0 sm:$0xff] }
   0x6   :  { %128 = vmatpush3.bf16.msra.mxu0 %v136_v2 }
   0x8   :  { %v22_v4 = vld [vmem:[#allocation2] sm:$0xff]  ;;  %v23_v6 = vld [vmem:[#allocation2 + $0x8] sm:$0xff] }
   0x9   :  { %130 = vmatmul.mubr.msk.bf16.vlgmr.msra.gmra.mrb[0].mxu0 %vm47_vm2, %v137_v3 }
  0xdc   :  { %v85_v5 = vpop.f32.mrb[0].mxu0 }
  0xdd   :  { %v92_v7 = vadd.f32 %v85_v5, %v22_v4  ;;  %v131_v8 = vpop.f32.mrb[1].mxu0 }
  0xde   :  { %v88_v9 = vpop.f32.mrb[2].mxu0 }
  0xdf   :  { %95 = vst.msk [vmem:[#allocation2] sm:$0xff] %vm19_vm0, %v92_v7  ;;  %v93_v10 = vadd.f32 %v88_v9, %v23_v6  ;;  %v132_v11 = vpop.f32.mrb[3].mxu0 }
  0xe1   :  { %96 = vst.msk [vmem:[#allocation2 + $0x8] sm:$0xff] %vm19_vm0, %v93_v10 }
  0xe6   :  { %v100_v13 = vld [vmem:[#allocation2] sm:$0xff] }
  0xe7   :  { %v109_v14 = vadd.f32 %v121_v12, %v100_v13 }
  0xe8   :  { %v101_v15 = vld [vmem:[#allocation2 + $0x8] sm:$0xff] }
  0xe9   :  { %111 = vst.msk [vmem:[%s187_s3] sm:$0xff] %vm19_vm0, %v109_v14  ;;  %v110_v16 = vadd.f32 %v121_v12, %v101_v15 }
  0xeb   :  { %112 = vst.msk [vmem:[%s187_s3 + $0x8] sm:$0xff] %vm19_vm0, %v110_v16 }

// kernel: bert_transformer_forward.103
= control target key start
LH: loop header
LB: loop body
LE: loop exit
PB: predicated region body
PF: predicated region fallthrough
CT: control target
= control target key end

     0   :  { %vm19_vm0 = vcmask 261120   ;;  %v137_v0 = vmov 0.0   ;;  %vm138_vm1 = vmmov 0   ;;  %s184_s1 = inlined_call_operand.vmem [shape: bf16[32,32], index: 1, kind: input, shape index: {}]   ;;  %s185_s0 = inlined_call_operand.vmem [shape: bf16[16,32], index: 0, kind: input, shape index: {}]   ;;  %s186_s2 = inlined_call_operand.vmem [shape: f32[1,32], index: 2, kind: input, shape index: {}]   ;;  %s187_s3 = inlined_call_operand.vmem [shape: f32[16,32], index: 3, kind: output, shape index: {}]  }
   0x1   :  { %124 = vmatprep.subr.bf16.mxu0 %v137_v0  ;;  %v134_v1 = vld [vmem:[%s184_s1] sm:$0xff]   ;;  %128 = vmatprep.mubr.msk.bf16.mxu0 %vm138_vm1, %v137_v0  ;;  %20 = vst.msk [vmem:[#allocation2] sm:$0xff] %vm19_vm0, %v137_v0  ;;  %21 = vst.msk [vmem:[#allocation2 + $0x8] sm:$0xff] %vm19_vm0, %v137_v0  ;;  %v135_v2 = vld [vmem:[%s184_s1 + $0x8] sm:$0xff]  }
   0x2   :  { %125 = vmatpush3.bf16.msra.mxu0 %v134_v1  ;;  %v136_v3 = vld [vmem:[%s185_s0] sm:$0xff]  }
   0x3   :  { %126 = vmatprep.subr.bf16.mxu0 %v137_v0  ;;  %v120_v12 = vld [vmem:[%s186_s2] ss:$0 sm:$0xff] }
   0x6   :  { %127 = vmatpush3.bf16.msra.mxu0 %v135_v2 }
   0x8   :  { %v22_v4 = vld [vmem:[#allocation2] sm:$0xff]  ;;  %v23_v6 = vld [vmem:[#allocation2 + $0x8] sm:$0xff] }
   0x9   :  { %129 = vmatmul.mubr.msk.bf16.vlgmr.msra.gmra.mrb[0].mxu0 %vm19_vm0, %v136_v3 }
  0xdc   :  { %v85_v5 = vpop.f32.mrb[0].mxu0 }
  0xdd   :  { %v92_v7 = vadd.f32 %v85_v5, %v22_v4  ;;  %v130_v8 = vpop.f32.mrb[1].mxu0 }
  0xde   :  { %v88_v9 = vpop.f32.mrb[2].mxu0 }
  0xdf   :  { %94 = vst.msk [vmem:[#allocation2] sm:$0xff] %vm19_vm0, %v92_v7  ;;  %v93_v10 = vadd.f32 %v88_v9, %v23_v6  ;;  %v131_v11 = vpop.f32.mrb[3].mxu0 }
  0xe1   :  { %95 = vst.msk [vmem:[#allocation2 + $0x8] sm:$0xff] %vm19_vm0, %v93_v10 }
  0xe6   :  { %v99_v13 = vld [vmem:[#allocation2] sm:$0xff] }
  0xe7   :  { %v108_v14 = vadd.f32 %v120_v12, %v99_v13 }
  0xe8   :  { %v100_v15 = vld [vmem:[#allocation2 + $0x8] sm:$0xff] }
  0xe9   :  { %110 = vst.msk [vmem:[%s187_s3] sm:$0xff] %vm19_vm0, %v108_v14  ;;  %v109_v16 = vadd.f32 %v120_v12, %v100_v15 }
  0xeb   :  { %111 = vst.msk [vmem:[%s187_s3 + $0x8] sm:$0xff] %vm19_vm0, %v109_v16 }

// kernel: bert_transformer_forward.102
= control target key start
LH: loop header
LB: loop body
LE: loop exit
PB: predicated region body
PF: predicated region fallthrough
CT: control target
= control target key end

     0   :  { %s973_s15 = smov 0   ;;  %s1081_s0 = inlined_call_operand.vmem [shape: bf16[2,8,32], index: 0, kind: input, shape index: {}]   ;;  %s1082_s1 = inlined_call_operand.vmem [shape: bf16[2,8,32], index: 1, kind: input, shape index: {}]   ;;  %s1083_s2 = inlined_call_operand.vmem [shape: bf16[2,8,32], index: 2, kind: input, shape index: {}]   ;;  %s1084_s3 = inlined_call_operand.vmem [shape: f32[2,1,8], index: 3, kind: input, shape index: {}]   ;;  %s1085_s4 = inlined_call_operand.vmem [shape: f32[2,8,32], index: 4, kind: output, shape index: {}]  }
   0x1 LB: > { %s810_s16 = sadd.s32 4294967295, %s938_s15   ;;  %p814_p0 = scmp.ge.s32.totalorder %s938_s15, 1  ;;  %s938_s15 = sphi %s973_s15, %s14_s15  }
   0x2   : > { %p187_p1 = scmp.lt.s32.totalorder %s938_s15, 3 }
   0x4   : > { %p188_p2 = pnand %p814_p0, %p187_p1 }
   0x5   : > { %p222_p3 = scmp.lt.s32.totalorder (!%p188_p2), %s810_s16, 1  ;;  %v940_v0 = vmov (!%p188_p2), 0.0   ;;  %vm941_vm0 = vmmov (!%p188_p2), 0   ;;  %vm246_vm1 = vcmask (!%p188_p2), 64512   ;;  %s942_s27 = smov (!%p188_p2), 120   ;;  %vm316_vm2 = vcmask (!%p188_p2), 1043456  }
   0x6   : > { %191 = sbr.rel (%p188_p2) target bundleno = 1479 (0x5c7), region = 36  ;;  %849 = vmatprep.subr.bf16.mxu0 (!%p188_p2), %v940_v0  ;;  %851 = vmatprep.mubr.msk.bf16.mxu0 (!%p188_p2), %vm941_vm0, %v940_v0  ;;  %s943_s28 = smov (!%p188_p2), 112   ;;  %vm718_vm3 = vcmask (!%p188_p2), 130048   ;;  %vm720_vm4 = vcmask (!%p188_p2), 195584   ;;  %vm722_vm5 = vcmask (!%p188_p2), 261120  }
   0x7   : > { %855 = vmatprep.subr.bf16.mxu1 (!%p188_p2), %v940_v0  ;;  %857 = vmatprep.mubr.msk.bf16.mxu1 (!%p188_p2), %vm941_vm0, %v940_v0  ;;  %s944_s29 = smov (!%p188_p2), 104   ;;  %s945_s7 = smov (!%p188_p2), 8  }
   0x8   : > { %s946_s8 = smov (!%p188_p2), 16   ;;  %s947_s9 = smov (!%p188_p2), 24  }
   0xd   : > { %s1087_s16 = smov (!%p222_p3, %s810_s16), 1 }
   0xe   : > { %s990_s17 = sshll.u32 %s1087_s16, 2  ;;  %s236_s26 = scalar_lea.vmem %s1084_s3, %s1087_s16 }
   0xf   : > { %s229_s20 = scalar_lea.vmem %s1082_s1, %s990_s17  ;;  %s225_s23 = scalar_lea.vmem %s1081_s0, %s990_s17  ;;  %v1009_v5 = vld [vmem:[%s236_s26] ss:$0 sm:$0xff] }
  0x10   : > { %v244_v1 = vld [vmem:[%s229_s20] sm:$0xf]  ;;  %s233_s6 = scalar_lea.vmem %s1083_s2, %s990_s17  ;;  %s818_s10 = sshll.u32 %s1087_s16, 3 }
  0x11   : > { %v251_v2 = vsel %vm246_vm1, %v244_v1, 0  ;;  %v243_v3 = vld [vmem:[%s225_s23] sm:$0xf]  ;;  %v823_v12 = vcombine.low %v244_v1, %v244_v1  ;;  %s240_s13 = scalar_lea.vmem %s1085_s4, %s818_s10 }
  0x12   : > { %850 = vmatpush3.bf16.xpose.msra.mxu0 %v251_v2  ;;  %v822_v13 = vcombine.low %v243_v3, %v243_v3  ;;  %v1023_v19 = vld [vmem:[%s233_s6] sm:$0xf] }
  0x13   : > { %867 = vmatprep.subr.bf16.mxu0 %v940_v0  ;;  %368 = vrot.lane.b32.xlu1 %v823_v12, %s942_s27  ;;  %v318_v20 = vsel %vm316_vm2, %v1023_v19, 0 }
  0x14   : > { %856 = vmatpush3.bf16.msra.mxu1 %v318_v20 }
  0x15   : > { %861 = vmatprep.subr.bf16.mxu1 %v940_v0 }
  0x17   : > { %363 = vrot.lane.b32.xlu1 %v822_v13, %s942_s27 }
  0x19   : > { %852 = vmatmul.mubr.msk.bf16.vlgmr.msra.gmra.mrb[0].mxu0 %vm246_vm1, %v243_v3 }
  0x1a   : > { %869 = vmatprep.mubr.msk.bf16.mxu0 %vm941_vm0, %v940_v0 }
  0x1b   : > { %481 = vrot.lane.b32.xlu1 %v822_v13, %s943_s28 }
  0x1f   : > { %595 = vrot.lane.b32.xlu1 %v823_v12, %s944_s29 }
  0x23   : > { %593 = vrot.lane.b32.xlu1 %v822_v13, %s944_s29 }
  0x85   : > { %v369_v23 = vpop.permute.xlu1 %368 }
  0x86   : > { %v374_v25 = vsel %vm246_vm1, %v369_v23, 0 }
  0x89   : > { %v364_v27 = vpop.permute.xlu1 %363 }
  0x8d   : > { %v482_v29 = vpop.permute.xlu1 %481 }
  0x91   : > { %v596_v31 = vpop.permute.xlu1 %595 }
  0x92   : > { %v601_v32 = vsel %vm246_vm1, %v596_v31, 0 }
  0x95   : > { %v594_v33 = vpop.permute.xlu1 %593 }
  0xec   : > { %v287_v4 = vpop.f32.mrb[0].mxu0 }
  0xed   : > { %v293_v6 = vmul.f32 0.35355338, %v287_v4  ;;  %v853_v7 = vpop.f32.mrb[1].mxu0 }
  0xee   : > { %v290_v8 = vpop.f32.mrb[2].mxu0 }
  0xef   : > { %v854_v9 = vpop.f32.mrb[3].mxu0  ;;  %v300_v10 = vadd.f32 %v1009_v5, %v293_v6 }
  0xf1   : > { %v301_v11 = vsel %vm246_vm1, %v300_v10, -inf }
  0xf2   : > { %302 = vmax.xlane.f32.xlu0 %v301_v11 }
 0x17f   : > { %v303_v14 = vpop.xlane.xlu0 %302 }
 0x180   : > { %v304_v15 = vsub.f32 %v300_v10, %v303_v14 }
 0x182   : > { %v305_v16 = vmul.f32 1.442695, %v304_v15 }
 0x184   : > { %916 = vpow2.f32 %v305_v16 }
 0x18e   : > { %v917_v17 = vpop.eup %916 }
 0x18f   : > { %v307_v18 = vsel %vm246_vm1, %v917_v17, 0.0 }
 0x190   : > { %308 = vadd.xlane.f32.xlu0 %v307_v18 }
 0x1a6   : > { %483 = vrot.lane.b32.xlu0 %v823_v12, %s943_s28 }
 0x21d   : > { %v309_v21 = vpop.xlane.xlu0 %308 }
 0x21e   : > { %918 = vrcp.f32 %v309_v21 }
 0x221   : > { %v484_v28 = vpop.permute.xlu0 %483 }
 0x222   : > { %v489_v30 = vsel %vm246_vm1, %v484_v28, 0 }
 0x228   : > { %v919_v22 = vpop.eup %918 }
 0x229   : > { %v311_v24 = vmul.f32 %v919_v22, %v917_v17 }
 0x22b   : > { %v312_v26 = vpack.c.bf16 %v311_v24, %v311_v24 }
 0x22d   : > { %858 = vmatmul.mubr.msk.bf16.vlgmr.msra.gmra.mrb[0].mxu1 %vm246_vm1, %v312_v26 }
 0x22e   : > { %862 = vmatpush3.bf16.xpose.msra.mxu1 %v374_v25  ;;  %863 = vmatprep.mubr.msk.bf16.mxu1 %vm941_vm0, %v940_v0 }
 0x22f   : > { %873 = vmatprep.subr.bf16.mxu1 %v940_v0 }
 0x235   : > { %864 = vmatmul.mubr.msk.bf16.vlgmr.msra.gmra.mrb[4].mxu1 %vm246_vm1, %v364_v27 }
 0x236   : > { %874 = vmatpush3.bf16.xpose.msra.mxu1 %v489_v30  ;;  %875 = vmatprep.mubr.msk.bf16.mxu1 %vm941_vm0, %v940_v0 }
 0x237   : > { %885 = vmatprep.subr.bf16.mxu1 %v940_v0 }
 0x23d   : > { %876 = vmatmul.mubr.msk.bf16.vlgmr.msra.gmra.mrb[8].mxu1 %vm246_vm1, %v482_v29 }
 0x23e   : > { %886 = vmatpush3.bf16.xpose.msra.mxu1 %v601_v32  ;;  %887 = vmatprep.mubr.msk.bf16.mxu1 %vm941_vm0, %v940_v0 }
 0x245   : > { %888 = vmatmul.mubr.msk.bf16.vlgmr.msra.gmra.mrb[12].mxu1 %vm246_vm1, %v594_v33 }
 0x300   : > { %v1044_v34 = vpop.f32.mrb[0].mxu1 }
 0x301   : > { %v859_v35 = vpop.f32.mrb[1].mxu1 }
 0x302   : > { %v357_v36 = vpop.f32.mrb[2].mxu1 }
 0x303   : > { %v860_v37 = vpop.f32.mrb[3].mxu1 }
 0x308   : > { %v410_v38 = vpop.f32.mrb[4].mxu1 }
 0x309   : > { %v416_v39 = vmul.f32 0.35355338, %v410_v38  ;;  %v865_v40 = vpop.f32.mrb[5].mxu1 }
 0x30a   : > { %v413_v41 = vpop.f32.mrb[6].mxu1 }
 0x30b   : > { %v866_v42 = vpop.f32.mrb[7].mxu1  ;;  %v417_v43 = vadd.f32 %v1009_v5, %v416_v39 }
 0x30d   : > { %v418_v44 = vsel %vm246_vm1, %v417_v43, -inf }
 0x30e   : > { %419 = vmax.xlane.f32.xlu1 %v418_v44 }
 0x310   : > { %v525_v45 = vpop.f32.mrb[8].mxu1 }
 0x311   : > { %v531_v46 = vmul.f32 0.35355338, %v525_v45  ;;  %v877_v47 = vpop.f32.mrb[9].mxu1 }
 0x312   : > { %v528_v48 = vpop.f32.mrb[10].mxu1 }
 0x313   : > { %v532_v49 = vadd.f32 %v1009_v5, %v531_v46  ;;  %v878_v50 = vpop.f32.mrb[11].mxu1 }
 0x315   : > { %v533_v51 = vsel %vm246_vm1, %v532_v49, -inf }
 0x316   : > { %534 = vmax.xlane.f32.xlu0 %v533_v51 }
 0x318   : > { %v637_v52 = vpop.f32.mrb[12].mxu1 }
 0x319   : > { %v643_v53 = vmul.f32 0.35355338, %v637_v52  ;;  %v889_v54 = vpop.f32.mrb[13].mxu1 }
 0x31a   : > { %v640_v55 = vpop.f32.mrb[14].mxu1 }
 0x31b   : > { %v644_v56 = vadd.f32 %v1009_v5, %v643_v53  ;;  %v890_v57 = vpop.f32.mrb[15].mxu1  ;;  %v825_v5 = vcombine.low %v1023_v19, %v1023_v19 }
 0x31d   : > { %v645_v58 = vsel %vm246_vm1, %v644_v56, -inf }
 0x31e   : > { %646 = vmax.xlane.f32.xlu1 %v645_v58 }
 0x39b   : > { %v420_v59 = vpop.xlane.xlu1 %419 }
 0x39c   : > { %v421_v60 = vsub.f32 %v417_v43, %v420_v59 }
 0x39e   : > { %v422_v61 = vmul.f32 1.442695, %v421_v60 }
 0x3a0   : > { %920 = vpow2.f32 %v422_v61 }
 0x3a3   : > { %v535_v62 = vpop.xlane.xlu0 %534 }
 0x3a4   : > { %v536_v63 = vsub.f32 %v532_v49, %v535_v62 }
 0x3a6   : > { %v537_v1 = vmul.f32 1.442695, %v536_v63 }
 0x3a8   : > { %922 = vpow2.f32 %v537_v1 }
 0x3aa   : > { %v921_v2 = vpop.eup %920 }
 0x3ab   : > { %v424_v3 = vsel %vm246_vm1, %v921_v2, 0.0  ;;  %v647_v7 = vpop.xlane.xlu1 %646 }
 0x3ac   : > { %425 = vadd.xlane.f32.xlu1 %v424_v3  ;;  %v648_v8 = vsub.f32 %v644_v56, %v647_v7 }
 0x3ae   : > { %v649_v9 = vmul.f32 1.442695, %v648_v8 }
 0x3b0   : > { %924 = vpow2.f32 %v649_v9 }
 0x3b2   : > { %v923_v4 = vpop.eup %922 }
 0x3b3   : > { %v539_v6 = vsel %vm246_vm1, %v923_v4, 0.0 }
 0x3b4   : > { %540 = vadd.xlane.f32.xlu0 %v539_v6 }
 0x3ba   : > { %v925_v10 = vpop.eup %924 }
 0x3bb   : > { %v651_v11 = vsel %vm246_vm1, %v925_v10, 0.0 }
 0x3bd   : > { %545 = vrot.lane.b32.xlu1 %v825_v5, %s943_s28 }
 0x3ca   : > { %433 = vrot.lane.b32.xlu0 %v825_v5, %s942_s27 }
 0x3e1   : > { %652 = vadd.xlane.f32.xlu1 %v651_v11 }
 0x3f2   : > { %657 = vrot.lane.b32.xlu1 %v825_v5, %s944_s29 }
 0x439   : > { %v426_v12 = vpop.xlane.xlu1 %425 }
 0x43a   : > { %926 = vrcp.f32 %v426_v12 }
 0x43d   : > { %v546_v18 = vpop.permute.xlu1 %545 }
 0x43e   : > { %v551_v20 = vsel %vm316_vm2, %v546_v18, 0 }
 0x441   : > { %v541_v13 = vpop.xlane.xlu0 %540 }
 0x442   : > { %928 = vrcp.f32 %v541_v13 }
 0x444   : > { %v927_v14 = vpop.eup %926 }
 0x445   : > { %v428_v15 = vmul.f32 %v927_v14, %v921_v2  ;;  %v434_v16 = vpop.permute.xlu0 %433 }
 0x446   : > { %v439_v17 = vsel %vm316_vm2, %v434_v16, 0 }
 0x447   : > { %868 = vmatpush3.bf16.msra.mxu0 %v439_v17  ;;  %v429_v19 = vpack.c.bf16 %v428_v15, %v428_v15 }
 0x448   : > { %879 = vmatprep.subr.bf16.mxu0 %v940_v0 }
 0x44a   : > { %870 = vmatmul.mubr.msk.bf16.vlgmr.msra.gmra.mrb[4].mxu0 %vm246_vm1, %v429_v19 }
 0x44b   : > { %880 = vmatpush3.bf16.msra.mxu0 %v551_v20  ;;  %881 = vmatprep.mubr.msk.bf16.mxu0 %vm941_vm0, %v940_v0 }
 0x44c   : > { %v929_v21 = vpop.eup %928  ;;  %891 = vmatprep.subr.bf16.mxu0 %v940_v0 }
 0x44d   : > { %v543_v22 = vmul.f32 %v929_v21, %v923_v4 }
 0x44f   : > { %v544_v23 = vpack.c.bf16 %v543_v22, %v543_v22 }
 0x452   : > { %882 = vmatmul.mubr.msk.bf16.vlgmr.msra.gmra.mrb[8].mxu0 %vm246_vm1, %v544_v23 }
 0x453   : > { %893 = vmatprep.mubr.msk.bf16.mxu0 %vm941_vm0, %v940_v0 }
 0x46e   : > { %v653_v24 = vpop.xlane.xlu1 %652 }
 0x46f   : > { %930 = vrcp.f32 %v653_v24 }
 0x472   : > { %v658_v25 = vpop.permute.xlu1 %657 }
 0x473   : > { %v663_v26 = vsel %vm316_vm2, %v658_v25, 0 }
 0x474   : > { %892 = vmatpush3.bf16.msra.mxu0 %v663_v26 }
 0x479   : > { %v931_v27 = vpop.eup %930 }
 0x47a   : > { %v655_v28 = vmul.f32 %v931_v27, %v925_v10 }
 0x47c   : > { %v656_v29 = vpack.c.bf16 %v655_v28, %v655_v28 }
 0x47e   : > { %894 = vmatmul.mubr.msk.bf16.vlgmr.msra.gmra.mrb[12].mxu0 %vm246_vm1, %v656_v29 }
 0x51d   : > { %v475_v30 = vpop.f32.mrb[4].mxu0 }
 0x51e   : > { %706 = vrot.lane.b32.xlu0 %v475_v30, %s945_s7  ;;  %v871_v31 = vpop.f32.mrb[5].mxu0 }
 0x51f   : > { %v478_v32 = vpop.f32.mrb[6].mxu0 }
 0x520   : > { %v872_v33 = vpop.f32.mrb[7].mxu0 }
 0x525   : > { %v587_v35 = vpop.f32.mrb[8].mxu0 }
 0x526   : > { %710 = vrot.lane.b32.xlu1 %v587_v35, %s946_s8  ;;  %v883_v0 = vpop.f32.mrb[9].mxu0 }
 0x527   : > { %v590_v36 = vpop.f32.mrb[10].mxu0 }
 0x528   : > { %v884_v37 = vpop.f32.mrb[11].mxu0 }
 0x551   : > { %v699_v38 = vpop.f32.mrb[12].mxu0 }
 0x552   : > { %714 = vrot.lane.b32.xlu0 %v699_v38, %s947_s9  ;;  %v895_v39 = vpop.f32.mrb[13].mxu0 }
 0x553   : > { %v702_v40 = vpop.f32.mrb[14].mxu0 }
 0x554   : > { %v896_v41 = vpop.f32.mrb[15].mxu0 }
 0x590   : > { %v707_v42 = vpop.permute.xlu0 %706 }
 0x591   : > { %v717_v44 = vsel %vm246_vm1, %v1044_v34, %v707_v42 }
 0x598   : > { %v711_v43 = vpop.permute.xlu1 %710 }
 0x599   : > { %v719_v45 = vsel %vm718_vm3, %v717_v44, %v711_v43 }
 0x5c4   : > { %v715_v46 = vpop.permute.xlu0 %714 }
 0x5c5   : > { %v721_v47 = vsel %vm720_vm4, %v719_v45, %v715_v46 }
 0x5c6   : > { %723 = vst.msk [vmem:[%s240_s13] sm:$0xff] %vm722_vm5, %v721_v47 }
 0x5c7 PF: > { %s14_s15 = sadd.s32 1, %s938_s15  }
 0x5c8   : > { %p11_p4 = scmp.ge.s32.totalorder %s14_s15, 4  }
 0x5ca   :  { %13 = sbr.rel (!%p11_p4) target bundleno = 1 (0x1), region = 75 }

// kernel: bert_transformer_forward.104
= control target key start
LH: loop header
LB: loop body
LE: loop exit
PB: predicated region body
PF: predicated region fallthrough
CT: control target
= control target key end

     0   :  { %vm25_vm0 = vcmask 261120   ;;  %s136_s0 = inlined_call_operand.vmem [shape: f32[16,32], index: 0, kind: input, shape index: {}]   ;;  %s137_s1 = inlined_call_operand.vmem [shape: f32[16,32], index: 1, kind: input, shape index: {}]   ;;  %s138_s2 = inlined_call_operand.vmem [shape: f32[1,32], index: 2, kind: input, shape index: {}]   ;;  %s139_s3 = inlined_call_operand.vmem [shape: f32[1,32], index: 3, kind: input, shape index: {}]   ;;  %s140_s4 = inlined_call_operand.vmem [shape: f32[16,32], index: 4, kind: output, shape index: {}]  }
   0x1   :  { %v17_v0 = vld [vmem:[%s136_s0] sm:$0xff]  ;;  %v18_v2 = vld [vmem:[%s136_s0 + $0x8] sm:$0xff] }
   0x2   :  { %v19_v1 = vld [vmem:[%s137_s1] sm:$0xff]  ;;  %v20_v4 = vld [vmem:[%s137_s1 + $0x8] sm:$0xff] }
   0x3   :  { %v21_v3 = vadd.f32 %v19_v1, %v17_v0  ;;  %v22_v5 = vadd.f32 %v20_v4, %v18_v2  ;;  %v75_v25 = vld [vmem:[%s138_s2] ss:$0 sm:$0xff] }
   0x4   :  { %v76_v27 = vld [vmem:[%s139_s3] ss:$0 sm:$0xff] }
   0x5   :  { %v26_v6 = vsel %vm25_vm0, %v21_v3, 0.0  ;;  %v29_v7 = vsel %vm25_vm0, %v22_v5, 0.0 }
   0x6   :  { %27 = vadd.xlane.f32.xlu0 %v26_v6 }
   0xa   :  { %30 = vadd.xlane.f32.xlu0 %v29_v7 }
  0x93   :  { %v28_v8 = vpop.xlane.xlu0 %27 }
  0x94   :  { %v33_v9 = vmul.f32 0.03125, %v28_v8 }
  0x96   :  { %v35_v10 = vsub.f32 %v21_v3, %v33_v9 }
  0x97   :  { %v31_v11 = vpop.xlane.xlu0 %30 }
  0x98   :  { %v34_v12 = vmul.f32 0.03125, %v31_v11  ;;  %v37_v13 = vmul.f32 %v35_v10, %v35_v10 }
  0x9a   :  { %v36_v14 = vsub.f32 %v22_v5, %v34_v12  ;;  %v39_v15 = vsel %vm25_vm0, %v37_v13, 0.0 }
  0x9b   :  { %40 = vadd.xlane.f32.xlu1 %v39_v15 }
  0x9c   :  { %v38_v16 = vmul.f32 %v36_v14, %v36_v14 }
  0x9e   :  { %v42_v17 = vsel %vm25_vm0, %v38_v16, 0.0 }
  0x9f   :  { %43 = vadd.xlane.f32.xlu1 %v42_v17 }
 0x128   :  { %v41_v18 = vpop.xlane.xlu1 %40 }
 0x129   :  { %v45_v19 = vmul.f32 0.03125, %v41_v18 }
 0x12b   :  { %v47_v20 = vadd.f32 1e-12, %v45_v19 }
 0x12c   :  { %v44_v21 = vpop.xlane.xlu1 %43 }
 0x12d   :  { %77 = vrsqrt.f32 %v47_v20  ;;  %v46_v22 = vmul.f32 0.03125, %v44_v21 }
 0x12f   :  { %v48_v23 = vadd.f32 1e-12, %v46_v22 }
 0x131   :  { %79 = vrsqrt.f32 %v48_v23 }
 0x137   :  { %v78_v24 = vpop.eup %77 }
 0x138   :  { %v51_v26 = vmul.f32 %v78_v24, %v35_v10 }
 0x13a   :  { %v59_v28 = vmul.f32 %v75_v25, %v51_v26 }
 0x13b   :  { %v80_v29 = vpop.eup %79 }
 0x13c   :  { %v67_v30 = vadd.f32 %v76_v27, %v59_v28  ;;  %v52_v31 = vmul.f32 %v80_v29, %v36_v14 }
 0x13e   :  { %69 = vst.msk [vmem:[%s140_s4] sm:$0xff] %vm25_vm0, %v67_v30  ;;  %v60_v32 = vmul.f32 %v75_v25, %v52_v31 }
 0x140   :  { %v68_v33 = vadd.f32 %v76_v27, %v60_v32 }
 0x142   :  { %70 = vst.msk [vmem:[%s140_s4 + $0x8] sm:$0xff] %vm25_vm0, %v68_v33 }

// kernel: bert_transformer_forward.105
= control target key start
LH: loop header
LB: loop body
LE: loop exit
PB: predicated region body
PF: predicated region fallthrough
CT: control target
= control target key end

     0   :  { %vm19_vm0 = vcmask 523264   ;;  %v160_v0 = vmov 0.0   ;;  %vm161_vm1 = vmmov 0   ;;  %vm47_vm2 = vcmask 261120   ;;  %s206_s1 = inlined_call_operand.vmem [shape: bf16[32,64], index: 1, kind: input, shape index: {}]   ;;  %s207_s0 = inlined_call_operand.vmem [shape: bf16[16,32], index: 0, kind: input, shape index: {}]   ;;  %s208_s2 = inlined_call_operand.vmem [shape: f32[1,64], index: 2, kind: input, shape index: {}]   ;;  %s209_s3 = inlined_call_operand.vmem [shape: f32[16,64], index: 3, kind: output, shape index: {}]  }
   0x1   :  { %143 = vmatprep.subr.bf16.mxu0 %v160_v0  ;;  %v153_v1 = vld [vmem:[%s206_s1] sm:$0xff]   ;;  %147 = vmatprep.mubr.msk.bf16.mxu0 %vm161_vm1, %v160_v0  ;;  %20 = vst.msk [vmem:[#allocation2] sm:$0xff] %vm19_vm0, %v160_v0  ;;  %21 = vst.msk [vmem:[#allocation2 + $0x8] sm:$0xff] %vm19_vm0, %v160_v0  ;;  %v154_v2 = vld [vmem:[%s206_s1 + $0x8] sm:$0xff]  }
   0x2   :  { %144 = vmatpush3.bf16.msra.mxu0 %v153_v1  ;;  %v155_v3 = vld [vmem:[%s207_s0] sm:$0xff]  }
   0x3   :  { %145 = vmatprep.subr.bf16.mxu0 %v160_v0  ;;  %v139_v12 = vld [vmem:[%s208_s2] ss:$0 sm:$0xff] }
   0x6   :  { %146 = vmatpush3.bf16.msra.mxu0 %v154_v2 }
   0x8   :  { %v22_v4 = vld [vmem:[#allocation2] sm:$0xff]  ;;  %v23_v6 = vld [vmem:[#allocation2 + $0x8] sm:$0xff] }
   0x9   :  { %148 = vmatmul.mubr.msk.bf16.vlgmr.msra.gmra.mrb[0].mxu0 %vm47_vm2, %v155_v3 }
  0xdc   :  { %v85_v5 = vpop.f32.mrb[0].mxu0 }
  0xdd   :  { %v92_v7 = vadd.f32 %v85_v5, %v22_v4  ;;  %v149_v8 = vpop.f32.mrb[1].mxu0 }
  0xde   :  { %v88_v9 = vpop.f32.mrb[2].mxu0 }
  0xdf   :  { %95 = vst.msk [vmem:[#allocation2] sm:$0xff] %vm19_vm0, %v92_v7  ;;  %v93_v10 = vadd.f32 %v88_v9, %v23_v6  ;;  %v150_v11 = vpop.f32.mrb[3].mxu0 }
  0xe1   :  { %96 = vst.msk [vmem:[#allocation2 + $0x8] sm:$0xff] %vm19_vm0, %v93_v10 }
  0xe6   :  { %v100_v13 = vld [vmem:[#allocation2] sm:$0xff] }
  0xe7   :  { %v109_v14 = vadd.f32 %v139_v12, %v100_v13 }
  0xe8   :  { %v101_v15 = vld [vmem:[#allocation2 + $0x8] sm:$0xff] }
  0xe9   :  { %v113_v16 = vmul.f32 %v109_v14, %v109_v14  ;;  %v110_v17 = vadd.f32 %v139_v12, %v101_v15  ;;  %v111_v28 = vmul.f32 0.5, %v109_v14 }
  0xeb   :  { %v115_v18 = vmul.f32 %v113_v16, %v109_v14  ;;  %v114_v19 = vmul.f32 %v110_v17, %v110_v17  ;;  %v112_v32 = vmul.f32 0.5, %v110_v17 }
  0xed   :  { %v117_v20 = vmul.f32 0.044715, %v115_v18  ;;  %v116_v21 = vmul.f32 %v114_v19, %v110_v17 }
  0xef   :  { %v119_v22 = vadd.f32 %v117_v20, %v109_v14  ;;  %v118_v23 = vmul.f32 0.044715, %v116_v21 }
  0xf1   :  { %v121_v24 = vmul.f32 0.7978846, %v119_v22  ;;  %v120_v25 = vadd.f32 %v118_v23, %v110_v17 }
  0xf3   :  { %156 = vtanh.f32 %v121_v24  ;;  %v122_v26 = vmul.f32 0.7978846, %v120_v25 }
  0xf5   :  { %158 = vtanh.f32 %v122_v26 }
  0xfd   :  { %v157_v27 = vpop.eup %156 }
  0xfe   :  { %v125_v29 = vadd.f32 1.0, %v157_v27 }
  0xff   :  { %v159_v30 = vpop.eup %158 }
 0x100   :  { %v127_v31 = vmul.f32 %v125_v29, %v111_v28  ;;  %v126_v33 = vadd.f32 1.0, %v159_v30 }
 0x102   :  { %129 = vst.msk [vmem:[%s209_s3] sm:$0xff] %vm19_vm0, %v127_v31  ;;  %v128_v34 = vmul.f32 %v126_v33, %v112_v32 }
 0x104   :  { %130 = vst.msk [vmem:[%s209_s3 + $0x8] sm:$0xff] %vm19_vm0, %v128_v34 }

// kernel: bert_transformer_forward.106
= control target key start
LH: loop header
LB: loop body
LE: loop exit
PB: predicated region body
PF: predicated region fallthrough
CT: control target
= control target key end

     0   :  { %vm19_vm0 = vcmask 261120   ;;  %v164_v0 = vmov 0.0   ;;  %vm165_vm1 = vmmov 0   ;;  %vm63_vm2 = vcmask 523264   ;;  %s216_s1 = inlined_call_operand.vmem [shape: bf16[64,32], index: 1, kind: input, shape index: {}]   ;;  %s217_s0 = inlined_call_operand.vmem [shape: bf16[16,64], index: 0, kind: input, shape index: {}]   ;;  %s218_s2 = inlined_call_operand.vmem [shape: f32[1,32], index: 2, kind: input, shape index: {}]   ;;  %s219_s3 = inlined_call_operand.vmem [shape: f32[16,32], index: 3, kind: output, shape index: {}]  }
   0x1   :  { %145 = vmatprep.subr.bf16.mxu0 %v164_v0  ;;  %v159_v1 = vld [vmem:[%s216_s1] sm:$0xff]   ;;  %153 = vmatprep.mubr.msk.bf16.mxu0 %vm165_vm1, %v164_v0  ;;  %20 = vst.msk [vmem:[#allocation2] sm:$0xff] %vm19_vm0, %v164_v0  ;;  %21 = vst.msk [vmem:[#allocation2 + $0x8] sm:$0xff] %vm19_vm0, %v164_v0  ;;  %v160_v2 = vld [vmem:[%s216_s1 + $0x8] sm:$0xff]  }
   0x2   :  { %146 = vmatpush3.bf16.msra.mxu0 %v159_v1  ;;  %v161_v3 = vld [vmem:[%s216_s1 + $0x10] sm:$0xff]   ;;  %v162_v4 = vld [vmem:[%s216_s1 + $0x18] sm:$0xff]   ;;  %v163_v5 = vld [vmem:[%s217_s0] sm:$0xff]  }
   0x3   :  { %147 = vmatprep.subr.bf16.mxu0 %v164_v0  ;;  %v139_v14 = vld [vmem:[%s218_s2] ss:$0 sm:$0xff] }
   0x6   :  { %148 = vmatpush3.bf16.msra.mxu0 %v160_v2 }
   0x7   :  { %149 = vmatprep.subr.bf16.mxu0 %v164_v0 }
   0x8   :  { %v22_v6 = vld [vmem:[#allocation2] sm:$0xff]  ;;  %v23_v8 = vld [vmem:[#allocation2 + $0x8] sm:$0xff] }
   0xa   :  { %150 = vmatpush3.bf16.msra.mxu0 %v161_v3 }
   0xb   :  { %151 = vmatprep.subr.bf16.mxu0 %v164_v0 }
   0xe   :  { %152 = vmatpush3.bf16.msra.mxu0 %v162_v4 }
  0x11   :  { %154 = vmatmul.mubr.msk.bf16.vlgmr.msra.gmra.mrb[0].mxu0 %vm63_vm2, %v163_v5 }
  0xe4   :  { %v101_v7 = vpop.f32.mrb[0].mxu0 }
  0xe5   :  { %v108_v9 = vadd.f32 %v101_v7, %v22_v6  ;;  %v155_v10 = vpop.f32.mrb[1].mxu0 }
  0xe6   :  { %v104_v11 = vpop.f32.mrb[2].mxu0 }
  0xe7   :  { %111 = vst.msk [vmem:[#allocation2] sm:$0xff] %vm19_vm0, %v108_v9  ;;  %v109_v12 = vadd.f32 %v104_v11, %v23_v8  ;;  %v156_v13 = vpop.f32.mrb[3].mxu0 }
  0xe9   :  { %112 = vst.msk [vmem:[#allocation2 + $0x8] sm:$0xff] %vm19_vm0, %v109_v12 }
  0xee   :  { %v116_v15 = vld [vmem:[#allocation2] sm:$0xff] }
  0xef   :  { %v125_v16 = vadd.f32 %v139_v14, %v116_v15 }
  0xf0   :  { %v117_v17 = vld [vmem:[#allocation2 + $0x8] sm:$0xff] }
  0xf1   :  { %127 = vst.msk [vmem:[%s219_s3] sm:$0xff] %vm19_vm0, %v125_v16  ;;  %v126_v18 = vadd.f32 %v139_v14, %v117_v17 }
  0xf3   :  { %128 = vst.msk [vmem:[%s219_s3 + $0x8] sm:$0xff] %vm19_vm0, %v126_v18 }

// kernel: bert_transformer_forward.85
= control target key start
LH: loop header
LB: loop body
LE: loop exit
PB: predicated region body
PF: predicated region fallthrough
CT: control target
= control target key end

     0   :  { %vm18_vm0 = vcmask 261120   ;;  %s138_s0 = inlined_call_operand.vmem [shape: f32[16,32], index: 0, kind: input, shape index: {}]   ;;  %s139_s1 = inlined_call_operand.vmem [shape: f32[1,32], index: 1, kind: input, shape index: {}]   ;;  %s140_s2 = inlined_call_operand.vmem [shape: f32[1,32], index: 2, kind: input, shape index: {}]   ;;  %s141_s3 = inlined_call_operand.vmem [shape: f32[16,32], index: 3, kind: output, shape index: {}]  }
   0x1   :  { %v14_v0 = vld [vmem:[%s138_s0] sm:$0xff]  ;;  %v15_v1 = vld [vmem:[%s138_s0 + $0x8] sm:$0xff] }
   0x2   :  { %v19_v2 = vsel %vm18_vm0, %v14_v0, 0.0  ;;  %v22_v3 = vsel %vm18_vm0, %v15_v1, 0.0  ;;  %v84_v33 = vld [vmem:[%s139_s1] ss:$0 sm:$0xff] }
   0x3   :  { %20 = vadd.xlane.f32.xlu0 %v19_v2  ;;  %v85_v35 = vld [vmem:[%s140_s2] ss:$0 sm:$0xff] }
   0x7   :  { %23 = vadd.xlane.f32.xlu0 %v22_v3 }
  0x90   :  { %v21_v4 = vpop.xlane.xlu0 %20 }
  0x91   :  { %v26_v5 = vmul.f32 0.03125, %v21_v4 }
  0x93   :  { %v28_v6 = vsub.f32 %v14_v0, %v26_v5 }
  0x94   :  { %v24_v7 = vpop.xlane.xlu0 %23 }
  0x95   :  { %v27_v8 = vmul.f32 0.03125, %v24_v7  ;;  %v30_v9 = vmul.f32 %v28_v6, %v28_v6 }
  0x97   :  { %v29_v10 = vsub.f32 %v15_v1, %v27_v8  ;;  %v32_v11 = vsel %vm18_vm0, %v30_v9, 0.0 }
  0x98   :  { %33 = vadd.xlane.f32.xlu1 %v32_v11 }
  0x99   :  { %v31_v12 = vmul.f32 %v29_v10, %v29_v10 }
  0x9b   :  { %v35_v13 = vsel %vm18_vm0, %v31_v12, 0.0 }
  0x9c   :  { %36 = vadd.xlane.f32.xlu1 %v35_v13 }
 0x125   :  { %v34_v14 = vpop.xlane.xlu1 %33 }
 0x126   :  { %v38_v15 = vmul.f32 0.03125, %v34_v14 }
 0x128   :  { %v40_v16 = vmul.f32 1.032258, %v38_v15 }
 0x129   :  { %v37_v17 = vpop.xlane.xlu1 %36 }
 0x12a   :  { %86 = vrsqrt.f32 %v40_v16  ;;  %v39_v18 = vmul.f32 0.03125, %v37_v17  ;;  %vm44_vm1 = vcmp.eq.f32.partialorder %v40_v16, inf  ;;  %v47_v22 = vand.u32 2147483648, %v40_v16 }
 0x12b   :  { %vm46_vm2 = vcmp.eq.f32.partialorder %v40_v16, 0.0 }
 0x12c   :  { %v41_v19 = vmul.f32 1.032258, %v39_v18 }
 0x12e   :  { %88 = vrsqrt.f32 %v41_v19  ;;  %vm51_vm3 = vcmp.eq.f32.partialorder %v41_v19, inf  ;;  %v54_v28 = vand.u32 2147483648, %v41_v19  ;;  %vm53_vm4 = vcmp.eq.f32.partialorder %v41_v19, 0.0 }
 0x134   :  { %v87_v20 = vpop.eup %86 }
 0x135   :  { %v43_v21 = vmul.f32 %v87_v20, %v40_v16 }
 0x137   :  { %v45_v23 = vsel %vm44_vm1, %v40_v16, %v43_v21 }
 0x138   :  { %v48_v24 = vsel %vm46_vm2, %v47_v22, %v45_v23  ;;  %v89_v25 = vpop.eup %88 }
 0x139   :  { %v56_v26 = vadd.f32 1e-06, %v48_v24  ;;  %v50_v27 = vmul.f32 %v89_v25, %v41_v19 }
 0x13b   :  { %90 = vrcp.f32 %v56_v26  ;;  %v52_v29 = vsel %vm51_vm3, %v41_v19, %v50_v27 }
 0x13c   :  { %v55_v30 = vsel %vm53_vm4, %v54_v28, %v52_v29 }
 0x13d   :  { %v57_v31 = vadd.f32 1e-06, %v55_v30 }
 0x13f   :  { %92 = vrcp.f32 %v57_v31 }
 0x145   :  { %v91_v32 = vpop.eup %90 }
 0x146   :  { %v59_v34 = vmul.f32 %v91_v32, %v28_v6 }
 0x148   :  { %v68_v36 = vmul.f32 %v84_v33, %v59_v34 }
 0x149   :  { %v93_v37 = vpop.eup %92 }
 0x14a   :  { %v76_v38 = vadd.f32 %v85_v35, %v68_v36  ;;  %v61_v39 = vmul.f32 %v93_v37, %v29_v10 }
 0x14c   :  { %78 = vst.msk [vmem:[%s141_s3] sm:$0xff] %vm18_vm0, %v76_v38  ;;  %v69_v40 = vmul.f32 %v84_v33, %v61_v39 }
 0x14e   :  { %v77_v41 = vadd.f32 %v85_v35, %v69_v40 }
 0x150   :  { %79 = vst.msk [vmem:[%s141_s3 + $0x8] sm:$0xff] %vm18_vm0, %v77_v41 }

// kernel: bert_transformer_forward.89
= control target key start
LH: loop header
LB: loop body
LE: loop exit
PB: predicated region body
PF: predicated region fallthrough
CT: control target
= control target key end

     0   :  { %vm25_vm0 = vcmask 261120   ;;  %s177_s0 = inlined_call_operand.vmem [shape: f32[16,32], index: 0, kind: input, shape index: {}]   ;;  %s178_s1 = inlined_call_operand.vmem [shape: f32[16,32], index: 1, kind: input, shape index: {}]   ;;  %s179_s4 = inlined_call_operand.vmem [shape: f32[16,32], index: 4, kind: output, shape index: {0}]   ;;  %s180_s2 = inlined_call_operand.vmem [shape: f32[1,32], index: 2, kind: input, shape index: {}]   ;;  %s181_s3 = inlined_call_operand.vmem [shape: f32[1,32], index: 3, kind: input, shape index: {}]   ;;  %s182_s5 = inlined_call_operand.vmem [shape: f32[16,32], index: 5, kind: output, shape index: {1}]  }
   0x1   :  { %v19_v0 = vld [vmem:[%s177_s0] sm:$0xff]  ;;  %v20_v2 = vld [vmem:[%s177_s0 + $0x8] sm:$0xff] }
   0x2   :  { %v21_v1 = vld [vmem:[%s178_s1] sm:$0xff]  ;;  %v22_v4 = vld [vmem:[%s178_s1 + $0x8] sm:$0xff] }
   0x3   :  { %v23_v3 = vadd.f32 %v21_v1, %v19_v0  ;;  %v24_v5 = vadd.f32 %v22_v4, %v20_v2  ;;  %v99_v37 = vld [vmem:[%s180_s2] ss:$0 sm:$0xff] }
   0x4   :  { %v100_v39 = vld [vmem:[%s181_s3] ss:$0 sm:$0xff] }
   0x5   :  { %v30_v6 = vsel %vm25_vm0, %v23_v3, 0.0  ;;  %26 = vst.msk [vmem:[%s179_s4] sm:$0xff] %vm25_vm0, %v23_v3  ;;  %27 = vst.msk [vmem:[%s179_s4 + $0x8] sm:$0xff] %vm25_vm0, %v24_v5  ;;  %v33_v7 = vsel %vm25_vm0, %v24_v5, 0.0 }
   0x6   :  { %31 = vadd.xlane.f32.xlu0 %v30_v6 }
   0xa   :  { %34 = vadd.xlane.f32.xlu0 %v33_v7 }
  0x93   :  { %v32_v8 = vpop.xlane.xlu0 %31 }
  0x94   :  { %v37_v9 = vmul.f32 0.03125, %v32_v8 }
  0x96   :  { %v39_v10 = vsub.f32 %v23_v3, %v37_v9 }
  0x97   :  { %v35_v11 = vpop.xlane.xlu0 %34 }
  0x98   :  { %v38_v12 = vmul.f32 0.03125, %v35_v11  ;;  %v41_v13 = vmul.f32 %v39_v10, %v39_v10 }
  0x9a   :  { %v40_v14 = vsub.f32 %v24_v5, %v38_v12  ;;  %v43_v15 = vsel %vm25_vm0, %v41_v13, 0.0 }
  0x9b   :  { %44 = vadd.xlane.f32.xlu1 %v43_v15 }
  0x9c   :  { %v42_v16 = vmul.f32 %v40_v14, %v40_v14 }
  0x9e   :  { %v46_v17 = vsel %vm25_vm0, %v42_v16, 0.0 }
  0x9f   :  { %47 = vadd.xlane.f32.xlu1 %v46_v17 }
 0x128   :  { %v45_v18 = vpop.xlane.xlu1 %44 }
 0x129   :  { %v49_v19 = vmul.f32 0.03125, %v45_v18 }
 0x12b   :  { %v51_v20 = vmul.f32 1.032258, %v49_v19 }
 0x12c   :  { %v48_v21 = vpop.xlane.xlu1 %47 }
 0x12d   :  { %101 = vrsqrt.f32 %v51_v20  ;;  %v50_v22 = vmul.f32 0.03125, %v48_v21  ;;  %vm55_vm1 = vcmp.eq.f32.partialorder %v51_v20, inf  ;;  %v58_v26 = vand.u32 2147483648, %v51_v20 }
 0x12e   :  { %vm57_vm2 = vcmp.eq.f32.partialorder %v51_v20, 0.0 }
 0x12f   :  { %v52_v23 = vmul.f32 1.032258, %v50_v22 }
 0x131   :  { %103 = vrsqrt.f32 %v52_v23  ;;  %vm62_vm3 = vcmp.eq.f32.partialorder %v52_v23, inf  ;;  %v65_v32 = vand.u32 2147483648, %v52_v23  ;;  %vm64_vm4 = vcmp.eq.f32.partialorder %v52_v23, 0.0 }
 0x137   :  { %v102_v24 = vpop.eup %101 }
 0x138   :  { %v54_v25 = vmul.f32 %v102_v24, %v51_v20 }
 0x13a   :  { %v56_v27 = vsel %vm55_vm1, %v51_v20, %v54_v25 }
 0x13b   :  { %v59_v28 = vsel %vm57_vm2, %v58_v26, %v56_v27  ;;  %v104_v29 = vpop.eup %103 }
 0x13c   :  { %v67_v30 = vadd.f32 1e-06, %v59_v28  ;;  %v61_v31 = vmul.f32 %v104_v29, %v52_v23 }
 0x13e   :  { %105 = vrcp.f32 %v67_v30  ;;  %v63_v33 = vsel %vm62_vm3, %v52_v23, %v61_v31 }
 0x13f   :  { %v66_v34 = vsel %vm64_vm4, %v65_v32, %v63_v33 }
 0x140   :  { %v68_v35 = vadd.f32 1e-06, %v66_v34 }
 0x142   :  { %107 = vrcp.f32 %v68_v35 }
 0x148   :  { %v106_v36 = vpop.eup %105 }
 0x149   :  { %v70_v38 = vmul.f32 %v106_v36, %v39_v10 }
 0x14b   :  { %v79_v40 = vmul.f32 %v99_v37, %v70_v38 }
 0x14c   :  { %v108_v41 = vpop.eup %107 }
 0x14d   :  { %v87_v42 = vadd.f32 %v100_v39, %v79_v40  ;;  %v72_v43 = vmul.f32 %v108_v41, %v40_v14 }
 0x14f   :  { %89 = vst.msk [vmem:[%s182_s5] sm:$0xff] %vm25_vm0, %v87_v42  ;;  %v80_v44 = vmul.f32 %v99_v37, %v72_v43 }
 0x151   :  { %v88_v45 = vadd.f32 %v100_v39, %v80_v44 }
 0x153   :  { %90 = vst.msk [vmem:[%s182_s5 + $0x8] sm:$0xff] %vm25_vm0, %v88_v45 }

// kernel: bert_transformer_forward.90
= control target key start
LH: loop header
LB: loop body
LE: loop exit
PB: predicated region body
PF: predicated region fallthrough
CT: control target
= control target key end

     0   :  { %vm19_vm0 = vcmask 523264   ;;  %v140_v0 = vmov 0.0   ;;  %vm141_vm1 = vmmov 0   ;;  %vm47_vm2 = vcmask 261120   ;;  %s186_s1 = inlined_call_operand.vmem [shape: bf16[32,64], index: 1, kind: input, shape index: {}]   ;;  %s187_s0 = inlined_call_operand.vmem [shape: bf16[16,32], index: 0, kind: input, shape index: {}]   ;;  %s188_s2 = inlined_call_operand.vmem [shape: f32[1,64], index: 2, kind: input, shape index: {}]   ;;  %s189_s3 = inlined_call_operand.vmem [shape: f32[16,64], index: 3, kind: output, shape index: {}]  }
   0x1   :  { %127 = vmatprep.subr.bf16.mxu0 %v140_v0  ;;  %v137_v1 = vld [vmem:[%s186_s1] sm:$0xff]   ;;  %131 = vmatprep.mubr.msk.bf16.mxu0 %vm141_vm1, %v140_v0  ;;  %20 = vst.msk [vmem:[#allocation2] sm:$0xff] %vm19_vm0, %v140_v0  ;;  %21 = vst.msk [vmem:[#allocation2 + $0x8] sm:$0xff] %vm19_vm0, %v140_v0  ;;  %v138_v2 = vld [vmem:[%s186_s1 + $0x8] sm:$0xff]  }
   0x2   :  { %128 = vmatpush3.bf16.msra.mxu0 %v137_v1  ;;  %v139_v3 = vld [vmem:[%s187_s0] sm:$0xff]  }
   0x3   :  { %129 = vmatprep.subr.bf16.mxu0 %v140_v0  ;;  %v123_v12 = vld [vmem:[%s188_s2] ss:$0 sm:$0xff] }
   0x6   :  { %130 = vmatpush3.bf16.msra.mxu0 %v138_v2 }
   0x8   :  { %v22_v4 = vld [vmem:[#allocation2] sm:$0xff]  ;;  %v23_v6 = vld [vmem:[#allocation2 + $0x8] sm:$0xff] }
   0x9   :  { %132 = vmatmul.mubr.msk.bf16.vlgmr.msra.gmra.mrb[0].mxu0 %vm47_vm2, %v139_v3 }
  0xdc   :  { %v85_v5 = vpop.f32.mrb[0].mxu0 }
  0xdd   :  { %v92_v7 = vadd.f32 %v85_v5, %v22_v4  ;;  %v133_v8 = vpop.f32.mrb[1].mxu0 }
  0xde   :  { %v88_v9 = vpop.f32.mrb[2].mxu0 }
  0xdf   :  { %95 = vst.msk [vmem:[#allocation2] sm:$0xff] %vm19_vm0, %v92_v7  ;;  %v93_v10 = vadd.f32 %v88_v9, %v23_v6  ;;  %v134_v11 = vpop.f32.mrb[3].mxu0 }
  0xe1   :  { %96 = vst.msk [vmem:[#allocation2 + $0x8] sm:$0xff] %vm19_vm0, %v93_v10 }
  0xe6   :  { %v100_v13 = vld [vmem:[#allocation2] sm:$0xff] }
  0xe7   :  { %v109_v14 = vadd.f32 %v123_v12, %v100_v13 }
  0xe8   :  { %v101_v15 = vld [vmem:[#allocation2 + $0x8] sm:$0xff] }
  0xe9   :  { %v111_v16 = vmax.f32 %v109_v14, 0.0  ;;  %v110_v17 = vadd.f32 %v123_v12, %v101_v15 }
  0xeb   :  { %113 = vst.msk [vmem:[%s189_s3] sm:$0xff] %vm19_vm0, %v111_v16  ;;  %v112_v18 = vmax.f32 %v110_v17, 0.0 }
  0xed   :  { %114 = vst.msk [vmem:[%s189_s3 + $0x8] sm:$0xff] %vm19_vm0, %v112_v18 }

// kernel: bert_transformer_forward.99
= control target key start
LH: loop header
LB: loop body
LE: loop exit
PB: predicated region body
PF: predicated region fallthrough
CT: control target
= control target key end

     0   :  { %vm25_vm0 = vcmask 261120   ;;  %s156_s0 = inlined_call_operand.vmem [shape: f32[16,32], index: 0, kind: input, shape index: {}]   ;;  %s157_s1 = inlined_call_operand.vmem [shape: f32[16,32], index: 1, kind: input, shape index: {}]   ;;  %s158_s2 = inlined_call_operand.vmem [shape: f32[1,32], index: 2, kind: input, shape index: {}]   ;;  %s159_s3 = inlined_call_operand.vmem [shape: f32[1,32], index: 3, kind: input, shape index: {}]   ;;  %s160_s4 = inlined_call_operand.vmem [shape: f32[16,32], index: 4, kind: output, shape index: {}]  }
   0x1   :  { %v17_v0 = vld [vmem:[%s156_s0] sm:$0xff]  ;;  %v18_v2 = vld [vmem:[%s156_s0 + $0x8] sm:$0xff] }
   0x2   :  { %v19_v1 = vld [vmem:[%s157_s1] sm:$0xff]  ;;  %v20_v4 = vld [vmem:[%s157_s1 + $0x8] sm:$0xff] }
   0x3   :  { %v21_v3 = vadd.f32 %v19_v1, %v17_v0  ;;  %v22_v5 = vadd.f32 %v20_v4, %v18_v2  ;;  %v91_v37 = vld [vmem:[%s158_s2] ss:$0 sm:$0xff] }
   0x4   :  { %v92_v39 = vld [vmem:[%s159_s3] ss:$0 sm:$0xff] }
   0x5   :  { %v26_v6 = vsel %vm25_vm0, %v21_v3, 0.0  ;;  %v29_v7 = vsel %vm25_vm0, %v22_v5, 0.0 }
   0x6   :  { %27 = vadd.xlane.f32.xlu0 %v26_v6 }
   0xa   :  { %30 = vadd.xlane.f32.xlu0 %v29_v7 }
  0x93   :  { %v28_v8 = vpop.xlane.xlu0 %27 }
  0x94   :  { %v33_v9 = vmul.f32 0.03125, %v28_v8 }
  0x96   :  { %v35_v10 = vsub.f32 %v21_v3, %v33_v9 }
  0x97   :  { %v31_v11 = vpop.xlane.xlu0 %30 }
  0x98   :  { %v34_v12 = vmul.f32 0.03125, %v31_v11  ;;  %v37_v13 = vmul.f32 %v35_v10, %v35_v10 }
  0x9a   :  { %v36_v14 = vsub.f32 %v22_v5, %v34_v12  ;;  %v39_v15 = vsel %vm25_vm0, %v37_v13, 0.0 }
  0x9b   :  { %40 = vadd.xlane.f32.xlu1 %v39_v15 }
  0x9c   :  { %v38_v16 = vmul.f32 %v36_v14, %v36_v14 }
  0x9e   :  { %v42_v17 = vsel %vm25_vm0, %v38_v16, 0.0 }
  0x9f   :  { %43 = vadd.xlane.f32.xlu1 %v42_v17 }
 0x128   :  { %v41_v18 = vpop.xlane.xlu1 %40 }
 0x129   :  { %v45_v19 = vmul.f32 0.03125, %v41_v18 }
 0x12b   :  { %v47_v20 = vmul.f32 1.032258, %v45_v19 }
 0x12c   :  { %v44_v21 = vpop.xlane.xlu1 %43 }
 0x12d   :  { %93 = vrsqrt.f32 %v47_v20  ;;  %v46_v22 = vmul.f32 0.03125, %v44_v21  ;;  %vm51_vm1 = vcmp.eq.f32.partialorder %v47_v20, inf  ;;  %v54_v26 = vand.u32 2147483648, %v47_v20 }
 0x12e   :  { %vm53_vm2 = vcmp.eq.f32.partialorder %v47_v20, 0.0 }
 0x12f   :  { %v48_v23 = vmul.f32 1.032258, %v46_v22 }
 0x131   :  { %95 = vrsqrt.f32 %v48_v23  ;;  %vm58_vm3 = vcmp.eq.f32.partialorder %v48_v23, inf  ;;  %v61_v32 = vand.u32 2147483648, %v48_v23  ;;  %vm60_vm4 = vcmp.eq.f32.partialorder %v48_v23, 0.0 }
 0x137   :  { %v94_v24 = vpop.eup %93 }
 0x138   :  { %v50_v25 = vmul.f32 %v94_v24, %v47_v20 }
 0x13a   :  { %v52_v27 = vsel %vm51_vm1, %v47_v20, %v50_v25 }
 0x13b   :  { %v55_v28 = vsel %vm53_vm2, %v54_v26, %v52_v27  ;;  %v96_v29 = vpop.eup %95 }
 0x13c   :  { %v63_v30 = vadd.f32 1e-06, %v55_v28  ;;  %v57_v31 = vmul.f32 %v96_v29, %v48_v23 }
 0x13e   :  { %97 = vrcp.f32 %v63_v30  ;;  %v59_v33 = vsel %vm58_vm3, %v48_v23, %v57_v31 }
 0x13f   :  { %v62_v34 = vsel %vm60_vm4, %v61_v32, %v59_v33 }
 0x140   :  { %v64_v35 = vadd.f32 1e-06, %v62_v34 }
 0x142   :  { %99 = vrcp.f32 %v64_v35 }
 0x148   :  { %v98_v36 = vpop.eup %97 }
 0x149   :  { %v66_v38 = vmul.f32 %v98_v36, %v35_v10 }
 0x14b   :  { %v75_v40 = vmul.f32 %v91_v37, %v66_v38 }
 0x14c   :  { %v100_v41 = vpop.eup %99 }
 0x14d   :  { %v83_v42 = vadd.f32 %v92_v39, %v75_v40  ;;  %v68_v43 = vmul.f32 %v100_v41, %v36_v14 }
 0x14f   :  { %85 = vst.msk [vmem:[%s160_s4] sm:$0xff] %vm25_vm0, %v83_v42  ;;  %v76_v44 = vmul.f32 %v91_v37, %v68_v43 }
 0x151   :  { %v84_v45 = vadd.f32 %v92_v39, %v76_v44 }
 0x153   :  { %86 = vst.msk [vmem:[%s160_s4 + $0x8] sm:$0xff] %vm25_vm0, %v84_v45 }

// kernel: bert_transformer_forward.115
= control target key start
LH: loop header
LB: loop body
LE: loop exit
PB: predicated region body
PF: predicated region fallthrough
CT: control target
= control target key end

     0   :  { %vm19_vm0 = vcmask 523264   ;;  %v138_v0 = vmov 0.0   ;;  %vm139_vm1 = vmmov 0   ;;  %vm47_vm2 = vcmask 261120   ;;  %s184_s1 = inlined_call_operand.vmem [shape: bf16[32,64], index: 1, kind: input, shape index: {}]   ;;  %s185_s0 = inlined_call_operand.vmem [shape: bf16[16,32], index: 0, kind: input, shape index: {}]   ;;  %s186_s2 = inlined_call_operand.vmem [shape: f32[1,64], index: 2, kind: input, shape index: {}]   ;;  %s187_s3 = inlined_call_operand.vmem [shape: f32[16,64], index: 3, kind: output, shape index: {}]  }
   0x1   :  { %125 = vmatprep.subr.bf16.mxu0 %v138_v0  ;;  %v135_v1 = vld [vmem:[%s184_s1] sm:$0xff]   ;;  %129 = vmatprep.mubr.msk.bf16.mxu0 %vm139_vm1, %v138_v0  ;;  %20 = vst.msk [vmem:[#allocation2] sm:$0xff] %vm19_vm0, %v138_v0  ;;  %21 = vst.msk [vmem:[#allocation2 + $0x8] sm:$0xff] %vm19_vm0, %v138_v0  ;;  %v136_v2 = vld [vmem:[%s184_s1 + $0x8] sm:$0xff]  }
   0x2   :  { %126 = vmatpush3.bf16.msra.mxu0 %v135_v1  ;;  %v137_v3 = vld [vmem:[%s185_s0] sm:$0xff]  }
   0x3   :  { %127 = vmatprep.subr.bf16.mxu0 %v138_v0  ;;  %v121_v12 = vld [vmem:[%s186_s2] ss:$0 sm:$0xff] }
   0x6   :  { %128 = vmatpush3.bf16.msra.mxu0 %v136_v2 }
   0x8   :  { %v22_v4 = vld [vmem:[#allocation2] sm:$0xff]  ;;  %v23_v6 = vld [vmem:[#allocation2 + $0x8] sm:$0xff] }
   0x9   :  { %130 = vmatmul.mubr.msk.bf16.vlgmr.msra.gmra.mrb[0].mxu0 %vm47_vm2, %v137_v3 }
  0xdc   :  { %v85_v5 = vpop.f32.mrb[0].mxu0 }
  0xdd   :  { %v92_v7 = vadd.f32 %v85_v5, %v22_v4  ;;  %v131_v8 = vpop.f32.mrb[1].mxu0 }
  0xde   :  { %v88_v9 = vpop.f32.mrb[2].mxu0 }
  0xdf   :  { %95 = vst.msk [vmem:[#allocation2] sm:$0xff] %vm19_vm0, %v92_v7  ;;  %v93_v10 = vadd.f32 %v88_v9, %v23_v6  ;;  %v132_v11 = vpop.f32.mrb[3].mxu0 }
  0xe1   :  { %96 = vst.msk [vmem:[#allocation2 + $0x8] sm:$0xff] %vm19_vm0, %v93_v10 }
  0xe6   :  { %v100_v13 = vld [vmem:[#allocation2] sm:$0xff] }
  0xe7   :  { %v109_v14 = vadd.f32 %v121_v12, %v100_v13 }
  0xe8   :  { %v101_v15 = vld [vmem:[#allocation2 + $0x8] sm:$0xff] }
  0xe9   :  { %111 = vst.msk [vmem:[%s187_s3] sm:$0xff] %vm19_vm0, %v109_v14  ;;  %v110_v16 = vadd.f32 %v121_v12, %v101_v15 }
  0xeb   :  { %112 = vst.msk [vmem:[%s187_s3 + $0x8] sm:$0xff] %vm19_vm0, %v110_v16 }

// kernel: bert_transformer_forward.139
= control target key start
LH: loop header
LB: loop body
LE: loop exit
PB: predicated region body
PF: predicated region fallthrough
CT: control target
= control target key end

     0   :  { %v178_v1 = vmov 0.0   ;;  %vm179_vm0 = vmmov 0   ;;  %vm20_vm1 = vcmask 408576   ;;  %s233_s0 = inlined_call_operand.vmem [shape: bf16[16,32], index: 0, kind: input, shape index: {}]   ;;  %s234_s1 = inlined_call_operand.vmem [shape: bf16[32,50], index: 1, kind: input, shape index: {}]   ;;  %s235_s2 = inlined_call_operand.vmem [shape: f32[1,50], index: 2, kind: input, shape index: {}]   ;;  %s236_s3 = inlined_call_operand.hbm [shape: f32[16,50], index: 3, kind: output, shape index: {}]  }
   0x1   :  { %v151_v0 = vld [vmem:[%s234_s1] sm:$0xff]   ;;  %138 = vmatprep.subr.bf16.mxu0 %v178_v1  ;;  %v152_v2 = vld [vmem:[%s234_s1 + $0x8] sm:$0xff]   ;;  %142 = vmatprep.mubr.msk.bf16.mxu0 %vm179_vm0, %v178_v1 }
   0x2   :  { %139 = vmatpush3.bf16.msra.mxu0 %v151_v0 }
   0x3   :  { %140 = vmatprep.subr.bf16.mxu0 %v178_v1 }
   0x4   :  { %8 = vsyncpa [#allocation4], 0  ;;  %21 = vst.msk [vmem:[#allocation2] sm:$0xff] %vm20_vm1, %v178_v1  ;;  %v153_v3 = vld [vmem:[%s233_s0] sm:$0xff]   ;;  %vm48_vm2 = vcmask 261120   ;;  %s180_s0 = smov [#allocation3]  }
   0x5   :  { %22 = vst.msk [vmem:[#allocation2 + $0x8] sm:$0xff] %vm20_vm1, %v178_v1  ;;  %v134_v12 = vld [vmem:[%s235_s2] ss:$0 sm:$0xff]  ;;  %s119_s19 = sshll.u32 %s180_s0, 4  ;;  %s120_s19 = int_to_ptr.vmem [resolvable:$true] %s119_s19 }
   0x6   :  { %141 = vmatpush3.bf16.msra.mxu0 %v152_v2  ;;  %s154_s20 = scalar_lea.vmem %s120_s19, 256  ;;  %p159_p1 = scmp.lt.s32.totalorder %s120_s19, %s120_s19 }
   0x7   :  { %p155_p0 = scmp.ne.s32.totalorder %s120_s19, %s154_s20  ;;  %p160_p2 = scmp.lt.s32.totalorder %s154_s20, %s154_s20 }
   0x9   :  { %143 = vmatmul.mubr.msk.bf16.vlgmr.msra.gmra.mrb[0].mxu0 %vm48_vm2, %v153_v3  ;;  %p161_p3 = por %p160_p2, %p159_p1 }
   0xb   :  { %v23_v4 = vld [vmem:[#allocation2] sm:$0xff]  ;;  %p162_p4 = pnand %p161_p3, %p155_p0 }
   0xc   :  { %v24_v6 = vld [vmem:[#allocation2 + $0x8] sm:$0xff] }
  0xdc   :  { %v86_v5 = vpop.f32.mrb[0].mxu0 }
  0xdd   :  { %v93_v7 = vadd.f32 %v86_v5, %v23_v4  ;;  %v144_v8 = vpop.f32.mrb[1].mxu0 }
  0xde   :  { %v89_v9 = vpop.f32.mrb[2].mxu0 }
  0xdf   :  { %96 = vst.msk [vmem:[#allocation2] sm:$0xff] %vm20_vm1, %v93_v7  ;;  %v94_v10 = vadd.f32 %v89_v9, %v24_v6  ;;  %v145_v11 = vpop.f32.mrb[3].mxu0 }
  0xe1   :  { %97 = vst.msk [vmem:[#allocation2 + $0x8] sm:$0xff] %vm20_vm1, %v94_v10 }
  0xe6   :  { %v101_v13 = vld [vmem:[#allocation2] sm:$0xff] }
  0xe7   :  { %v110_v14 = vadd.f32 %v134_v12, %v101_v13 }
  0xe8   :  { %v102_v15 = vld [vmem:[#allocation2 + $0x8] sm:$0xff] }
  0xe9   :  { %v111_v16 = vadd.f32 %v134_v12, %v102_v15  ;;  %112 = vst.msk [vmem:[#allocation3] sm:$0xff] %vm20_vm1, %v110_v14 }
  0xeb   :  { %113 = vst.msk [vmem:[#allocation3 + $0x8] sm:$0xff] %vm20_vm1, %v111_v16 }
  0xec   :  { %165 = shalt.err (!%p162_p4)
}
  0xed   :  { %s166_s22 = scalar_lea.hbm %s236_s3, 256 }
  0xee   :  { %p167_p5 = scmp.ne.s32.totalorder %s236_s3, %s166_s22  ;;  %p170_p6 = scmp.lt.u32.totalorder %s166_s22, %s236_s3 }
  0xf0   :  { %p172_p7 = pnand %p170_p6, %p167_p5 }
  0xf2   :  { %175 = shalt.err (!%p172_p7)
}
  0xf3   :  { %s181_s27 = smov 128   ;;  %s182_s28 = smov 8  }
  0xf4   :  { %125 = dma.vmem_to_hbm [thread:$0]  %s120_s19, 256, %s236_s3, [#allocation4], %s181_s27, %s181_s27, %s182_s28  }
  0xf5   :  { %176 = dma.done.wait [#allocation4], 256  }
  0xf6   :  { %177 = vsyncadd [#allocation4], 4294967040 }
  0xf7   :  { %129 = vsyncpa [#allocation4], 1 }

// kernel: bert_transformer_forward.118
= control target key start
LH: loop header
LB: loop body
LE: loop exit
PB: predicated region body
PF: predicated region fallthrough
CT: control target
= control target key end

     0   :  { %s973_s15 = smov 0   ;;  %s1084_s0 = inlined_call_operand.vmem [shape: bf16[2,8,32], index: 0, kind: input, shape index: {}]   ;;  %s1085_s1 = inlined_call_operand.vmem [shape: bf16[2,8,32], index: 1, kind: input, shape index: {}]   ;;  %s1086_s2 = inlined_call_operand.vmem [shape: bf16[2,8,32], index: 2, kind: input, shape index: {}]   ;;  %s1087_s3 = inlined_call_operand.vmem [shape: f32[2,8,8], index: 3, kind: input, shape index: {}]   ;;  %s1088_s4 = inlined_call_operand.vmem [shape: f32[2,8,32], index: 4, kind: output, shape index: {}]  }
   0x1 LB: > { %s810_s16 = sadd.s32 4294967295, %s938_s15   ;;  %p814_p0 = scmp.ge.s32.totalorder %s938_s15, 1  ;;  %s938_s15 = sphi %s973_s15, %s14_s15  }
   0x2   : > { %p188_p1 = scmp.lt.s32.totalorder %s938_s15, 3 }
   0x4   : > { %p189_p2 = pnand %p814_p0, %p188_p1 }
   0x5   : > { %p224_p3 = scmp.lt.s32.totalorder (!%p189_p2), %s810_s16, 1  ;;  %v940_v0 = vmov (!%p189_p2), 0.0   ;;  %vm941_vm0 = vmmov (!%p189_p2), 0   ;;  %vm249_vm1 = vcmask (!%p189_p2), 64512   ;;  %s942_s28 = smov (!%p189_p2), 120   ;;  %vm313_vm2 = vcmask (!%p189_p2), 1043456  }
   0x6   : > { %192 = sbr.rel (%p189_p2) target bundleno = 1479 (0x5c7), region = 36  ;;  %849 = vmatprep.subr.bf16.mxu0 (!%p189_p2), %v940_v0  ;;  %851 = vmatprep.mubr.msk.bf16.mxu0 (!%p189_p2), %vm941_vm0, %v940_v0  ;;  %s943_s29 = smov (!%p189_p2), 112   ;;  %vm715_vm3 = vcmask (!%p189_p2), 130048   ;;  %vm717_vm4 = vcmask (!%p189_p2), 195584   ;;  %vm719_vm5 = vcmask (!%p189_p2), 261120  }
   0x7   : > { %855 = vmatprep.subr.bf16.mxu1 (!%p189_p2), %v940_v0  ;;  %857 = vmatprep.mubr.msk.bf16.mxu1 (!%p189_p2), %vm941_vm0, %v940_v0  ;;  %s944_s30 = smov (!%p189_p2), 104   ;;  %s945_s8 = smov (!%p189_p2), 8  }
   0x8   : > { %s946_s9 = smov (!%p189_p2), 16   ;;  %s947_s10 = smov (!%p189_p2), 24  }
   0xd   : > { %s1090_s16 = smov (!%p224_p3, %s810_s16), 1 }
   0xe   : > { %s990_s17 = sshll.u32 %s1090_s16, 2  ;;  %s818_s24 = sshll.u32 %s1090_s16, 3 }
   0xf   : > { %s231_s20 = scalar_lea.vmem %s1085_s1, %s990_s17  ;;  %s227_s23 = scalar_lea.vmem %s1084_s0, %s990_s17 }
  0x10   : > { %v247_v1 = vld [vmem:[%s231_s20] sm:$0xf]  ;;  %s239_s27 = scalar_lea.vmem %s1087_s3, %s818_s24  ;;  %s235_s7 = scalar_lea.vmem %s1086_s2, %s990_s17 }
  0x11   : > { %v254_v2 = vsel %vm249_vm1, %v247_v1, 0  ;;  %v246_v3 = vld [vmem:[%s227_s23] sm:$0xf]  ;;  %v823_v12 = vcombine.low %v247_v1, %v247_v1  ;;  %s243_s13 = scalar_lea.vmem %s1088_s4, %s818_s24 }
  0x12   : > { %850 = vmatpush3.bf16.xpose.msra.mxu0 %v254_v2  ;;  %v1011_v5 = vld [vmem:[%s239_s27] sm:$0xff]  ;;  %v822_v13 = vcombine.low %v246_v3, %v246_v3 }
  0x13   : > { %867 = vmatprep.subr.bf16.mxu0 %v940_v0  ;;  %365 = vrot.lane.b32.xlu1 %v823_v12, %s942_s28  ;;  %v1025_v19 = vld [vmem:[%s235_s7] sm:$0xf] }
  0x14   : > { %v315_v20 = vsel %vm313_vm2, %v1025_v19, 0 }
  0x15   : > { %856 = vmatpush3.bf16.msra.mxu1 %v315_v20 }
  0x16   : > { %861 = vmatprep.subr.bf16.mxu1 %v940_v0 }
  0x17   : > { %360 = vrot.lane.b32.xlu1 %v822_v13, %s942_s28 }
  0x19   : > { %852 = vmatmul.mubr.msk.bf16.vlgmr.msra.gmra.mrb[0].mxu0 %vm249_vm1, %v246_v3 }
  0x1a   : > { %869 = vmatprep.mubr.msk.bf16.mxu0 %vm941_vm0, %v940_v0 }
  0x1b   : > { %478 = vrot.lane.b32.xlu1 %v822_v13, %s943_s29 }
  0x1f   : > { %592 = vrot.lane.b32.xlu1 %v823_v12, %s944_s30 }
  0x23   : > { %590 = vrot.lane.b32.xlu1 %v822_v13, %s944_s30 }
  0x85   : > { %v366_v23 = vpop.permute.xlu1 %365 }
  0x86   : > { %v371_v25 = vsel %vm249_vm1, %v366_v23, 0 }
  0x89   : > { %v361_v27 = vpop.permute.xlu1 %360 }
  0x8d   : > { %v479_v29 = vpop.permute.xlu1 %478 }
  0x91   : > { %v593_v31 = vpop.permute.xlu1 %592 }
  0x92   : > { %v598_v32 = vsel %vm249_vm1, %v593_v31, 0 }
  0x95   : > { %v591_v33 = vpop.permute.xlu1 %590 }
  0xec   : > { %v290_v4 = vpop.f32.mrb[0].mxu0 }
  0xed   : > { %v296_v6 = vmul.f32 0.35355338, %v290_v4  ;;  %v853_v7 = vpop.f32.mrb[1].mxu0 }
  0xee   : > { %v293_v8 = vpop.f32.mrb[2].mxu0 }
  0xef   : > { %v854_v9 = vpop.f32.mrb[3].mxu0  ;;  %v297_v10 = vadd.f32 %v296_v6, %v1011_v5 }
  0xf1   : > { %v298_v11 = vsel %vm249_vm1, %v297_v10, -inf }
  0xf2   : > { %299 = vmax.xlane.f32.xlu0 %v298_v11 }
 0x17f   : > { %v300_v14 = vpop.xlane.xlu0 %299 }
 0x180   : > { %v301_v15 = vsub.f32 %v297_v10, %v300_v14 }
 0x182   : > { %v302_v16 = vmul.f32 1.442695, %v301_v15 }
 0x184   : > { %916 = vpow2.f32 %v302_v16 }
 0x18e   : > { %v917_v17 = vpop.eup %916 }
 0x18f   : > { %v304_v18 = vsel %vm249_vm1, %v917_v17, 0.0 }
 0x190   : > { %305 = vadd.xlane.f32.xlu0 %v304_v18 }
 0x1a6   : > { %480 = vrot.lane.b32.xlu0 %v823_v12, %s943_s29 }
 0x21d   : > { %v306_v21 = vpop.xlane.xlu0 %305 }
 0x21e   : > { %918 = vrcp.f32 %v306_v21 }
 0x221   : > { %v481_v28 = vpop.permute.xlu0 %480 }
 0x222   : > { %v486_v30 = vsel %vm249_vm1, %v481_v28, 0 }
 0x228   : > { %v919_v22 = vpop.eup %918 }
 0x229   : > { %v308_v24 = vmul.f32 %v919_v22, %v917_v17 }
 0x22b   : > { %v309_v26 = vpack.c.bf16 %v308_v24, %v308_v24 }
 0x22d   : > { %858 = vmatmul.mubr.msk.bf16.vlgmr.msra.gmra.mrb[0].mxu1 %vm249_vm1, %v309_v26 }
 0x22e   : > { %862 = vmatpush3.bf16.xpose.msra.mxu1 %v371_v25  ;;  %863 = vmatprep.mubr.msk.bf16.mxu1 %vm941_vm0, %v940_v0 }
 0x22f   : > { %873 = vmatprep.subr.bf16.mxu1 %v940_v0 }
 0x235   : > { %864 = vmatmul.mubr.msk.bf16.vlgmr.msra.gmra.mrb[4].mxu1 %vm249_vm1, %v361_v27 }
 0x236   : > { %874 = vmatpush3.bf16.xpose.msra.mxu1 %v486_v30  ;;  %875 = vmatprep.mubr.msk.bf16.mxu1 %vm941_vm0, %v940_v0 }
 0x237   : > { %885 = vmatprep.subr.bf16.mxu1 %v940_v0 }
 0x23d   : > { %876 = vmatmul.mubr.msk.bf16.vlgmr.msra.gmra.mrb[8].mxu1 %vm249_vm1, %v479_v29 }
 0x23e   : > { %886 = vmatpush3.bf16.xpose.msra.mxu1 %v598_v32  ;;  %887 = vmatprep.mubr.msk.bf16.mxu1 %vm941_vm0, %v940_v0 }
 0x245   : > { %888 = vmatmul.mubr.msk.bf16.vlgmr.msra.gmra.mrb[12].mxu1 %vm249_vm1, %v591_v33 }
 0x300   : > { %v1046_v34 = vpop.f32.mrb[0].mxu1 }
 0x301   : > { %v859_v35 = vpop.f32.mrb[1].mxu1 }
 0x302   : > { %v354_v36 = vpop.f32.mrb[2].mxu1 }
 0x303   : > { %v860_v37 = vpop.f32.mrb[3].mxu1 }
 0x308   : > { %v407_v38 = vpop.f32.mrb[4].mxu1 }
 0x309   : > { %v413_v39 = vmul.f32 0.35355338, %v407_v38  ;;  %v865_v40 = vpop.f32.mrb[5].mxu1 }
 0x30a   : > { %v410_v41 = vpop.f32.mrb[6].mxu1 }
 0x30b   : > { %v866_v42 = vpop.f32.mrb[7].mxu1  ;;  %v414_v43 = vadd.f32 %v413_v39, %v1011_v5 }
 0x30d   : > { %v415_v44 = vsel %vm249_vm1, %v414_v43, -inf }
 0x30e   : > { %416 = vmax.xlane.f32.xlu1 %v415_v44 }
 0x310   : > { %v522_v45 = vpop.f32.mrb[8].mxu1 }
 0x311   : > { %v528_v46 = vmul.f32 0.35355338, %v522_v45  ;;  %v877_v47 = vpop.f32.mrb[9].mxu1 }
 0x312   : > { %v525_v48 = vpop.f32.mrb[10].mxu1 }
 0x313   : > { %v529_v49 = vadd.f32 %v528_v46, %v1011_v5  ;;  %v878_v50 = vpop.f32.mrb[11].mxu1 }
 0x315   : > { %v530_v51 = vsel %vm249_vm1, %v529_v49, -inf }
 0x316   : > { %531 = vmax.xlane.f32.xlu0 %v530_v51 }
 0x318   : > { %v634_v52 = vpop.f32.mrb[12].mxu1 }
 0x319   : > { %v640_v53 = vmul.f32 0.35355338, %v634_v52  ;;  %v889_v54 = vpop.f32.mrb[13].mxu1 }
 0x31a   : > { %v637_v55 = vpop.f32.mrb[14].mxu1 }
 0x31b   : > { %v641_v56 = vadd.f32 %v640_v53, %v1011_v5  ;;  %v890_v57 = vpop.f32.mrb[15].mxu1  ;;  %v825_v5 = vcombine.low %v1025_v19, %v1025_v19 }
 0x31d   : > { %v642_v58 = vsel %vm249_vm1, %v641_v56, -inf }
 0x31e   : > { %643 = vmax.xlane.f32.xlu1 %v642_v58 }
 0x39b   : > { %v417_v59 = vpop.xlane.xlu1 %416 }
 0x39c   : > { %v418_v60 = vsub.f32 %v414_v43, %v417_v59 }
 0x39e   : > { %v419_v61 = vmul.f32 1.442695, %v418_v60 }
 0x3a0   : > { %920 = vpow2.f32 %v419_v61 }
 0x3a3   : > { %v532_v62 = vpop.xlane.xlu0 %531 }
 0x3a4   : > { %v533_v63 = vsub.f32 %v529_v49, %v532_v62 }
 0x3a6   : > { %v534_v1 = vmul.f32 1.442695, %v533_v63 }
 0x3a8   : > { %922 = vpow2.f32 %v534_v1 }
 0x3aa   : > { %v921_v2 = vpop.eup %920 }
 0x3ab   : > { %v421_v3 = vsel %vm249_vm1, %v921_v2, 0.0  ;;  %v644_v7 = vpop.xlane.xlu1 %643 }
 0x3ac   : > { %422 = vadd.xlane.f32.xlu1 %v421_v3  ;;  %v645_v8 = vsub.f32 %v641_v56, %v644_v7 }
 0x3ae   : > { %v646_v9 = vmul.f32 1.442695, %v645_v8 }
 0x3b0   : > { %924 = vpow2.f32 %v646_v9 }
 0x3b2   : > { %v923_v4 = vpop.eup %922 }
 0x3b3   : > { %v536_v6 = vsel %vm249_vm1, %v923_v4, 0.0 }
 0x3b4   : > { %537 = vadd.xlane.f32.xlu0 %v536_v6 }
 0x3ba   : > { %v925_v10 = vpop.eup %924 }
 0x3bb   : > { %v648_v11 = vsel %vm249_vm1, %v925_v10, 0.0 }
 0x3bd   : > { %542 = vrot.lane.b32.xlu1 %v825_v5, %s943_s29 }
 0x3ca   : > { %430 = vrot.lane.b32.xlu0 %v825_v5, %s942_s28 }
 0x3e1   : > { %649 = vadd.xlane.f32.xlu1 %v648_v11 }
 0x3f2   : > { %654 = vrot.lane.b32.xlu1 %v825_v5, %s944_s30 }
 0x439   : > { %v423_v12 = vpop.xlane.xlu1 %422 }
 0x43a   : > { %926 = vrcp.f32 %v423_v12 }
 0x43d   : > { %v543_v18 = vpop.permute.xlu1 %542 }
 0x43e   : > { %v548_v20 = vsel %vm313_vm2, %v543_v18, 0 }
 0x441   : > { %v538_v13 = vpop.xlane.xlu0 %537 }
 0x442   : > { %928 = vrcp.f32 %v538_v13 }
 0x444   : > { %v927_v14 = vpop.eup %926 }
 0x445   : > { %v425_v15 = vmul.f32 %v927_v14, %v921_v2  ;;  %v431_v16 = vpop.permute.xlu0 %430 }
 0x446   : > { %v436_v17 = vsel %vm313_vm2, %v431_v16, 0 }
 0x447   : > { %868 = vmatpush3.bf16.msra.mxu0 %v436_v17  ;;  %v426_v19 = vpack.c.bf16 %v425_v15, %v425_v15 }
 0x448   : > { %879 = vmatprep.subr.bf16.mxu0 %v940_v0 }
 0x44a   : > { %870 = vmatmul.mubr.msk.bf16.vlgmr.msra.gmra.mrb[4].mxu0 %vm249_vm1, %v426_v19 }
 0x44b   : > { %880 = vmatpush3.bf16.msra.mxu0 %v548_v20  ;;  %881 = vmatprep.mubr.msk.bf16.mxu0 %vm941_vm0, %v940_v0 }
 0x44c   : > { %v929_v21 = vpop.eup %928  ;;  %891 = vmatprep.subr.bf16.mxu0 %v940_v0 }
 0x44d   : > { %v540_v22 = vmul.f32 %v929_v21, %v923_v4 }
 0x44f   : > { %v541_v23 = vpack.c.bf16 %v540_v22, %v540_v22 }
 0x452   : > { %882 = vmatmul.mubr.msk.bf16.vlgmr.msra.gmra.mrb[8].mxu0 %vm249_vm1, %v541_v23 }
 0x453   : > { %893 = vmatprep.mubr.msk.bf16.mxu0 %vm941_vm0, %v940_v0 }
 0x46e   : > { %v650_v24 = vpop.xlane.xlu1 %649 }
 0x46f   : > { %930 = vrcp.f32 %v650_v24 }
 0x472   : > { %v655_v25 = vpop.permute.xlu1 %654 }
 0x473   : > { %v660_v26 = vsel %vm313_vm2, %v655_v25, 0 }
 0x474   : > { %892 = vmatpush3.bf16.msra.mxu0 %v660_v26 }
 0x479   : > { %v931_v27 = vpop.eup %930 }
 0x47a   : > { %v652_v28 = vmul.f32 %v931_v27, %v925_v10 }
 0x47c   : > { %v653_v29 = vpack.c.bf16 %v652_v28, %v652_v28 }
 0x47e   : > { %894 = vmatmul.mubr.msk.bf16.vlgmr.msra.gmra.mrb[12].mxu0 %vm249_vm1, %v653_v29 }
 0x51d   : > { %v472_v30 = vpop.f32.mrb[4].mxu0 }
 0x51e   : > { %703 = vrot.lane.b32.xlu0 %v472_v30, %s945_s8  ;;  %v871_v31 = vpop.f32.mrb[5].mxu0 }
 0x51f   : > { %v475_v32 = vpop.f32.mrb[6].mxu0 }
 0x520   : > { %v872_v33 = vpop.f32.mrb[7].mxu0 }
 0x525   : > { %v584_v35 = vpop.f32.mrb[8].mxu0 }
 0x526   : > { %707 = vrot.lane.b32.xlu1 %v584_v35, %s946_s9  ;;  %v883_v0 = vpop.f32.mrb[9].mxu0 }
 0x527   : > { %v587_v36 = vpop.f32.mrb[10].mxu0 }
 0x528   : > { %v884_v37 = vpop.f32.mrb[11].mxu0 }
 0x551   : > { %v696_v38 = vpop.f32.mrb[12].mxu0 }
 0x552   : > { %711 = vrot.lane.b32.xlu0 %v696_v38, %s947_s10  ;;  %v895_v39 = vpop.f32.mrb[13].mxu0 }
 0x553   : > { %v699_v40 = vpop.f32.mrb[14].mxu0 }
 0x554   : > { %v896_v41 = vpop.f32.mrb[15].mxu0 }
 0x590   : > { %v704_v42 = vpop.permute.xlu0 %703 }
 0x591   : > { %v714_v44 = vsel %vm249_vm1, %v1046_v34, %v704_v42 }
 0x598   : > { %v708_v43 = vpop.permute.xlu1 %707 }
 0x599   : > { %v716_v45 = vsel %vm715_vm3, %v714_v44, %v708_v43 }
 0x5c4   : > { %v712_v46 = vpop.permute.xlu0 %711 }
 0x5c5   : > { %v718_v47 = vsel %vm717_vm4, %v716_v45, %v712_v46 }
 0x5c6   : > { %720 = vst.msk [vmem:[%s243_s13] sm:$0xff] %vm719_vm5, %v718_v47 }
 0x5c7 PF: > { %s14_s15 = sadd.s32 1, %s938_s15  }
 0x5c8   : > { %p11_p4 = scmp.ge.s32.totalorder %s14_s15, 4  }
 0x5ca   :  { %13 = sbr.rel (!%p11_p4) target bundleno = 1 (0x1), region = 75 }

</bundles_post_ra>
